<compile_context>
chip_gen: v5e
topology: v5e:2x2
jax: 0.10.0
libtpu: 0.0.40
codegen_flags: <defaults>
</compile_context>

<pallas_src>
import jax
import jax.numpy as jnp
import numpy as np
from jax.experimental import pallas as pl
from jax.experimental.pallas import tpu as pltpu


def prepare_params(params, compute_dtype=jnp.float32):
    """One-time parameter prep: per-gate split, transpose, bias fold, O padding."""
    H = params["w_hh0"].shape[1]
    O = params["w_out"].shape[0]
    O_pad = ((O + 127) // 128) * 128

    def gates_t(w):
        # (4H, Din) -> (4, Din, H); gate order (i, f, g, o) as in PyTorch.
        din = w.shape[1]
        return jnp.transpose(w.reshape(4, H, din), (0, 2, 1)).astype(compute_dtype)

    def gate_bias(bih, bhh):
        # Combined per-gate bias, folded into the hoisted input projection (f32).
        return (bih + bhh).reshape(4, 1, H).astype(jnp.float32)

    w_out_p = jnp.zeros((H, O_pad), compute_dtype).at[:, :O].set(
        params["w_out"].T.astype(compute_dtype))
    b_out_p = jnp.zeros((1, O_pad), jnp.float32).at[:, :O].set(
        params["b_out"].astype(jnp.float32))

    return {
        "wih0": gates_t(params["w_ih0"]), "whh0": gates_t(params["w_hh0"]),
        "b0": gate_bias(params["b_ih0"], params["b_hh0"]),
        "wih1": gates_t(params["w_ih1"]), "whh1": gates_t(params["w_hh1"]),
        "b1": gate_bias(params["b_ih1"], params["b_hh1"]),
        "w_out": w_out_p, "b_out": b_out_p,
        "H": H, "O": O,
    }


def lstm_forward(x, prepped):
    S, B, D = x.shape
    H = prepped["H"]
    O = prepped["O"]
    O_pad = prepped["w_out"].shape[1]
    w_dtype = prepped["wih0"].dtype

    x2d = x.reshape(S * B, D).astype(w_dtype)   # flat, time-major: row t*B+b

    def kernel(x_ref,                            # (S*B, D)
               wih0_ref, whh0_ref, b0_ref,       # (4,D,H), (4,H,H), (4,1,H)
               wih1_ref, whh1_ref, b1_ref,       # (4,H,H), (4,H,H), (4,1,H)
               wout_ref, bout_ref,               # (H,O_pad), (1,O_pad)
               y_ref,                            # (S*B, O_pad)
               h_all,                            # scratch (S*B, H)
               xp_i, xp_f, xp_g, xp_o,           # scratch (S*B, H) each
               h_st, c_st):                      # scratch (B, H) each

        def run_layer(inp_ref, wih_ref, whh_ref, b_ref):
            # ---- hoisted full-sequence per-gate input projection (+ bias) ----
            inp = inp_ref[...].astype(w_dtype)   # (S*B, Din)
            xp_i[...] = jnp.dot(inp, wih_ref[0],
                                preferred_element_type=jnp.float32) + b_ref[0]
            xp_f[...] = jnp.dot(inp, wih_ref[1],
                                preferred_element_type=jnp.float32) + b_ref[1]
            xp_g[...] = jnp.dot(inp, wih_ref[2],
                                preferred_element_type=jnp.float32) + b_ref[2]
            xp_o[...] = jnp.dot(inp, wih_ref[3],
                                preferred_element_type=jnp.float32) + b_ref[3]

            # Per-gate recurrent weights, loaded once (no 4H slicing in the loop).
            w_i = whh_ref[0]
            w_f = whh_ref[1]
            w_g = whh_ref[2]
            w_o = whh_ref[3]

            # PyTorch default zero initial hidden / cell state.
            h_st[...] = jnp.zeros_like(h_st)
            c_st[...] = jnp.zeros_like(c_st)

            def step(t, carry):
                row = pl.multiple_of(t * B, B)
                h = h_st[...].astype(w_dtype)
                i = jax.nn.sigmoid(
                    xp_i[pl.ds(row, B), :]
                    + jnp.dot(h, w_i, preferred_element_type=jnp.float32))
                f = jax.nn.sigmoid(
                    xp_f[pl.ds(row, B), :]
                    + jnp.dot(h, w_f, preferred_element_type=jnp.float32))
                g = jnp.tanh(
                    xp_g[pl.ds(row, B), :]
                    + jnp.dot(h, w_g, preferred_element_type=jnp.float32))
                o = jax.nn.sigmoid(
                    xp_o[pl.ds(row, B), :]
                    + jnp.dot(h, w_o, preferred_element_type=jnp.float32))
                c = f * c_st[...] + i * g
                h_new = o * jnp.tanh(c)
                c_st[...] = c
                h_st[...] = h_new
                h_all[pl.ds(row, B), :] = h_new
                return carry

            # S is static -> fully unroll so consecutive steps overlap in the
            # VLIW schedule (MXU push/pop of step t under VPU math of step t-1).
            jax.lax.fori_loop(0, S, step, 0, unroll=True)

        run_layer(x_ref, wih0_ref, whh0_ref, b0_ref)    # layer 0: consumes x
        run_layer(h_all, wih1_ref, whh1_ref, b1_ref)    # layer 1: consumes layer-0 h

        # Final Linear head on the flat (S*B, H) slab; output is lane-dense
        # (O padded to a multiple of 128 -> unmasked stores).
        y_ref[...] = (jnp.dot(h_all[...].astype(w_dtype), wout_ref[...],
                              preferred_element_type=jnp.float32)
                      + bout_ref[...])

    vmem = pl.BlockSpec(memory_space=pltpu.MemorySpace.VMEM)
    y_pad = pl.pallas_call(
        kernel,
        out_shape=jax.ShapeDtypeStruct((S * B, O_pad), jnp.float32),
        in_specs=[vmem] * 9,
        out_specs=vmem,
        scratch_shapes=[
            pltpu.VMEM((S * B, H), jnp.float32),   # h_all (per-layer outputs, flat)
            pltpu.VMEM((S * B, H), jnp.float32),   # xp_i
            pltpu.VMEM((S * B, H), jnp.float32),   # xp_f
            pltpu.VMEM((S * B, H), jnp.float32),   # xp_g
            pltpu.VMEM((S * B, H), jnp.float32),   # xp_o
            pltpu.VMEM((B, H), jnp.float32),       # h state
            pltpu.VMEM((B, H), jnp.float32),       # c state
        ],
    )(x2d, prepped["wih0"], prepped["whh0"], prepped["b0"],
      prepped["wih1"], prepped["whh1"], prepped["b1"],
      prepped["w_out"], prepped["b_out"])

    return y_pad[:, :O].reshape(S, B, O)


def lstm_ref(x, params):
    """Pure-JAX reference (PyTorch nn.LSTM semantics) for correctness check."""
    S, B, _ = x.shape
    H = params["w_hh0"].shape[1]

    def layer(inp, wih, whh, bih, bhh):
        h = jnp.zeros((B, H), jnp.float32)
        c = jnp.zeros((B, H), jnp.float32)
        outs = []
        for t in range(S):
            gates = inp[t] @ wih.T + bih + h @ whh.T + bhh
            i = jax.nn.sigmoid(gates[:, 0 * H:1 * H])
            f = jax.nn.sigmoid(gates[:, 1 * H:2 * H])
            g = jnp.tanh(gates[:, 2 * H:3 * H])
            o = jax.nn.sigmoid(gates[:, 3 * H:4 * H])
            c = f * c + i * g
            h = o * jnp.tanh(c)
            outs.append(h)
        return jnp.stack(outs, axis=0)

    h0 = layer(x, params["w_ih0"], params["w_hh0"], params["b_ih0"], params["b_hh0"])
    h1 = layer(h0, params["w_ih1"], params["w_hh1"], params["b_ih1"], params["b_hh1"])
    y = h1.reshape(S * B, H) @ params["w_out"].T + params["b_out"]
    return y.reshape(S, B, -1)


def init_params(key, input_size, hidden_size, output_size):
    k = 1.0 / np.sqrt(hidden_size)
    keys = jax.random.split(key, 10)

    def u(k_, shape):
        return jax.random.uniform(k_, shape, jnp.float32, -k, k)

    return {
        "w_ih0": u(keys[0], (4 * hidden_size, input_size)),
        "w_hh0": u(keys[1], (4 * hidden_size, hidden_size)),
        "b_ih0": u(keys[2], (4 * hidden_size,)),
        "b_hh0": u(keys[3], (4 * hidden_size,)),
        "w_ih1": u(keys[4], (4 * hidden_size, hidden_size)),
        "w_hh1": u(keys[5], (4 * hidden_size, hidden_size)),
        "b_ih1": u(keys[6], (4 * hidden_size,)),
        "b_hh1": u(keys[7], (4 * hidden_size,)),
        "w_out": u(keys[8], (output_size, hidden_size)),
        "b_out": u(keys[9], (output_size,)),
    }


if __name__ == "__main__":
    SEQ, BATCH, INPUT, HIDDEN, OUT = 8, 2, 16, 32, 1

    key = jax.random.PRNGKey(0)
    kx, kp = jax.random.split(key)
    x = jax.random.normal(kx, (SEQ, BATCH, INPUT), jnp.float32)
    params = init_params(kp, INPUT, HIDDEN, OUT)

    # One-time parameter prep (per-gate split / transpose / pad), outside the
    # per-call path.  Use compute_dtype=jnp.bfloat16 for 2x MXU throughput at
    # production sizes (loosen the tolerance accordingly); f32 here for the
    # strict check against the f32 reference.
    prepped = prepare_params(params, compute_dtype=jnp.float32)

    y = lstm_forward(x, prepped)
    jax.block_until_ready(y)

    y_ref = lstm_ref(x, params)
    np.testing.assert_allclose(np.asarray(y), np.asarray(y_ref), rtol=1e-4, atol=1e-5)

    print("KERNEL_OK")
</pallas_src>

<mosaic_0001>
module attributes {stable_mosaic.version = 11 : i64} {
  func.func @kernel(%arg0: memref<16x16xf32, #tpu.memory_space<vmem>>, %arg1: memref<4x16x32xf32, #tpu.memory_space<vmem>>, %arg2: memref<4x32x32xf32, #tpu.memory_space<vmem>>, %arg3: memref<4x1x32xf32, #tpu.memory_space<vmem>>, %arg4: memref<4x32x32xf32, #tpu.memory_space<vmem>>, %arg5: memref<4x32x32xf32, #tpu.memory_space<vmem>>, %arg6: memref<4x1x32xf32, #tpu.memory_space<vmem>>, %arg7: memref<32x128xf32, #tpu.memory_space<vmem>>, %arg8: memref<1x128xf32, #tpu.memory_space<vmem>>, %arg9: memref<16x128xf32, #tpu.memory_space<vmem>>, %arg10: memref<16x32xf32, #tpu.memory_space<vmem>>, %arg11: memref<16x32xf32, #tpu.memory_space<vmem>>, %arg12: memref<16x32xf32, #tpu.memory_space<vmem>>, %arg13: memref<16x32xf32, #tpu.memory_space<vmem>>, %arg14: memref<16x32xf32, #tpu.memory_space<vmem>>, %arg15: memref<2x32xf32, #tpu.memory_space<vmem>>, %arg16: memref<2x32xf32, #tpu.memory_space<vmem>>) attributes {dimension_semantics = [], scalar_prefetch = 0 : i64, scratch_operands = 7 : i64, tpu.core_type = #tpu.core_type<tc>} {
    %c0 = arith.constant 0 : index
    %c0_0 = arith.constant 0 : index
    %0 = vector.load %arg0[%c0, %c0_0] : memref<16x16xf32, #tpu.memory_space<vmem>>, vector<16x16xf32>
    %c0_1 = arith.constant 0 : index
    %c0_2 = arith.constant 0 : index
    %c0_3 = arith.constant 0 : index
    %1 = vector.load %arg1[%c0_1, %c0_2, %c0_3] : memref<4x16x32xf32, #tpu.memory_space<vmem>>, vector<1x16x32xf32>
    %2 = vector.shape_cast %1 : vector<1x16x32xf32> to vector<16x32xf32>
    %cst = arith.constant dense<0.000000e+00> : vector<16x32xf32>
    %3 = tpu.matmul %0, %2, %cst {dimension_numbers = #tpu.dot_dimension_numbers<[1], [0], [0], [1], [0, 0, 1, 1], [], []>} : vector<16x16xf32>, vector<16x32xf32>, vector<16x32xf32> -> vector<16x32xf32>
    %c0_4 = arith.constant 0 : index
    %c0_5 = arith.constant 0 : index
    %c0_6 = arith.constant 0 : index
    %4 = vector.load %arg3[%c0_4, %c0_5, %c0_6] : memref<4x1x32xf32, #tpu.memory_space<vmem>>, vector<1x1x32xf32>
    %5 = vector.shape_cast %4 : vector<1x1x32xf32> to vector<1x32xf32>
    %6 = vector.broadcast %5 : vector<1x32xf32> to vector<16x32xf32>
    %7 = arith.addf %3, %6 : vector<16x32xf32>
    %c0_7 = arith.constant 0 : index
    %c0_8 = arith.constant 0 : index
    %8 = vector.load %arg11[%c0_7, %c0_8] : memref<16x32xf32, #tpu.memory_space<vmem>>, vector<16x32xf32>
    tpu.vector_store %arg11[%c0_7, %c0_8], %7 {strides = array<i32>} : memref<16x32xf32, #tpu.memory_space<vmem>>, vector<16x32xf32>,
    %c1 = arith.constant 1 : index
    %c0_9 = arith.constant 0 : index
    %c0_10 = arith.constant 0 : index
    %9 = vector.load %arg1[%c1, %c0_9, %c0_10] : memref<4x16x32xf32, #tpu.memory_space<vmem>>, vector<1x16x32xf32>
    %10 = vector.shape_cast %9 : vector<1x16x32xf32> to vector<16x32xf32>
    %cst_11 = arith.constant dense<0.000000e+00> : vector<16x32xf32>
    %11 = tpu.matmul %0, %10, %cst_11 {dimension_numbers = #tpu.dot_dimension_numbers<[1], [0], [0], [1], [0, 0, 1, 1], [], []>} : vector<16x16xf32>, vector<16x32xf32>, vector<16x32xf32> -> vector<16x32xf32>
    %c1_12 = arith.constant 1 : index
    %c0_13 = arith.constant 0 : index
    %c0_14 = arith.constant 0 : index
    %12 = vector.load %arg3[%c1_12, %c0_13, %c0_14] : memref<4x1x32xf32, #tpu.memory_space<vmem>>, vector<1x1x32xf32>
    %13 = vector.shape_cast %12 : vector<1x1x32xf32> to vector<1x32xf32>
    %14 = vector.broadcast %13 : vector<1x32xf32> to vector<16x32xf32>
    %15 = arith.addf %11, %14 : vector<16x32xf32>
    %c0_15 = arith.constant 0 : index
    %c0_16 = arith.constant 0 : index
    %16 = vector.load %arg12[%c0_15, %c0_16] : memref<16x32xf32, #tpu.memory_space<vmem>>, vector<16x32xf32>
    tpu.vector_store %arg12[%c0_15, %c0_16], %15 {strides = array<i32>} : memref<16x32xf32, #tpu.memory_space<vmem>>, vector<16x32xf32>,
    %c2 = arith.constant 2 : index
    %c0_17 = arith.constant 0 : index
    %c0_18 = arith.constant 0 : index
    %17 = vector.load %arg1[%c2, %c0_17, %c0_18] : memref<4x16x32xf32, #tpu.memory_space<vmem>>, vector<1x16x32xf32>
    %18 = vector.shape_cast %17 : vector<1x16x32xf32> to vector<16x32xf32>
    %cst_19 = arith.constant dense<0.000000e+00> : vector<16x32xf32>
    %19 = tpu.matmul %0, %18, %cst_19 {dimension_numbers = #tpu.dot_dimension_numbers<[1], [0], [0], [1], [0, 0, 1, 1], [], []>} : vector<16x16xf32>, vector<16x32xf32>, vector<16x32xf32> -> vector<16x32xf32>
    %c2_20 = arith.constant 2 : index
    %c0_21 = arith.constant 0 : index
    %c0_22 = arith.constant 0 : index
    %20 = vector.load %arg3[%c2_20, %c0_21, %c0_22] : memref<4x1x32xf32, #tpu.memory_space<vmem>>, vector<1x1x32xf32>
    %21 = vector.shape_cast %20 : vector<1x1x32xf32> to vector<1x32xf32>
    %22 = vector.broadcast %21 : vector<1x32xf32> to vector<16x32xf32>
    %23 = arith.addf %19, %22 : vector<16x32xf32>
    %c0_23 = arith.constant 0 : index
    %c0_24 = arith.constant 0 : index
    %24 = vector.load %arg13[%c0_23, %c0_24] : memref<16x32xf32, #tpu.memory_space<vmem>>, vector<16x32xf32>
    tpu.vector_store %arg13[%c0_23, %c0_24], %23 {strides = array<i32>} : memref<16x32xf32, #tpu.memory_space<vmem>>, vector<16x32xf32>,
    %c3 = arith.constant 3 : index
    %c0_25 = arith.constant 0 : index
    %c0_26 = arith.constant 0 : index
    %25 = vector.load %arg1[%c3, %c0_25, %c0_26] : memref<4x16x32xf32, #tpu.memory_space<vmem>>, vector<1x16x32xf32>
    %26 = vector.shape_cast %25 : vector<1x16x32xf32> to vector<16x32xf32>
    %cst_27 = arith.constant dense<0.000000e+00> : vector<16x32xf32>
    %27 = tpu.matmul %0, %26, %cst_27 {dimension_numbers = #tpu.dot_dimension_numbers<[1], [0], [0], [1], [0, 0, 1, 1], [], []>} : vector<16x16xf32>, vector<16x32xf32>, vector<16x32xf32> -> vector<16x32xf32>
    %c3_28 = arith.constant 3 : index
    %c0_29 = arith.constant 0 : index
    %c0_30 = arith.constant 0 : index
    %28 = vector.load %arg3[%c3_28, %c0_29, %c0_30] : memref<4x1x32xf32, #tpu.memory_space<vmem>>, vector<1x1x32xf32>
    %29 = vector.shape_cast %28 : vector<1x1x32xf32> to vector<1x32xf32>
    %30 = vector.broadcast %29 : vector<1x32xf32> to vector<16x32xf32>
    %31 = arith.addf %27, %30 : vector<16x32xf32>
    %c0_31 = arith.constant 0 : index
    %c0_32 = arith.constant 0 : index
    %32 = vector.load %arg14[%c0_31, %c0_32] : memref<16x32xf32, #tpu.memory_space<vmem>>, vector<16x32xf32>
    tpu.vector_store %arg14[%c0_31, %c0_32], %31 {strides = array<i32>} : memref<16x32xf32, #tpu.memory_space<vmem>>, vector<16x32xf32>,
    %c0_33 = arith.constant 0 : index
    %c0_34 = arith.constant 0 : index
    %c0_35 = arith.constant 0 : index
    %33 = vector.load %arg2[%c0_33, %c0_34, %c0_35] : memref<4x32x32xf32, #tpu.memory_space<vmem>>, vector<1x32x32xf32>
    %34 = vector.shape_cast %33 : vector<1x32x32xf32> to vector<32x32xf32>
    %c1_36 = arith.constant 1 : index
    %c0_37 = arith.constant 0 : index
    %c0_38 = arith.constant 0 : index
    %35 = vector.load %arg2[%c1_36, %c0_37, %c0_38] : memref<4x32x32xf32, #tpu.memory_space<vmem>>, vector<1x32x32xf32>
    %36 = vector.shape_cast %35 : vector<1x32x32xf32> to vector<32x32xf32>
    %c2_39 = arith.constant 2 : index
    %c0_40 = arith.constant 0 : index
    %c0_41 = arith.constant 0 : index
    %37 = vector.load %arg2[%c2_39, %c0_40, %c0_41] : memref<4x32x32xf32, #tpu.memory_space<vmem>>, vector<1x32x32xf32>
    %38 = vector.shape_cast %37 : vector<1x32x32xf32> to vector<32x32xf32>
    %c3_42 = arith.constant 3 : index
    %c0_43 = arith.constant 0 : index
    %c0_44 = arith.constant 0 : index
    %39 = vector.load %arg2[%c3_42, %c0_43, %c0_44] : memref<4x32x32xf32, #tpu.memory_space<vmem>>, vector<1x32x32xf32>
    %40 = vector.shape_cast %39 : vector<1x32x32xf32> to vector<32x32xf32>
    %cst_45 = arith.constant 0.000000e+00 : f32
    %41 = vector.broadcast %cst_45 : f32 to vector<2x32xf32>
    %c0_46 = arith.constant 0 : index
    %c0_47 = arith.constant 0 : index
    %42 = vector.load %arg15[%c0_46, %c0_47] : memref<2x32xf32, #tpu.memory_space<vmem>>, vector<2x32xf32>
    tpu.vector_store %arg15[%c0_46, %c0_47], %41 {strides = array<i32>} : memref<2x32xf32, #tpu.memory_space<vmem>>, vector<2x32xf32>,
    %cst_48 = arith.constant 0.000000e+00 : f32
    %43 = vector.broadcast %cst_48 : f32 to vector<2x32xf32>
    %c0_49 = arith.constant 0 : index
    %c0_50 = arith.constant 0 : index
    %44 = vector.load %arg16[%c0_49, %c0_50] : memref<2x32xf32, #tpu.memory_space<vmem>>, vector<2x32xf32>
    tpu.vector_store %arg16[%c0_49, %c0_50], %43 {strides = array<i32>} : memref<2x32xf32, #tpu.memory_space<vmem>>, vector<2x32xf32>,
    %c0_i32 = arith.constant 0 : i32
    %c2_i32 = arith.constant 2 : i32
    %45 = arith.muli %c0_i32, %c2_i32 : i32
    %46 = tpu.assume_multiple %45, 2 : i32
    %c0_51 = arith.constant 0 : index
    %c0_52 = arith.constant 0 : index
    %47 = vector.load %arg15[%c0_51, %c0_52] : memref<2x32xf32, #tpu.memory_space<vmem>>, vector<2x32xf32>
    %48 = arith.index_cast %46 : i32 to index
    %c0_53 = arith.constant 0 : index
    %49 = vector.load %arg11[%48, %c0_53] : memref<16x32xf32, #tpu.memory_space<vmem>>, vector<2x32xf32>
    %cst_54 = arith.constant dense<0.000000e+00> : vector<2x32xf32>
    %50 = tpu.matmul %47, %34, %cst_54 {dimension_numbers = #tpu.dot_dimension_numbers<[1], [0], [0], [1], [0, 0, 1, 1], [], []>} : vector<2x32xf32>, vector<32x32xf32>, vector<2x32xf32> -> vector<2x32xf32>
    %51 = arith.addf %49, %50 : vector<2x32xf32>
    %52 = arith.negf %51 : vector<2x32xf32>
    %53 = math.exp %52 : vector<2x32xf32>
    %cst_55 = arith.constant 1.000000e+00 : f32
    %54 = vector.broadcast %cst_55 : f32 to vector<2x32xf32>
    %55 = arith.addf %54, %53 : vector<2x32xf32>
    %56 = arith.divf %54, %55 : vector<2x32xf32>
    %57 = arith.index_cast %46 : i32 to index
    %c0_56 = arith.constant 0 : index
    %58 = vector.load %arg12[%57, %c0_56] : memref<16x32xf32, #tpu.memory_space<vmem>>, vector<2x32xf32>
    %cst_57 = arith.constant dense<0.000000e+00> : vector<2x32xf32>
    %59 = tpu.matmul %47, %36, %cst_57 {dimension_numbers = #tpu.dot_dimension_numbers<[1], [0], [0], [1], [0, 0, 1, 1], [], []>} : vector<2x32xf32>, vector<32x32xf32>, vector<2x32xf32> -> vector<2x32xf32>
    %60 = arith.addf %58, %59 : vector<2x32xf32>
    %61 = arith.negf %60 : vector<2x32xf32>
    %62 = math.exp %61 : vector<2x32xf32>
    %cst_58 = arith.constant 1.000000e+00 : f32
    %63 = vector.broadcast %cst_58 : f32 to vector<2x32xf32>
    %64 = arith.addf %63, %62 : vector<2x32xf32>
    %65 = arith.divf %63, %64 : vector<2x32xf32>
    %66 = arith.index_cast %46 : i32 to index
    %c0_59 = arith.constant 0 : index
    %67 = vector.load %arg13[%66, %c0_59] : memref<16x32xf32, #tpu.memory_space<vmem>>, vector<2x32xf32>
    %cst_60 = arith.constant dense<0.000000e+00> : vector<2x32xf32>
    %68 = tpu.matmul %47, %38, %cst_60 {dimension_numbers = #tpu.dot_dimension_numbers<[1], [0], [0], [1], [0, 0, 1, 1], [], []>} : vector<2x32xf32>, vector<32x32xf32>, vector<2x32xf32> -> vector<2x32xf32>
    %69 = arith.addf %67, %68 : vector<2x32xf32>
    %70 = math.tanh %69 : vector<2x32xf32>
    %71 = arith.index_cast %46 : i32 to index
    %c0_61 = arith.constant 0 : index
    %72 = vector.load %arg14[%71, %c0_61] : memref<16x32xf32, #tpu.memory_space<vmem>>, vector<2x32xf32>
    %cst_62 = arith.constant dense<0.000000e+00> : vector<2x32xf32>
    %73 = tpu.matmul %47, %40, %cst_62 {dimension_numbers = #tpu.dot_dimension_numbers<[1], [0], [0], [1], [0, 0, 1, 1], [], []>} : vector<2x32xf32>, vector<32x32xf32>, vector<2x32xf32> -> vector<2x32xf32>
    %74 = arith.addf %72, %73 : vector<2x32xf32>
    %75 = arith.negf %74 : vector<2x32xf32>
    %76 = math.exp %75 : vector<2x32xf32>
    %cst_63 = arith.constant 1.000000e+00 : f32
    %77 = vector.broadcast %cst_63 : f32 to vector<2x32xf32>
    %78 = arith.addf %77, %76 : vector<2x32xf32>
    %79 = arith.divf %77, %78 : vector<2x32xf32>
    %c0_64 = arith.constant 0 : index
    %c0_65 = arith.constant 0 : index
    %80 = vector.load %arg16[%c0_64, %c0_65] : memref<2x32xf32, #tpu.memory_space<vmem>>, vector<2x32xf32>
    %81 = arith.mulf %65, %80 : vector<2x32xf32>
    %82 = arith.mulf %56, %70 : vector<2x32xf32>
    %83 = arith.addf %81, %82 : vector<2x32xf32>
    %84 = math.tanh %83 : vector<2x32xf32>
    %85 = arith.mulf %79, %84 : vector<2x32xf32>
    %c0_66 = arith.constant 0 : index
    %c0_67 = arith.constant 0 : index
    %86 = vector.load %arg16[%c0_66, %c0_67] : memref<2x32xf32, #tpu.memory_space<vmem>>, vector<2x32xf32>
    tpu.vector_store %arg16[%c0_66, %c0_67], %83 {strides = array<i32>} : memref<2x32xf32, #tpu.memory_space<vmem>>, vector<2x32xf32>,
    %c0_68 = arith.constant 0 : index
    %c0_69 = arith.constant 0 : index
    %87 = vector.load %arg15[%c0_68, %c0_69] : memref<2x32xf32, #tpu.memory_space<vmem>>, vector<2x32xf32>
    tpu.vector_store %arg15[%c0_68, %c0_69], %85 {strides = array<i32>} : memref<2x32xf32, #tpu.memory_space<vmem>>, vector<2x32xf32>,
    %88 = arith.index_cast %46 : i32 to index
    %c0_70 = arith.constant 0 : index
    %89 = vector.load %arg10[%88, %c0_70] : memref<16x32xf32, #tpu.memory_space<vmem>>, vector<2x32xf32>
    tpu.vector_store %arg10[%88, %c0_70], %85 {strides = array<i32>} : memref<16x32xf32, #tpu.memory_space<vmem>>, vector<2x32xf32>,
    %c1_i32 = arith.constant 1 : i32
    %c2_i32_71 = arith.constant 2 : i32
    %90 = arith.muli %c1_i32, %c2_i32_71 : i32
    %91 = tpu.assume_multiple %90, 2 : i32
    %c0_72 = arith.constant 0 : index
    %c0_73 = arith.constant 0 : index
    %92 = vector.load %arg15[%c0_72, %c0_73] : memref<2x32xf32, #tpu.memory_space<vmem>>, vector<2x32xf32>
    %93 = arith.index_cast %91 : i32 to index
    %c0_74 = arith.constant 0 : index
    %94 = vector.load %arg11[%93, %c0_74] : memref<16x32xf32, #tpu.memory_space<vmem>>, vector<2x32xf32>
    %cst_75 = arith.constant dense<0.000000e+00> : vector<2x32xf32>
    %95 = tpu.matmul %92, %34, %cst_75 {dimension_numbers = #tpu.dot_dimension_numbers<[1], [0], [0], [1], [0, 0, 1, 1], [], []>} : vector<2x32xf32>, vector<32x32xf32>, vector<2x32xf32> -> vector<2x32xf32>
    %96 = arith.addf %94, %95 : vector<2x32xf32>
    %97 = arith.negf %96 : vector<2x32xf32>
    %98 = math.exp %97 : vector<2x32xf32>
    %cst_76 = arith.constant 1.000000e+00 : f32
    %99 = vector.broadcast %cst_76 : f32 to vector<2x32xf32>
    %100 = arith.addf %99, %98 : vector<2x32xf32>
    %101 = arith.divf %99, %100 : vector<2x32xf32>
    %102 = arith.index_cast %91 : i32 to index
    %c0_77 = arith.constant 0 : index
    %103 = vector.load %arg12[%102, %c0_77] : memref<16x32xf32, #tpu.memory_space<vmem>>, vector<2x32xf32>
    %cst_78 = arith.constant dense<0.000000e+00> : vector<2x32xf32>
    %104 = tpu.matmul %92, %36, %cst_78 {dimension_numbers = #tpu.dot_dimension_numbers<[1], [0], [0], [1], [0, 0, 1, 1], [], []>} : vector<2x32xf32>, vector<32x32xf32>, vector<2x32xf32> -> vector<2x32xf32>
    %105 = arith.addf %103, %104 : vector<2x32xf32>
    %106 = arith.negf %105 : vector<2x32xf32>
    %107 = math.exp %106 : vector<2x32xf32>
    %cst_79 = arith.constant 1.000000e+00 : f32
    %108 = vector.broadcast %cst_79 : f32 to vector<2x32xf32>
    %109 = arith.addf %108, %107 : vector<2x32xf32>
    %110 = arith.divf %108, %109 : vector<2x32xf32>
    %111 = arith.index_cast %91 : i32 to index
    %c0_80 = arith.constant 0 : index
    %112 = vector.load %arg13[%111, %c0_80] : memref<16x32xf32, #tpu.memory_space<vmem>>, vector<2x32xf32>
    %cst_81 = arith.constant dense<0.000000e+00> : vector<2x32xf32>
    %113 = tpu.matmul %92, %38, %cst_81 {dimension_numbers = #tpu.dot_dimension_numbers<[1], [0], [0], [1], [0, 0, 1, 1], [], []>} : vector<2x32xf32>, vector<32x32xf32>, vector<2x32xf32> -> vector<2x32xf32>
    %114 = arith.addf %112, %113 : vector<2x32xf32>
    %115 = math.tanh %114 : vector<2x32xf32>
    %116 = arith.index_cast %91 : i32 to index
    %c0_82 = arith.constant 0 : index
    %117 = vector.load %arg14[%116, %c0_82] : memref<16x32xf32, #tpu.memory_space<vmem>>, vector<2x32xf32>
    %cst_83 = arith.constant dense<0.000000e+00> : vector<2x32xf32>
    %118 = tpu.matmul %92, %40, %cst_83 {dimension_numbers = #tpu.dot_dimension_numbers<[1], [0], [0], [1], [0, 0, 1, 1], [], []>} : vector<2x32xf32>, vector<32x32xf32>, vector<2x32xf32> -> vector<2x32xf32>
    %119 = arith.addf %117, %118 : vector<2x32xf32>
    %120 = arith.negf %119 : vector<2x32xf32>
    %121 = math.exp %120 : vector<2x32xf32>
    %cst_84 = arith.constant 1.000000e+00 : f32
    %122 = vector.broadcast %cst_84 : f32 to vector<2x32xf32>
    %123 = arith.addf %122, %121 : vector<2x32xf32>
    %124 = arith.divf %122, %123 : vector<2x32xf32>
    %c0_85 = arith.constant 0 : index
    %c0_86 = arith.constant 0 : index
    %125 = vector.load %arg16[%c0_85, %c0_86] : memref<2x32xf32, #tpu.memory_space<vmem>>, vector<2x32xf32>
    %126 = arith.mulf %110, %125 : vector<2x32xf32>
    %127 = arith.mulf %101, %115 : vector<2x32xf32>
    %128 = arith.addf %126, %127 : vector<2x32xf32>
    %129 = math.tanh %128 : vector<2x32xf32>
    %130 = arith.mulf %124, %129 : vector<2x32xf32>
    %c0_87 = arith.constant 0 : index
    %c0_88 = arith.constant 0 : index
    %131 = vector.load %arg16[%c0_87, %c0_88] : memref<2x32xf32, #tpu.memory_space<vmem>>, vector<2x32xf32>
    tpu.vector_store %arg16[%c0_87, %c0_88], %128 {strides = array<i32>} : memref<2x32xf32, #tpu.memory_space<vmem>>, vector<2x32xf32>,
    %c0_89 = arith.constant 0 : index
    %c0_90 = arith.constant 0 : index
    %132 = vector.load %arg15[%c0_89, %c0_90] : memref<2x32xf32, #tpu.memory_space<vmem>>, vector<2x32xf32>
    tpu.vector_store %arg15[%c0_89, %c0_90], %130 {strides = array<i32>} : memref<2x32xf32, #tpu.memory_space<vmem>>, vector<2x32xf32>,
    %133 = arith.index_cast %91 : i32 to index
    %c0_91 = arith.constant 0 : index
    %134 = vector.load %arg10[%133, %c0_91] : memref<16x32xf32, #tpu.memory_space<vmem>>, vector<2x32xf32>
    tpu.vector_store %arg10[%133, %c0_91], %130 {strides = array<i32>} : memref<16x32xf32, #tpu.memory_space<vmem>>, vector<2x32xf32>,
    %c2_i32_92 = arith.constant 2 : i32
    %c2_i32_93 = arith.constant 2 : i32
    %135 = arith.muli %c2_i32_92, %c2_i32_93 : i32
    %136 = tpu.assume_multiple %135, 2 : i32
    %c0_94 = arith.constant 0 : index
    %c0_95 = arith.constant 0 : index
    %137 = vector.load %arg15[%c0_94, %c0_95] : memref<2x32xf32, #tpu.memory_space<vmem>>, vector<2x32xf32>
    %138 = arith.index_cast %136 : i32 to index
    %c0_96 = arith.constant 0 : index
    %139 = vector.load %arg11[%138, %c0_96] : memref<16x32xf32, #tpu.memory_space<vmem>>, vector<2x32xf32>
    %cst_97 = arith.constant dense<0.000000e+00> : vector<2x32xf32>
    %140 = tpu.matmul %137, %34, %cst_97 {dimension_numbers = #tpu.dot_dimension_numbers<[1], [0], [0], [1], [0, 0, 1, 1], [], []>} : vector<2x32xf32>, vector<32x32xf32>, vector<2x32xf32> -> vector<2x32xf32>
    %141 = arith.addf %139, %140 : vector<2x32xf32>
    %142 = arith.negf %141 : vector<2x32xf32>
    %143 = math.exp %142 : vector<2x32xf32>
    %cst_98 = arith.constant 1.000000e+00 : f32
    %144 = vector.broadcast %cst_98 : f32 to vector<2x32xf32>
    %145 = arith.addf %144, %143 : vector<2x32xf32>
    %146 = arith.divf %144, %145 : vector<2x32xf32>
    %147 = arith.index_cast %136 : i32 to index
    %c0_99 = arith.constant 0 : index
    %148 = vector.load %arg12[%147, %c0_99] : memref<16x32xf32, #tpu.memory_space<vmem>>, vector<2x32xf32>
    %cst_100 = arith.constant dense<0.000000e+00> : vector<2x32xf32>
    %149 = tpu.matmul %137, %36, %cst_100 {dimension_numbers = #tpu.dot_dimension_numbers<[1], [0], [0], [1], [0, 0, 1, 1], [], []>} : vector<2x32xf32>, vector<32x32xf32>, vector<2x32xf32> -> vector<2x32xf32>
    %150 = arith.addf %148, %149 : vector<2x32xf32>
    %151 = arith.negf %150 : vector<2x32xf32>
    %152 = math.exp %151 : vector<2x32xf32>
    %cst_101 = arith.constant 1.000000e+00 : f32
    %153 = vector.broadcast %cst_101 : f32 to vector<2x32xf32>
    %154 = arith.addf %153, %152 : vector<2x32xf32>
    %155 = arith.divf %153, %154 : vector<2x32xf32>
    %156 = arith.index_cast %136 : i32 to index
    %c0_102 = arith.constant 0 : index
    %157 = vector.load %arg13[%156, %c0_102] : memref<16x32xf32, #tpu.memory_space<vmem>>, vector<2x32xf32>
    %cst_103 = arith.constant dense<0.000000e+00> : vector<2x32xf32>
    %158 = tpu.matmul %137, %38, %cst_103 {dimension_numbers = #tpu.dot_dimension_numbers<[1], [0], [0], [1], [0, 0, 1, 1], [], []>} : vector<2x32xf32>, vector<32x32xf32>, vector<2x32xf32> -> vector<2x32xf32>
    %159 = arith.addf %157, %158 : vector<2x32xf32>
    %160 = math.tanh %159 : vector<2x32xf32>
    %161 = arith.index_cast %136 : i32 to index
    %c0_104 = arith.constant 0 : index
    %162 = vector.load %arg14[%161, %c0_104] : memref<16x32xf32, #tpu.memory_space<vmem>>, vector<2x32xf32>
    %cst_105 = arith.constant dense<0.000000e+00> : vector<2x32xf32>
    %163 = tpu.matmul %137, %40, %cst_105 {dimension_numbers = #tpu.dot_dimension_numbers<[1], [0], [0], [1], [0, 0, 1, 1], [], []>} : vector<2x32xf32>, vector<32x32xf32>, vector<2x32xf32> -> vector<2x32xf32>
    %164 = arith.addf %162, %163 : vector<2x32xf32>
    %165 = arith.negf %164 : vector<2x32xf32>
    %166 = math.exp %165 : vector<2x32xf32>
    %cst_106 = arith.constant 1.000000e+00 : f32
    %167 = vector.broadcast %cst_106 : f32 to vector<2x32xf32>
    %168 = arith.addf %167, %166 : vector<2x32xf32>
    %169 = arith.divf %167, %168 : vector<2x32xf32>
    %c0_107 = arith.constant 0 : index
    %c0_108 = arith.constant 0 : index
    %170 = vector.load %arg16[%c0_107, %c0_108] : memref<2x32xf32, #tpu.memory_space<vmem>>, vector<2x32xf32>
    %171 = arith.mulf %155, %170 : vector<2x32xf32>
    %172 = arith.mulf %146, %160 : vector<2x32xf32>
    %173 = arith.addf %171, %172 : vector<2x32xf32>
    %174 = math.tanh %173 : vector<2x32xf32>
    %175 = arith.mulf %169, %174 : vector<2x32xf32>
    %c0_109 = arith.constant 0 : index
    %c0_110 = arith.constant 0 : index
    %176 = vector.load %arg16[%c0_109, %c0_110] : memref<2x32xf32, #tpu.memory_space<vmem>>, vector<2x32xf32>
    tpu.vector_store %arg16[%c0_109, %c0_110], %173 {strides = array<i32>} : memref<2x32xf32, #tpu.memory_space<vmem>>, vector<2x32xf32>,
    %c0_111 = arith.constant 0 : index
    %c0_112 = arith.constant 0 : index
    %177 = vector.load %arg15[%c0_111, %c0_112] : memref<2x32xf32, #tpu.memory_space<vmem>>, vector<2x32xf32>
    tpu.vector_store %arg15[%c0_111, %c0_112], %175 {strides = array<i32>} : memref<2x32xf32, #tpu.memory_space<vmem>>, vector<2x32xf32>,
    %178 = arith.index_cast %136 : i32 to index
    %c0_113 = arith.constant 0 : index
    %179 = vector.load %arg10[%178, %c0_113] : memref<16x32xf32, #tpu.memory_space<vmem>>, vector<2x32xf32>
    tpu.vector_store %arg10[%178, %c0_113], %175 {strides = array<i32>} : memref<16x32xf32, #tpu.memory_space<vmem>>, vector<2x32xf32>,
    %c3_i32 = arith.constant 3 : i32
    %c2_i32_114 = arith.constant 2 : i32
    %180 = arith.muli %c3_i32, %c2_i32_114 : i32
    %181 = tpu.assume_multiple %180, 2 : i32
    %c0_115 = arith.constant 0 : index
    %c0_116 = arith.constant 0 : index
    %182 = vector.load %arg15[%c0_115, %c0_116] : memref<2x32xf32, #tpu.memory_space<vmem>>, vector<2x32xf32>
    %183 = arith.index_cast %181 : i32 to index
    %c0_117 = arith.constant 0 : index
    %184 = vector.load %arg11[%183, %c0_117] : memref<16x32xf32, #tpu.memory_space<vmem>>, vector<2x32xf32>
    %cst_118 = arith.constant dense<0.000000e+00> : vector<2x32xf32>
    %185 = tpu.matmul %182, %34, %cst_118 {dimension_numbers = #tpu.dot_dimension_numbers<[1], [0], [0], [1], [0, 0, 1, 1], [], []>} : vector<2x32xf32>, vector<32x32xf32>, vector<2x32xf32> -> vector<2x32xf32>
    %186 = arith.addf %184, %185 : vector<2x32xf32>
    %187 = arith.negf %186 : vector<2x32xf32>
    %188 = math.exp %187 : vector<2x32xf32>
    %cst_119 = arith.constant 1.000000e+00 : f32
    %189 = vector.broadcast %cst_119 : f32 to vector<2x32xf32>
    %190 = arith.addf %189, %188 : vector<2x32xf32>
    %191 = arith.divf %189, %190 : vector<2x32xf32>
    %192 = arith.index_cast %181 : i32 to index
    %c0_120 = arith.constant 0 : index
    %193 = vector.load %arg12[%192, %c0_120] : memref<16x32xf32, #tpu.memory_space<vmem>>, vector<2x32xf32>
    %cst_121 = arith.constant dense<0.000000e+00> : vector<2x32xf32>
    %194 = tpu.matmul %182, %36, %cst_121 {dimension_numbers = #tpu.dot_dimension_numbers<[1], [0], [0], [1], [0, 0, 1, 1], [], []>} : vector<2x32xf32>, vector<32x32xf32>, vector<2x32xf32> -> vector<2x32xf32>
    %195 = arith.addf %193, %194 : vector<2x32xf32>
    %196 = arith.negf %195 : vector<2x32xf32>
    %197 = math.exp %196 : vector<2x32xf32>
    %cst_122 = arith.constant 1.000000e+00 : f32
    %198 = vector.broadcast %cst_122 : f32 to vector<2x32xf32>
    %199 = arith.addf %198, %197 : vector<2x32xf32>
    %200 = arith.divf %198, %199 : vector<2x32xf32>
    %201 = arith.index_cast %181 : i32 to index
    %c0_123 = arith.constant 0 : index
    %202 = vector.load %arg13[%201, %c0_123] : memref<16x32xf32, #tpu.memory_space<vmem>>, vector<2x32xf32>
    %cst_124 = arith.constant dense<0.000000e+00> : vector<2x32xf32>
    %203 = tpu.matmul %182, %38, %cst_124 {dimension_numbers = #tpu.dot_dimension_numbers<[1], [0], [0], [1], [0, 0, 1, 1], [], []>} : vector<2x32xf32>, vector<32x32xf32>, vector<2x32xf32> -> vector<2x32xf32>
    %204 = arith.addf %202, %203 : vector<2x32xf32>
    %205 = math.tanh %204 : vector<2x32xf32>
    %206 = arith.index_cast %181 : i32 to index
    %c0_125 = arith.constant 0 : index
    %207 = vector.load %arg14[%206, %c0_125] : memref<16x32xf32, #tpu.memory_space<vmem>>, vector<2x32xf32>
    %cst_126 = arith.constant dense<0.000000e+00> : vector<2x32xf32>
    %208 = tpu.matmul %182, %40, %cst_126 {dimension_numbers = #tpu.dot_dimension_numbers<[1], [0], [0], [1], [0, 0, 1, 1], [], []>} : vector<2x32xf32>, vector<32x32xf32>, vector<2x32xf32> -> vector<2x32xf32>
    %209 = arith.addf %207, %208 : vector<2x32xf32>
    %210 = arith.negf %209 : vector<2x32xf32>
    %211 = math.exp %210 : vector<2x32xf32>
    %cst_127 = arith.constant 1.000000e+00 : f32
    %212 = vector.broadcast %cst_127 : f32 to vector<2x32xf32>
    %213 = arith.addf %212, %211 : vector<2x32xf32>
    %214 = arith.divf %212, %213 : vector<2x32xf32>
    %c0_128 = arith.constant 0 : index
    %c0_129 = arith.constant 0 : index
    %215 = vector.load %arg16[%c0_128, %c0_129] : memref<2x32xf32, #tpu.memory_space<vmem>>, vector<2x32xf32>
    %216 = arith.mulf %200, %215 : vector<2x32xf32>
    %217 = arith.mulf %191, %205 : vector<2x32xf32>
    %218 = arith.addf %216, %217 : vector<2x32xf32>
    %219 = math.tanh %218 : vector<2x32xf32>
    %220 = arith.mulf %214, %219 : vector<2x32xf32>
    %c0_130 = arith.constant 0 : index
    %c0_131 = arith.constant 0 : index
    %221 = vector.load %arg16[%c0_130, %c0_131] : memref<2x32xf32, #tpu.memory_space<vmem>>, vector<2x32xf32>
    tpu.vector_store %arg16[%c0_130, %c0_131], %218 {strides = array<i32>} : memref<2x32xf32, #tpu.memory_space<vmem>>, vector<2x32xf32>,
    %c0_132 = arith.constant 0 : index
    %c0_133 = arith.constant 0 : index
    %222 = vector.load %arg15[%c0_132, %c0_133] : memref<2x32xf32, #tpu.memory_space<vmem>>, vector<2x32xf32>
    tpu.vector_store %arg15[%c0_132, %c0_133], %220 {strides = array<i32>} : memref<2x32xf32, #tpu.memory_space<vmem>>, vector<2x32xf32>,
    %223 = arith.index_cast %181 : i32 to index
    %c0_134 = arith.constant 0 : index
    %224 = vector.load %arg10[%223, %c0_134] : memref<16x32xf32, #tpu.memory_space<vmem>>, vector<2x32xf32>
    tpu.vector_store %arg10[%223, %c0_134], %220 {strides = array<i32>} : memref<16x32xf32, #tpu.memory_space<vmem>>, vector<2x32xf32>,
    %c4_i32 = arith.constant 4 : i32
    %c2_i32_135 = arith.constant 2 : i32
    %225 = arith.muli %c4_i32, %c2_i32_135 : i32
    %226 = tpu.assume_multiple %225, 2 : i32
    %c0_136 = arith.constant 0 : index
    %c0_137 = arith.constant 0 : index
    %227 = vector.load %arg15[%c0_136, %c0_137] : memref<2x32xf32, #tpu.memory_space<vmem>>, vector<2x32xf32>
    %228 = arith.index_cast %226 : i32 to index
    %c0_138 = arith.constant 0 : index
    %229 = vector.load %arg11[%228, %c0_138] : memref<16x32xf32, #tpu.memory_space<vmem>>, vector<2x32xf32>
    %cst_139 = arith.constant dense<0.000000e+00> : vector<2x32xf32>
    %230 = tpu.matmul %227, %34, %cst_139 {dimension_numbers = #tpu.dot_dimension_numbers<[1], [0], [0], [1], [0, 0, 1, 1], [], []>} : vector<2x32xf32>, vector<32x32xf32>, vector<2x32xf32> -> vector<2x32xf32>
    %231 = arith.addf %229, %230 : vector<2x32xf32>
    %232 = arith.negf %231 : vector<2x32xf32>
    %233 = math.exp %232 : vector<2x32xf32>
    %cst_140 = arith.constant 1.000000e+00 : f32
    %234 = vector.broadcast %cst_140 : f32 to vector<2x32xf32>
    %235 = arith.addf %234, %233 : vector<2x32xf32>
    %236 = arith.divf %234, %235 : vector<2x32xf32>
    %237 = arith.index_cast %226 : i32 to index
    %c0_141 = arith.constant 0 : index
    %238 = vector.load %arg12[%237, %c0_141] : memref<16x32xf32, #tpu.memory_space<vmem>>, vector<2x32xf32>
    %cst_142 = arith.constant dense<0.000000e+00> : vector<2x32xf32>
    %239 = tpu.matmul %227, %36, %cst_142 {dimension_numbers = #tpu.dot_dimension_numbers<[1], [0], [0], [1], [0, 0, 1, 1], [], []>} : vector<2x32xf32>, vector<32x32xf32>, vector<2x32xf32> -> vector<2x32xf32>
    %240 = arith.addf %238, %239 : vector<2x32xf32>
    %241 = arith.negf %240 : vector<2x32xf32>
    %242 = math.exp %241 : vector<2x32xf32>
    %cst_143 = arith.constant 1.000000e+00 : f32
    %243 = vector.broadcast %cst_143 : f32 to vector<2x32xf32>
    %244 = arith.addf %243, %242 : vector<2x32xf32>
    %245 = arith.divf %243, %244 : vector<2x32xf32>
    %246 = arith.index_cast %226 : i32 to index
    %c0_144 = arith.constant 0 : index
    %247 = vector.load %arg13[%246, %c0_144] : memref<16x32xf32, #tpu.memory_space<vmem>>, vector<2x32xf32>
    %cst_145 = arith.constant dense<0.000000e+00> : vector<2x32xf32>
    %248 = tpu.matmul %227, %38, %cst_145 {dimension_numbers = #tpu.dot_dimension_numbers<[1], [0], [0], [1], [0, 0, 1, 1], [], []>} : vector<2x32xf32>, vector<32x32xf32>, vector<2x32xf32> -> vector<2x32xf32>
    %249 = arith.addf %247, %248 : vector<2x32xf32>
    %250 = math.tanh %249 : vector<2x32xf32>
    %251 = arith.index_cast %226 : i32 to index
    %c0_146 = arith.constant 0 : index
    %252 = vector.load %arg14[%251, %c0_146] : memref<16x32xf32, #tpu.memory_space<vmem>>, vector<2x32xf32>
    %cst_147 = arith.constant dense<0.000000e+00> : vector<2x32xf32>
    %253 = tpu.matmul %227, %40, %cst_147 {dimension_numbers = #tpu.dot_dimension_numbers<[1], [0], [0], [1], [0, 0, 1, 1], [], []>} : vector<2x32xf32>, vector<32x32xf32>, vector<2x32xf32> -> vector<2x32xf32>
    %254 = arith.addf %252, %253 : vector<2x32xf32>
    %255 = arith.negf %254 : vector<2x32xf32>
    %256 = math.exp %255 : vector<2x32xf32>
    %cst_148 = arith.constant 1.000000e+00 : f32
    %257 = vector.broadcast %cst_148 : f32 to vector<2x32xf32>
    %258 = arith.addf %257, %256 : vector<2x32xf32>
    %259 = arith.divf %257, %258 : vector<2x32xf32>
    %c0_149 = arith.constant 0 : index
    %c0_150 = arith.constant 0 : index
    %260 = vector.load %arg16[%c0_149, %c0_150] : memref<2x32xf32, #tpu.memory_space<vmem>>, vector<2x32xf32>
    %261 = arith.mulf %245, %260 : vector<2x32xf32>
    %262 = arith.mulf %236, %250 : vector<2x32xf32>
    %263 = arith.addf %261, %262 : vector<2x32xf32>
    %264 = math.tanh %263 : vector<2x32xf32>
    %265 = arith.mulf %259, %264 : vector<2x32xf32>
    %c0_151 = arith.constant 0 : index
    %c0_152 = arith.constant 0 : index
    %266 = vector.load %arg16[%c0_151, %c0_152] : memref<2x32xf32, #tpu.memory_space<vmem>>, vector<2x32xf32>
    tpu.vector_store %arg16[%c0_151, %c0_152], %263 {strides = array<i32>} : memref<2x32xf32, #tpu.memory_space<vmem>>, vector<2x32xf32>,
    %c0_153 = arith.constant 0 : index
    %c0_154 = arith.constant 0 : index
    %267 = vector.load %arg15[%c0_153, %c0_154] : memref<2x32xf32, #tpu.memory_space<vmem>>, vector<2x32xf32>
    tpu.vector_store %arg15[%c0_153, %c0_154], %265 {strides = array<i32>} : memref<2x32xf32, #tpu.memory_space<vmem>>, vector<2x32xf32>,
    %268 = arith.index_cast %226 : i32 to index
    %c0_155 = arith.constant 0 : index
    %269 = vector.load %arg10[%268, %c0_155] : memref<16x32xf32, #tpu.memory_space<vmem>>, vector<2x32xf32>
    tpu.vector_store %arg10[%268, %c0_155], %265 {strides = array<i32>} : memref<16x32xf32, #tpu.memory_space<vmem>>, vector<2x32xf32>,
    %c5_i32 = arith.constant 5 : i32
    %c2_i32_156 = arith.constant 2 : i32
    %270 = arith.muli %c5_i32, %c2_i32_156 : i32
    %271 = tpu.assume_multiple %270, 2 : i32
    %c0_157 = arith.constant 0 : index
    %c0_158 = arith.constant 0 : index
    %272 = vector.load %arg15[%c0_157, %c0_158] : memref<2x32xf32, #tpu.memory_space<vmem>>, vector<2x32xf32>
    %273 = arith.index_cast %271 : i32 to index
    %c0_159 = arith.constant 0 : index
    %274 = vector.load %arg11[%273, %c0_159] : memref<16x32xf32, #tpu.memory_space<vmem>>, vector<2x32xf32>
    %cst_160 = arith.constant dense<0.000000e+00> : vector<2x32xf32>
    %275 = tpu.matmul %272, %34, %cst_160 {dimension_numbers = #tpu.dot_dimension_numbers<[1], [0], [0], [1], [0, 0, 1, 1], [], []>} : vector<2x32xf32>, vector<32x32xf32>, vector<2x32xf32> -> vector<2x32xf32>
    %276 = arith.addf %274, %275 : vector<2x32xf32>
    %277 = arith.negf %276 : vector<2x32xf32>
    %278 = math.exp %277 : vector<2x32xf32>
    %cst_161 = arith.constant 1.000000e+00 : f32
    %279 = vector.broadcast %cst_161 : f32 to vector<2x32xf32>
    %280 = arith.addf %279, %278 : vector<2x32xf32>
    %281 = arith.divf %279, %280 : vector<2x32xf32>
    %282 = arith.index_cast %271 : i32 to index
    %c0_162 = arith.constant 0 : index
    %283 = vector.load %arg12[%282, %c0_162] : memref<16x32xf32, #tpu.memory_space<vmem>>, vector<2x32xf32>
    %cst_163 = arith.constant dense<0.000000e+00> : vector<2x32xf32>
    %284 = tpu.matmul %272, %36, %cst_163 {dimension_numbers = #tpu.dot_dimension_numbers<[1], [0], [0], [1], [0, 0, 1, 1], [], []>} : vector<2x32xf32>, vector<32x32xf32>, vector<2x32xf32> -> vector<2x32xf32>
    %285 = arith.addf %283, %284 : vector<2x32xf32>
    %286 = arith.negf %285 : vector<2x32xf32>
    %287 = math.exp %286 : vector<2x32xf32>
    %cst_164 = arith.constant 1.000000e+00 : f32
    %288 = vector.broadcast %cst_164 : f32 to vector<2x32xf32>
    %289 = arith.addf %288, %287 : vector<2x32xf32>
    %290 = arith.divf %288, %289 : vector<2x32xf32>
    %291 = arith.index_cast %271 : i32 to index
    %c0_165 = arith.constant 0 : index
    %292 = vector.load %arg13[%291, %c0_165] : memref<16x32xf32, #tpu.memory_space<vmem>>, vector<2x32xf32>
    %cst_166 = arith.constant dense<0.000000e+00> : vector<2x32xf32>
    %293 = tpu.matmul %272, %38, %cst_166 {dimension_numbers = #tpu.dot_dimension_numbers<[1], [0], [0], [1], [0, 0, 1, 1], [], []>} : vector<2x32xf32>, vector<32x32xf32>, vector<2x32xf32> -> vector<2x32xf32>
    %294 = arith.addf %292, %293 : vector<2x32xf32>
    %295 = math.tanh %294 : vector<2x32xf32>
    %296 = arith.index_cast %271 : i32 to index
    %c0_167 = arith.constant 0 : index
    %297 = vector.load %arg14[%296, %c0_167] : memref<16x32xf32, #tpu.memory_space<vmem>>, vector<2x32xf32>
    %cst_168 = arith.constant dense<0.000000e+00> : vector<2x32xf32>
    %298 = tpu.matmul %272, %40, %cst_168 {dimension_numbers = #tpu.dot_dimension_numbers<[1], [0], [0], [1], [0, 0, 1, 1], [], []>} : vector<2x32xf32>, vector<32x32xf32>, vector<2x32xf32> -> vector<2x32xf32>
    %299 = arith.addf %297, %298 : vector<2x32xf32>
    %300 = arith.negf %299 : vector<2x32xf32>
    %301 = math.exp %300 : vector<2x32xf32>
    %cst_169 = arith.constant 1.000000e+00 : f32
    %302 = vector.broadcast %cst_169 : f32 to vector<2x32xf32>
    %303 = arith.addf %302, %301 : vector<2x32xf32>
    %304 = arith.divf %302, %303 : vector<2x32xf32>
    %c0_170 = arith.constant 0 : index
    %c0_171 = arith.constant 0 : index
    %305 = vector.load %arg16[%c0_170, %c0_171] : memref<2x32xf32, #tpu.memory_space<vmem>>, vector<2x32xf32>
    %306 = arith.mulf %290, %305 : vector<2x32xf32>
    %307 = arith.mulf %281, %295 : vector<2x32xf32>
    %308 = arith.addf %306, %307 : vector<2x32xf32>
    %309 = math.tanh %308 : vector<2x32xf32>
    %310 = arith.mulf %304, %309 : vector<2x32xf32>
    %c0_172 = arith.constant 0 : index
    %c0_173 = arith.constant 0 : index
    %311 = vector.load %arg16[%c0_172, %c0_173] : memref<2x32xf32, #tpu.memory_space<vmem>>, vector<2x32xf32>
    tpu.vector_store %arg16[%c0_172, %c0_173], %308 {strides = array<i32>} : memref<2x32xf32, #tpu.memory_space<vmem>>, vector<2x32xf32>,
    %c0_174 = arith.constant 0 : index
    %c0_175 = arith.constant 0 : index
    %312 = vector.load %arg15[%c0_174, %c0_175] : memref<2x32xf32, #tpu.memory_space<vmem>>, vector<2x32xf32>
    tpu.vector_store %arg15[%c0_174, %c0_175], %310 {strides = array<i32>} : memref<2x32xf32, #tpu.memory_space<vmem>>, vector<2x32xf32>,
    %313 = arith.index_cast %271 : i32 to index
    %c0_176 = arith.constant 0 : index
    %314 = vector.load %arg10[%313, %c0_176] : memref<16x32xf32, #tpu.memory_space<vmem>>, vector<2x32xf32>
    tpu.vector_store %arg10[%313, %c0_176], %310 {strides = array<i32>} : memref<16x32xf32, #tpu.memory_space<vmem>>, vector<2x32xf32>,
    %c6_i32 = arith.constant 6 : i32
    %c2_i32_177 = arith.constant 2 : i32
    %315 = arith.muli %c6_i32, %c2_i32_177 : i32
    %316 = tpu.assume_multiple %315, 2 : i32
    %c0_178 = arith.constant 0 : index
    %c0_179 = arith.constant 0 : index
    %317 = vector.load %arg15[%c0_178, %c0_179] : memref<2x32xf32, #tpu.memory_space<vmem>>, vector<2x32xf32>
    %318 = arith.index_cast %316 : i32 to index
    %c0_180 = arith.constant 0 : index
    %319 = vector.load %arg11[%318, %c0_180] : memref<16x32xf32, #tpu.memory_space<vmem>>, vector<2x32xf32>
    %cst_181 = arith.constant dense<0.000000e+00> : vector<2x32xf32>
    %320 = tpu.matmul %317, %34, %cst_181 {dimension_numbers = #tpu.dot_dimension_numbers<[1], [0], [0], [1], [0, 0, 1, 1], [], []>} : vector<2x32xf32>, vector<32x32xf32>, vector<2x32xf32> -> vector<2x32xf32>
    %321 = arith.addf %319, %320 : vector<2x32xf32>
    %322 = arith.negf %321 : vector<2x32xf32>
    %323 = math.exp %322 : vector<2x32xf32>
    %cst_182 = arith.constant 1.000000e+00 : f32
    %324 = vector.broadcast %cst_182 : f32 to vector<2x32xf32>
    %325 = arith.addf %324, %323 : vector<2x32xf32>
    %326 = arith.divf %324, %325 : vector<2x32xf32>
    %327 = arith.index_cast %316 : i32 to index
    %c0_183 = arith.constant 0 : index
    %328 = vector.load %arg12[%327, %c0_183] : memref<16x32xf32, #tpu.memory_space<vmem>>, vector<2x32xf32>
    %cst_184 = arith.constant dense<0.000000e+00> : vector<2x32xf32>
    %329 = tpu.matmul %317, %36, %cst_184 {dimension_numbers = #tpu.dot_dimension_numbers<[1], [0], [0], [1], [0, 0, 1, 1], [], []>} : vector<2x32xf32>, vector<32x32xf32>, vector<2x32xf32> -> vector<2x32xf32>
    %330 = arith.addf %328, %329 : vector<2x32xf32>
    %331 = arith.negf %330 : vector<2x32xf32>
    %332 = math.exp %331 : vector<2x32xf32>
    %cst_185 = arith.constant 1.000000e+00 : f32
    %333 = vector.broadcast %cst_185 : f32 to vector<2x32xf32>
    %334 = arith.addf %333, %332 : vector<2x32xf32>
    %335 = arith.divf %333, %334 : vector<2x32xf32>
    %336 = arith.index_cast %316 : i32 to index
    %c0_186 = arith.constant 0 : index
    %337 = vector.load %arg13[%336, %c0_186] : memref<16x32xf32, #tpu.memory_space<vmem>>, vector<2x32xf32>
    %cst_187 = arith.constant dense<0.000000e+00> : vector<2x32xf32>
    %338 = tpu.matmul %317, %38, %cst_187 {dimension_numbers = #tpu.dot_dimension_numbers<[1], [0], [0], [1], [0, 0, 1, 1], [], []>} : vector<2x32xf32>, vector<32x32xf32>, vector<2x32xf32> -> vector<2x32xf32>
    %339 = arith.addf %337, %338 : vector<2x32xf32>
    %340 = math.tanh %339 : vector<2x32xf32>
    %341 = arith.index_cast %316 : i32 to index
    %c0_188 = arith.constant 0 : index
    %342 = vector.load %arg14[%341, %c0_188] : memref<16x32xf32, #tpu.memory_space<vmem>>, vector<2x32xf32>
    %cst_189 = arith.constant dense<0.000000e+00> : vector<2x32xf32>
    %343 = tpu.matmul %317, %40, %cst_189 {dimension_numbers = #tpu.dot_dimension_numbers<[1], [0], [0], [1], [0, 0, 1, 1], [], []>} : vector<2x32xf32>, vector<32x32xf32>, vector<2x32xf32> -> vector<2x32xf32>
    %344 = arith.addf %342, %343 : vector<2x32xf32>
    %345 = arith.negf %344 : vector<2x32xf32>
    %346 = math.exp %345 : vector<2x32xf32>
    %cst_190 = arith.constant 1.000000e+00 : f32
    %347 = vector.broadcast %cst_190 : f32 to vector<2x32xf32>
    %348 = arith.addf %347, %346 : vector<2x32xf32>
    %349 = arith.divf %347, %348 : vector<2x32xf32>
    %c0_191 = arith.constant 0 : index
    %c0_192 = arith.constant 0 : index
    %350 = vector.load %arg16[%c0_191, %c0_192] : memref<2x32xf32, #tpu.memory_space<vmem>>, vector<2x32xf32>
    %351 = arith.mulf %335, %350 : vector<2x32xf32>
    %352 = arith.mulf %326, %340 : vector<2x32xf32>
    %353 = arith.addf %351, %352 : vector<2x32xf32>
    %354 = math.tanh %353 : vector<2x32xf32>
    %355 = arith.mulf %349, %354 : vector<2x32xf32>
    %c0_193 = arith.constant 0 : index
    %c0_194 = arith.constant 0 : index
    %356 = vector.load %arg16[%c0_193, %c0_194] : memref<2x32xf32, #tpu.memory_space<vmem>>, vector<2x32xf32>
    tpu.vector_store %arg16[%c0_193, %c0_194], %353 {strides = array<i32>} : memref<2x32xf32, #tpu.memory_space<vmem>>, vector<2x32xf32>,
    %c0_195 = arith.constant 0 : index
    %c0_196 = arith.constant 0 : index
    %357 = vector.load %arg15[%c0_195, %c0_196] : memref<2x32xf32, #tpu.memory_space<vmem>>, vector<2x32xf32>
    tpu.vector_store %arg15[%c0_195, %c0_196], %355 {strides = array<i32>} : memref<2x32xf32, #tpu.memory_space<vmem>>, vector<2x32xf32>,
    %358 = arith.index_cast %316 : i32 to index
    %c0_197 = arith.constant 0 : index
    %359 = vector.load %arg10[%358, %c0_197] : memref<16x32xf32, #tpu.memory_space<vmem>>, vector<2x32xf32>
    tpu.vector_store %arg10[%358, %c0_197], %355 {strides = array<i32>} : memref<16x32xf32, #tpu.memory_space<vmem>>, vector<2x32xf32>,
    %c7_i32 = arith.constant 7 : i32
    %c2_i32_198 = arith.constant 2 : i32
    %360 = arith.muli %c7_i32, %c2_i32_198 : i32
    %361 = tpu.assume_multiple %360, 2 : i32
    %c0_199 = arith.constant 0 : index
    %c0_200 = arith.constant 0 : index
    %362 = vector.load %arg15[%c0_199, %c0_200] : memref<2x32xf32, #tpu.memory_space<vmem>>, vector<2x32xf32>
    %363 = arith.index_cast %361 : i32 to index
    %c0_201 = arith.constant 0 : index
    %364 = vector.load %arg11[%363, %c0_201] : memref<16x32xf32, #tpu.memory_space<vmem>>, vector<2x32xf32>
    %cst_202 = arith.constant dense<0.000000e+00> : vector<2x32xf32>
    %365 = tpu.matmul %362, %34, %cst_202 {dimension_numbers = #tpu.dot_dimension_numbers<[1], [0], [0], [1], [0, 0, 1, 1], [], []>} : vector<2x32xf32>, vector<32x32xf32>, vector<2x32xf32> -> vector<2x32xf32>
    %366 = arith.addf %364, %365 : vector<2x32xf32>
    %367 = arith.negf %366 : vector<2x32xf32>
    %368 = math.exp %367 : vector<2x32xf32>
    %cst_203 = arith.constant 1.000000e+00 : f32
    %369 = vector.broadcast %cst_203 : f32 to vector<2x32xf32>
    %370 = arith.addf %369, %368 : vector<2x32xf32>
    %371 = arith.divf %369, %370 : vector<2x32xf32>
    %372 = arith.index_cast %361 : i32 to index
    %c0_204 = arith.constant 0 : index
    %373 = vector.load %arg12[%372, %c0_204] : memref<16x32xf32, #tpu.memory_space<vmem>>, vector<2x32xf32>
    %cst_205 = arith.constant dense<0.000000e+00> : vector<2x32xf32>
    %374 = tpu.matmul %362, %36, %cst_205 {dimension_numbers = #tpu.dot_dimension_numbers<[1], [0], [0], [1], [0, 0, 1, 1], [], []>} : vector<2x32xf32>, vector<32x32xf32>, vector<2x32xf32> -> vector<2x32xf32>
    %375 = arith.addf %373, %374 : vector<2x32xf32>
    %376 = arith.negf %375 : vector<2x32xf32>
    %377 = math.exp %376 : vector<2x32xf32>
    %cst_206 = arith.constant 1.000000e+00 : f32
    %378 = vector.broadcast %cst_206 : f32 to vector<2x32xf32>
    %379 = arith.addf %378, %377 : vector<2x32xf32>
    %380 = arith.divf %378, %379 : vector<2x32xf32>
    %381 = arith.index_cast %361 : i32 to index
    %c0_207 = arith.constant 0 : index
    %382 = vector.load %arg13[%381, %c0_207] : memref<16x32xf32, #tpu.memory_space<vmem>>, vector<2x32xf32>
    %cst_208 = arith.constant dense<0.000000e+00> : vector<2x32xf32>
    %383 = tpu.matmul %362, %38, %cst_208 {dimension_numbers = #tpu.dot_dimension_numbers<[1], [0], [0], [1], [0, 0, 1, 1], [], []>} : vector<2x32xf32>, vector<32x32xf32>, vector<2x32xf32> -> vector<2x32xf32>
    %384 = arith.addf %382, %383 : vector<2x32xf32>
    %385 = math.tanh %384 : vector<2x32xf32>
    %386 = arith.index_cast %361 : i32 to index
    %c0_209 = arith.constant 0 : index
    %387 = vector.load %arg14[%386, %c0_209] : memref<16x32xf32, #tpu.memory_space<vmem>>, vector<2x32xf32>
    %cst_210 = arith.constant dense<0.000000e+00> : vector<2x32xf32>
    %388 = tpu.matmul %362, %40, %cst_210 {dimension_numbers = #tpu.dot_dimension_numbers<[1], [0], [0], [1], [0, 0, 1, 1], [], []>} : vector<2x32xf32>, vector<32x32xf32>, vector<2x32xf32> -> vector<2x32xf32>
    %389 = arith.addf %387, %388 : vector<2x32xf32>
    %390 = arith.negf %389 : vector<2x32xf32>
    %391 = math.exp %390 : vector<2x32xf32>
    %cst_211 = arith.constant 1.000000e+00 : f32
    %392 = vector.broadcast %cst_211 : f32 to vector<2x32xf32>
    %393 = arith.addf %392, %391 : vector<2x32xf32>
    %394 = arith.divf %392, %393 : vector<2x32xf32>
    %c0_212 = arith.constant 0 : index
    %c0_213 = arith.constant 0 : index
    %395 = vector.load %arg16[%c0_212, %c0_213] : memref<2x32xf32, #tpu.memory_space<vmem>>, vector<2x32xf32>
    %396 = arith.mulf %380, %395 : vector<2x32xf32>
    %397 = arith.mulf %371, %385 : vector<2x32xf32>
    %398 = arith.addf %396, %397 : vector<2x32xf32>
    %399 = math.tanh %398 : vector<2x32xf32>
    %400 = arith.mulf %394, %399 : vector<2x32xf32>
    %c0_214 = arith.constant 0 : index
    %c0_215 = arith.constant 0 : index
    %401 = vector.load %arg16[%c0_214, %c0_215] : memref<2x32xf32, #tpu.memory_space<vmem>>, vector<2x32xf32>
    tpu.vector_store %arg16[%c0_214, %c0_215], %398 {strides = array<i32>} : memref<2x32xf32, #tpu.memory_space<vmem>>, vector<2x32xf32>,
    %c0_216 = arith.constant 0 : index
    %c0_217 = arith.constant 0 : index
    %402 = vector.load %arg15[%c0_216, %c0_217] : memref<2x32xf32, #tpu.memory_space<vmem>>, vector<2x32xf32>
    tpu.vector_store %arg15[%c0_216, %c0_217], %400 {strides = array<i32>} : memref<2x32xf32, #tpu.memory_space<vmem>>, vector<2x32xf32>,
    %403 = arith.index_cast %361 : i32 to index
    %c0_218 = arith.constant 0 : index
    %404 = vector.load %arg10[%403, %c0_218] : memref<16x32xf32, #tpu.memory_space<vmem>>, vector<2x32xf32>
    tpu.vector_store %arg10[%403, %c0_218], %400 {strides = array<i32>} : memref<16x32xf32, #tpu.memory_space<vmem>>, vector<2x32xf32>,
    %c8_i32 = arith.constant 8 : i32
    %c0_219 = arith.constant 0 : index
    %c0_220 = arith.constant 0 : index
    %405 = vector.load %arg10[%c0_219, %c0_220] : memref<16x32xf32, #tpu.memory_space<vmem>>, vector<16x32xf32>
    %c0_221 = arith.constant 0 : index
    %c0_222 = arith.constant 0 : index
    %c0_223 = arith.constant 0 : index
    %406 = vector.load %arg4[%c0_221, %c0_222, %c0_223] : memref<4x32x32xf32, #tpu.memory_space<vmem>>, vector<1x32x32xf32>
    %407 = vector.shape_cast %406 : vector<1x32x32xf32> to vector<32x32xf32>
    %cst_224 = arith.constant dense<0.000000e+00> : vector<16x32xf32>
    %408 = tpu.matmul %405, %407, %cst_224 {dimension_numbers = #tpu.dot_dimension_numbers<[1], [0], [0], [1], [0, 0, 1, 1], [], []>} : vector<16x32xf32>, vector<32x32xf32>, vector<16x32xf32> -> vector<16x32xf32>
    %c0_225 = arith.constant 0 : index
    %c0_226 = arith.constant 0 : index
    %c0_227 = arith.constant 0 : index
    %409 = vector.load %arg6[%c0_225, %c0_226, %c0_227] : memref<4x1x32xf32, #tpu.memory_space<vmem>>, vector<1x1x32xf32>
    %410 = vector.shape_cast %409 : vector<1x1x32xf32> to vector<1x32xf32>
    %411 = vector.broadcast %410 : vector<1x32xf32> to vector<16x32xf32>
    %412 = arith.addf %408, %411 : vector<16x32xf32>
    %c0_228 = arith.constant 0 : index
    %c0_229 = arith.constant 0 : index
    %413 = vector.load %arg11[%c0_228, %c0_229] : memref<16x32xf32, #tpu.memory_space<vmem>>, vector<16x32xf32>
    tpu.vector_store %arg11[%c0_228, %c0_229], %412 {strides = array<i32>} : memref<16x32xf32, #tpu.memory_space<vmem>>, vector<16x32xf32>,
    %c1_230 = arith.constant 1 : index
    %c0_231 = arith.constant 0 : index
    %c0_232 = arith.constant 0 : index
    %414 = vector.load %arg4[%c1_230, %c0_231, %c0_232] : memref<4x32x32xf32, #tpu.memory_space<vmem>>, vector<1x32x32xf32>
    %415 = vector.shape_cast %414 : vector<1x32x32xf32> to vector<32x32xf32>
    %cst_233 = arith.constant dense<0.000000e+00> : vector<16x32xf32>
    %416 = tpu.matmul %405, %415, %cst_233 {dimension_numbers = #tpu.dot_dimension_numbers<[1], [0], [0], [1], [0, 0, 1, 1], [], []>} : vector<16x32xf32>, vector<32x32xf32>, vector<16x32xf32> -> vector<16x32xf32>
    %c1_234 = arith.constant 1 : index
    %c0_235 = arith.constant 0 : index
    %c0_236 = arith.constant 0 : index
    %417 = vector.load %arg6[%c1_234, %c0_235, %c0_236] : memref<4x1x32xf32, #tpu.memory_space<vmem>>, vector<1x1x32xf32>
    %418 = vector.shape_cast %417 : vector<1x1x32xf32> to vector<1x32xf32>
    %419 = vector.broadcast %418 : vector<1x32xf32> to vector<16x32xf32>
    %420 = arith.addf %416, %419 : vector<16x32xf32>
    %c0_237 = arith.constant 0 : index
    %c0_238 = arith.constant 0 : index
    %421 = vector.load %arg12[%c0_237, %c0_238] : memref<16x32xf32, #tpu.memory_space<vmem>>, vector<16x32xf32>
    tpu.vector_store %arg12[%c0_237, %c0_238], %420 {strides = array<i32>} : memref<16x32xf32, #tpu.memory_space<vmem>>, vector<16x32xf32>,
    %c2_239 = arith.constant 2 : index
    %c0_240 = arith.constant 0 : index
    %c0_241 = arith.constant 0 : index
    %422 = vector.load %arg4[%c2_239, %c0_240, %c0_241] : memref<4x32x32xf32, #tpu.memory_space<vmem>>, vector<1x32x32xf32>
    %423 = vector.shape_cast %422 : vector<1x32x32xf32> to vector<32x32xf32>
    %cst_242 = arith.constant dense<0.000000e+00> : vector<16x32xf32>
    %424 = tpu.matmul %405, %423, %cst_242 {dimension_numbers = #tpu.dot_dimension_numbers<[1], [0], [0], [1], [0, 0, 1, 1], [], []>} : vector<16x32xf32>, vector<32x32xf32>, vector<16x32xf32> -> vector<16x32xf32>
    %c2_243 = arith.constant 2 : index
    %c0_244 = arith.constant 0 : index
    %c0_245 = arith.constant 0 : index
    %425 = vector.load %arg6[%c2_243, %c0_244, %c0_245] : memref<4x1x32xf32, #tpu.memory_space<vmem>>, vector<1x1x32xf32>
    %426 = vector.shape_cast %425 : vector<1x1x32xf32> to vector<1x32xf32>
    %427 = vector.broadcast %426 : vector<1x32xf32> to vector<16x32xf32>
    %428 = arith.addf %424, %427 : vector<16x32xf32>
    %c0_246 = arith.constant 0 : index
    %c0_247 = arith.constant 0 : index
    %429 = vector.load %arg13[%c0_246, %c0_247] : memref<16x32xf32, #tpu.memory_space<vmem>>, vector<16x32xf32>
    tpu.vector_store %arg13[%c0_246, %c0_247], %428 {strides = array<i32>} : memref<16x32xf32, #tpu.memory_space<vmem>>, vector<16x32xf32>,
    %c3_248 = arith.constant 3 : index
    %c0_249 = arith.constant 0 : index
    %c0_250 = arith.constant 0 : index
    %430 = vector.load %arg4[%c3_248, %c0_249, %c0_250] : memref<4x32x32xf32, #tpu.memory_space<vmem>>, vector<1x32x32xf32>
    %431 = vector.shape_cast %430 : vector<1x32x32xf32> to vector<32x32xf32>
    %cst_251 = arith.constant dense<0.000000e+00> : vector<16x32xf32>
    %432 = tpu.matmul %405, %431, %cst_251 {dimension_numbers = #tpu.dot_dimension_numbers<[1], [0], [0], [1], [0, 0, 1, 1], [], []>} : vector<16x32xf32>, vector<32x32xf32>, vector<16x32xf32> -> vector<16x32xf32>
    %c3_252 = arith.constant 3 : index
    %c0_253 = arith.constant 0 : index
    %c0_254 = arith.constant 0 : index
    %433 = vector.load %arg6[%c3_252, %c0_253, %c0_254] : memref<4x1x32xf32, #tpu.memory_space<vmem>>, vector<1x1x32xf32>
    %434 = vector.shape_cast %433 : vector<1x1x32xf32> to vector<1x32xf32>
    %435 = vector.broadcast %434 : vector<1x32xf32> to vector<16x32xf32>
    %436 = arith.addf %432, %435 : vector<16x32xf32>
    %c0_255 = arith.constant 0 : index
    %c0_256 = arith.constant 0 : index
    %437 = vector.load %arg14[%c0_255, %c0_256] : memref<16x32xf32, #tpu.memory_space<vmem>>, vector<16x32xf32>
    tpu.vector_store %arg14[%c0_255, %c0_256], %436 {strides = array<i32>} : memref<16x32xf32, #tpu.memory_space<vmem>>, vector<16x32xf32>,
    %c0_257 = arith.constant 0 : index
    %c0_258 = arith.constant 0 : index
    %c0_259 = arith.constant 0 : index
    %438 = vector.load %arg5[%c0_257, %c0_258, %c0_259] : memref<4x32x32xf32, #tpu.memory_space<vmem>>, vector<1x32x32xf32>
    %439 = vector.shape_cast %438 : vector<1x32x32xf32> to vector<32x32xf32>
    %c1_260 = arith.constant 1 : index
    %c0_261 = arith.constant 0 : index
    %c0_262 = arith.constant 0 : index
    %440 = vector.load %arg5[%c1_260, %c0_261, %c0_262] : memref<4x32x32xf32, #tpu.memory_space<vmem>>, vector<1x32x32xf32>
    %441 = vector.shape_cast %440 : vector<1x32x32xf32> to vector<32x32xf32>
    %c2_263 = arith.constant 2 : index
    %c0_264 = arith.constant 0 : index
    %c0_265 = arith.constant 0 : index
    %442 = vector.load %arg5[%c2_263, %c0_264, %c0_265] : memref<4x32x32xf32, #tpu.memory_space<vmem>>, vector<1x32x32xf32>
    %443 = vector.shape_cast %442 : vector<1x32x32xf32> to vector<32x32xf32>
    %c3_266 = arith.constant 3 : index
    %c0_267 = arith.constant 0 : index
    %c0_268 = arith.constant 0 : index
    %444 = vector.load %arg5[%c3_266, %c0_267, %c0_268] : memref<4x32x32xf32, #tpu.memory_space<vmem>>, vector<1x32x32xf32>
    %445 = vector.shape_cast %444 : vector<1x32x32xf32> to vector<32x32xf32>
    %cst_269 = arith.constant 0.000000e+00 : f32
    %446 = vector.broadcast %cst_269 : f32 to vector<2x32xf32>
    %c0_270 = arith.constant 0 : index
    %c0_271 = arith.constant 0 : index
    %447 = vector.load %arg15[%c0_270, %c0_271] : memref<2x32xf32, #tpu.memory_space<vmem>>, vector<2x32xf32>
    tpu.vector_store %arg15[%c0_270, %c0_271], %446 {strides = array<i32>} : memref<2x32xf32, #tpu.memory_space<vmem>>, vector<2x32xf32>,
    %cst_272 = arith.constant 0.000000e+00 : f32
    %448 = vector.broadcast %cst_272 : f32 to vector<2x32xf32>
    %c0_273 = arith.constant 0 : index
    %c0_274 = arith.constant 0 : index
    %449 = vector.load %arg16[%c0_273, %c0_274] : memref<2x32xf32, #tpu.memory_space<vmem>>, vector<2x32xf32>
    tpu.vector_store %arg16[%c0_273, %c0_274], %448 {strides = array<i32>} : memref<2x32xf32, #tpu.memory_space<vmem>>, vector<2x32xf32>,
    %c0_i32_275 = arith.constant 0 : i32
    %c2_i32_276 = arith.constant 2 : i32
    %450 = arith.muli %c0_i32_275, %c2_i32_276 : i32
    %451 = tpu.assume_multiple %450, 2 : i32
    %c0_277 = arith.constant 0 : index
    %c0_278 = arith.constant 0 : index
    %452 = vector.load %arg15[%c0_277, %c0_278] : memref<2x32xf32, #tpu.memory_space<vmem>>, vector<2x32xf32>
    %453 = arith.index_cast %451 : i32 to index
    %c0_279 = arith.constant 0 : index
    %454 = vector.load %arg11[%453, %c0_279] : memref<16x32xf32, #tpu.memory_space<vmem>>, vector<2x32xf32>
    %cst_280 = arith.constant dense<0.000000e+00> : vector<2x32xf32>
    %455 = tpu.matmul %452, %439, %cst_280 {dimension_numbers = #tpu.dot_dimension_numbers<[1], [0], [0], [1], [0, 0, 1, 1], [], []>} : vector<2x32xf32>, vector<32x32xf32>, vector<2x32xf32> -> vector<2x32xf32>
    %456 = arith.addf %454, %455 : vector<2x32xf32>
    %457 = arith.negf %456 : vector<2x32xf32>
    %458 = math.exp %457 : vector<2x32xf32>
    %cst_281 = arith.constant 1.000000e+00 : f32
    %459 = vector.broadcast %cst_281 : f32 to vector<2x32xf32>
    %460 = arith.addf %459, %458 : vector<2x32xf32>
    %461 = arith.divf %459, %460 : vector<2x32xf32>
    %462 = arith.index_cast %451 : i32 to index
    %c0_282 = arith.constant 0 : index
    %463 = vector.load %arg12[%462, %c0_282] : memref<16x32xf32, #tpu.memory_space<vmem>>, vector<2x32xf32>
    %cst_283 = arith.constant dense<0.000000e+00> : vector<2x32xf32>
    %464 = tpu.matmul %452, %441, %cst_283 {dimension_numbers = #tpu.dot_dimension_numbers<[1], [0], [0], [1], [0, 0, 1, 1], [], []>} : vector<2x32xf32>, vector<32x32xf32>, vector<2x32xf32> -> vector<2x32xf32>
    %465 = arith.addf %463, %464 : vector<2x32xf32>
    %466 = arith.negf %465 : vector<2x32xf32>
    %467 = math.exp %466 : vector<2x32xf32>
    %cst_284 = arith.constant 1.000000e+00 : f32
    %468 = vector.broadcast %cst_284 : f32 to vector<2x32xf32>
    %469 = arith.addf %468, %467 : vector<2x32xf32>
    %470 = arith.divf %468, %469 : vector<2x32xf32>
    %471 = arith.index_cast %451 : i32 to index
    %c0_285 = arith.constant 0 : index
    %472 = vector.load %arg13[%471, %c0_285] : memref<16x32xf32, #tpu.memory_space<vmem>>, vector<2x32xf32>
    %cst_286 = arith.constant dense<0.000000e+00> : vector<2x32xf32>
    %473 = tpu.matmul %452, %443, %cst_286 {dimension_numbers = #tpu.dot_dimension_numbers<[1], [0], [0], [1], [0, 0, 1, 1], [], []>} : vector<2x32xf32>, vector<32x32xf32>, vector<2x32xf32> -> vector<2x32xf32>
    %474 = arith.addf %472, %473 : vector<2x32xf32>
    %475 = math.tanh %474 : vector<2x32xf32>
    %476 = arith.index_cast %451 : i32 to index
    %c0_287 = arith.constant 0 : index
    %477 = vector.load %arg14[%476, %c0_287] : memref<16x32xf32, #tpu.memory_space<vmem>>, vector<2x32xf32>
    %cst_288 = arith.constant dense<0.000000e+00> : vector<2x32xf32>
    %478 = tpu.matmul %452, %445, %cst_288 {dimension_numbers = #tpu.dot_dimension_numbers<[1], [0], [0], [1], [0, 0, 1, 1], [], []>} : vector<2x32xf32>, vector<32x32xf32>, vector<2x32xf32> -> vector<2x32xf32>
    %479 = arith.addf %477, %478 : vector<2x32xf32>
    %480 = arith.negf %479 : vector<2x32xf32>
    %481 = math.exp %480 : vector<2x32xf32>
    %cst_289 = arith.constant 1.000000e+00 : f32
    %482 = vector.broadcast %cst_289 : f32 to vector<2x32xf32>
    %483 = arith.addf %482, %481 : vector<2x32xf32>
    %484 = arith.divf %482, %483 : vector<2x32xf32>
    %c0_290 = arith.constant 0 : index
    %c0_291 = arith.constant 0 : index
    %485 = vector.load %arg16[%c0_290, %c0_291] : memref<2x32xf32, #tpu.memory_space<vmem>>, vector<2x32xf32>
    %486 = arith.mulf %470, %485 : vector<2x32xf32>
    %487 = arith.mulf %461, %475 : vector<2x32xf32>
    %488 = arith.addf %486, %487 : vector<2x32xf32>
    %489 = math.tanh %488 : vector<2x32xf32>
    %490 = arith.mulf %484, %489 : vector<2x32xf32>
    %c0_292 = arith.constant 0 : index
    %c0_293 = arith.constant 0 : index
    %491 = vector.load %arg16[%c0_292, %c0_293] : memref<2x32xf32, #tpu.memory_space<vmem>>, vector<2x32xf32>
    tpu.vector_store %arg16[%c0_292, %c0_293], %488 {strides = array<i32>} : memref<2x32xf32, #tpu.memory_space<vmem>>, vector<2x32xf32>,
    %c0_294 = arith.constant 0 : index
    %c0_295 = arith.constant 0 : index
    %492 = vector.load %arg15[%c0_294, %c0_295] : memref<2x32xf32, #tpu.memory_space<vmem>>, vector<2x32xf32>
    tpu.vector_store %arg15[%c0_294, %c0_295], %490 {strides = array<i32>} : memref<2x32xf32, #tpu.memory_space<vmem>>, vector<2x32xf32>,
    %493 = arith.index_cast %451 : i32 to index
    %c0_296 = arith.constant 0 : index
    %494 = vector.load %arg10[%493, %c0_296] : memref<16x32xf32, #tpu.memory_space<vmem>>, vector<2x32xf32>
    tpu.vector_store %arg10[%493, %c0_296], %490 {strides = array<i32>} : memref<16x32xf32, #tpu.memory_space<vmem>>, vector<2x32xf32>,
    %c1_i32_297 = arith.constant 1 : i32
    %c2_i32_298 = arith.constant 2 : i32
    %495 = arith.muli %c1_i32_297, %c2_i32_298 : i32
    %496 = tpu.assume_multiple %495, 2 : i32
    %c0_299 = arith.constant 0 : index
    %c0_300 = arith.constant 0 : index
    %497 = vector.load %arg15[%c0_299, %c0_300] : memref<2x32xf32, #tpu.memory_space<vmem>>, vector<2x32xf32>
    %498 = arith.index_cast %496 : i32 to index
    %c0_301 = arith.constant 0 : index
    %499 = vector.load %arg11[%498, %c0_301] : memref<16x32xf32, #tpu.memory_space<vmem>>, vector<2x32xf32>
    %cst_302 = arith.constant dense<0.000000e+00> : vector<2x32xf32>
    %500 = tpu.matmul %497, %439, %cst_302 {dimension_numbers = #tpu.dot_dimension_numbers<[1], [0], [0], [1], [0, 0, 1, 1], [], []>} : vector<2x32xf32>, vector<32x32xf32>, vector<2x32xf32> -> vector<2x32xf32>
    %501 = arith.addf %499, %500 : vector<2x32xf32>
    %502 = arith.negf %501 : vector<2x32xf32>
    %503 = math.exp %502 : vector<2x32xf32>
    %cst_303 = arith.constant 1.000000e+00 : f32
    %504 = vector.broadcast %cst_303 : f32 to vector<2x32xf32>
    %505 = arith.addf %504, %503 : vector<2x32xf32>
    %506 = arith.divf %504, %505 : vector<2x32xf32>
    %507 = arith.index_cast %496 : i32 to index
    %c0_304 = arith.constant 0 : index
    %508 = vector.load %arg12[%507, %c0_304] : memref<16x32xf32, #tpu.memory_space<vmem>>, vector<2x32xf32>
    %cst_305 = arith.constant dense<0.000000e+00> : vector<2x32xf32>
    %509 = tpu.matmul %497, %441, %cst_305 {dimension_numbers = #tpu.dot_dimension_numbers<[1], [0], [0], [1], [0, 0, 1, 1], [], []>} : vector<2x32xf32>, vector<32x32xf32>, vector<2x32xf32> -> vector<2x32xf32>
    %510 = arith.addf %508, %509 : vector<2x32xf32>
    %511 = arith.negf %510 : vector<2x32xf32>
    %512 = math.exp %511 : vector<2x32xf32>
    %cst_306 = arith.constant 1.000000e+00 : f32
    %513 = vector.broadcast %cst_306 : f32 to vector<2x32xf32>
    %514 = arith.addf %513, %512 : vector<2x32xf32>
    %515 = arith.divf %513, %514 : vector<2x32xf32>
    %516 = arith.index_cast %496 : i32 to index
    %c0_307 = arith.constant 0 : index
    %517 = vector.load %arg13[%516, %c0_307] : memref<16x32xf32, #tpu.memory_space<vmem>>, vector<2x32xf32>
    %cst_308 = arith.constant dense<0.000000e+00> : vector<2x32xf32>
    %518 = tpu.matmul %497, %443, %cst_308 {dimension_numbers = #tpu.dot_dimension_numbers<[1], [0], [0], [1], [0, 0, 1, 1], [], []>} : vector<2x32xf32>, vector<32x32xf32>, vector<2x32xf32> -> vector<2x32xf32>
    %519 = arith.addf %517, %518 : vector<2x32xf32>
    %520 = math.tanh %519 : vector<2x32xf32>
    %521 = arith.index_cast %496 : i32 to index
    %c0_309 = arith.constant 0 : index
    %522 = vector.load %arg14[%521, %c0_309] : memref<16x32xf32, #tpu.memory_space<vmem>>, vector<2x32xf32>
    %cst_310 = arith.constant dense<0.000000e+00> : vector<2x32xf32>
    %523 = tpu.matmul %497, %445, %cst_310 {dimension_numbers = #tpu.dot_dimension_numbers<[1], [0], [0], [1], [0, 0, 1, 1], [], []>} : vector<2x32xf32>, vector<32x32xf32>, vector<2x32xf32> -> vector<2x32xf32>
    %524 = arith.addf %522, %523 : vector<2x32xf32>
    %525 = arith.negf %524 : vector<2x32xf32>
    %526 = math.exp %525 : vector<2x32xf32>
    %cst_311 = arith.constant 1.000000e+00 : f32
    %527 = vector.broadcast %cst_311 : f32 to vector<2x32xf32>
    %528 = arith.addf %527, %526 : vector<2x32xf32>
    %529 = arith.divf %527, %528 : vector<2x32xf32>
    %c0_312 = arith.constant 0 : index
    %c0_313 = arith.constant 0 : index
    %530 = vector.load %arg16[%c0_312, %c0_313] : memref<2x32xf32, #tpu.memory_space<vmem>>, vector<2x32xf32>
    %531 = arith.mulf %515, %530 : vector<2x32xf32>
    %532 = arith.mulf %506, %520 : vector<2x32xf32>
    %533 = arith.addf %531, %532 : vector<2x32xf32>
    %534 = math.tanh %533 : vector<2x32xf32>
    %535 = arith.mulf %529, %534 : vector<2x32xf32>
    %c0_314 = arith.constant 0 : index
    %c0_315 = arith.constant 0 : index
    %536 = vector.load %arg16[%c0_314, %c0_315] : memref<2x32xf32, #tpu.memory_space<vmem>>, vector<2x32xf32>
    tpu.vector_store %arg16[%c0_314, %c0_315], %533 {strides = array<i32>} : memref<2x32xf32, #tpu.memory_space<vmem>>, vector<2x32xf32>,
    %c0_316 = arith.constant 0 : index
    %c0_317 = arith.constant 0 : index
    %537 = vector.load %arg15[%c0_316, %c0_317] : memref<2x32xf32, #tpu.memory_space<vmem>>, vector<2x32xf32>
    tpu.vector_store %arg15[%c0_316, %c0_317], %535 {strides = array<i32>} : memref<2x32xf32, #tpu.memory_space<vmem>>, vector<2x32xf32>,
    %538 = arith.index_cast %496 : i32 to index
    %c0_318 = arith.constant 0 : index
    %539 = vector.load %arg10[%538, %c0_318] : memref<16x32xf32, #tpu.memory_space<vmem>>, vector<2x32xf32>
    tpu.vector_store %arg10[%538, %c0_318], %535 {strides = array<i32>} : memref<16x32xf32, #tpu.memory_space<vmem>>, vector<2x32xf32>,
    %c2_i32_319 = arith.constant 2 : i32
    %c2_i32_320 = arith.constant 2 : i32
    %540 = arith.muli %c2_i32_319, %c2_i32_320 : i32
    %541 = tpu.assume_multiple %540, 2 : i32
    %c0_321 = arith.constant 0 : index
    %c0_322 = arith.constant 0 : index
    %542 = vector.load %arg15[%c0_321, %c0_322] : memref<2x32xf32, #tpu.memory_space<vmem>>, vector<2x32xf32>
    %543 = arith.index_cast %541 : i32 to index
    %c0_323 = arith.constant 0 : index
    %544 = vector.load %arg11[%543, %c0_323] : memref<16x32xf32, #tpu.memory_space<vmem>>, vector<2x32xf32>
    %cst_324 = arith.constant dense<0.000000e+00> : vector<2x32xf32>
    %545 = tpu.matmul %542, %439, %cst_324 {dimension_numbers = #tpu.dot_dimension_numbers<[1], [0], [0], [1], [0, 0, 1, 1], [], []>} : vector<2x32xf32>, vector<32x32xf32>, vector<2x32xf32> -> vector<2x32xf32>
    %546 = arith.addf %544, %545 : vector<2x32xf32>
    %547 = arith.negf %546 : vector<2x32xf32>
    %548 = math.exp %547 : vector<2x32xf32>
    %cst_325 = arith.constant 1.000000e+00 : f32
    %549 = vector.broadcast %cst_325 : f32 to vector<2x32xf32>
    %550 = arith.addf %549, %548 : vector<2x32xf32>
    %551 = arith.divf %549, %550 : vector<2x32xf32>
    %552 = arith.index_cast %541 : i32 to index
    %c0_326 = arith.constant 0 : index
    %553 = vector.load %arg12[%552, %c0_326] : memref<16x32xf32, #tpu.memory_space<vmem>>, vector<2x32xf32>
    %cst_327 = arith.constant dense<0.000000e+00> : vector<2x32xf32>
    %554 = tpu.matmul %542, %441, %cst_327 {dimension_numbers = #tpu.dot_dimension_numbers<[1], [0], [0], [1], [0, 0, 1, 1], [], []>} : vector<2x32xf32>, vector<32x32xf32>, vector<2x32xf32> -> vector<2x32xf32>
    %555 = arith.addf %553, %554 : vector<2x32xf32>
    %556 = arith.negf %555 : vector<2x32xf32>
    %557 = math.exp %556 : vector<2x32xf32>
    %cst_328 = arith.constant 1.000000e+00 : f32
    %558 = vector.broadcast %cst_328 : f32 to vector<2x32xf32>
    %559 = arith.addf %558, %557 : vector<2x32xf32>
    %560 = arith.divf %558, %559 : vector<2x32xf32>
    %561 = arith.index_cast %541 : i32 to index
    %c0_329 = arith.constant 0 : index
    %562 = vector.load %arg13[%561, %c0_329] : memref<16x32xf32, #tpu.memory_space<vmem>>, vector<2x32xf32>
    %cst_330 = arith.constant dense<0.000000e+00> : vector<2x32xf32>
    %563 = tpu.matmul %542, %443, %cst_330 {dimension_numbers = #tpu.dot_dimension_numbers<[1], [0], [0], [1], [0, 0, 1, 1], [], []>} : vector<2x32xf32>, vector<32x32xf32>, vector<2x32xf32> -> vector<2x32xf32>
    %564 = arith.addf %562, %563 : vector<2x32xf32>
    %565 = math.tanh %564 : vector<2x32xf32>
    %566 = arith.index_cast %541 : i32 to index
    %c0_331 = arith.constant 0 : index
    %567 = vector.load %arg14[%566, %c0_331] : memref<16x32xf32, #tpu.memory_space<vmem>>, vector<2x32xf32>
    %cst_332 = arith.constant dense<0.000000e+00> : vector<2x32xf32>
    %568 = tpu.matmul %542, %445, %cst_332 {dimension_numbers = #tpu.dot_dimension_numbers<[1], [0], [0], [1], [0, 0, 1, 1], [], []>} : vector<2x32xf32>, vector<32x32xf32>, vector<2x32xf32> -> vector<2x32xf32>
    %569 = arith.addf %567, %568 : vector<2x32xf32>
    %570 = arith.negf %569 : vector<2x32xf32>
    %571 = math.exp %570 : vector<2x32xf32>
    %cst_333 = arith.constant 1.000000e+00 : f32
    %572 = vector.broadcast %cst_333 : f32 to vector<2x32xf32>
    %573 = arith.addf %572, %571 : vector<2x32xf32>
    %574 = arith.divf %572, %573 : vector<2x32xf32>
    %c0_334 = arith.constant 0 : index
    %c0_335 = arith.constant 0 : index
    %575 = vector.load %arg16[%c0_334, %c0_335] : memref<2x32xf32, #tpu.memory_space<vmem>>, vector<2x32xf32>
    %576 = arith.mulf %560, %575 : vector<2x32xf32>
    %577 = arith.mulf %551, %565 : vector<2x32xf32>
    %578 = arith.addf %576, %577 : vector<2x32xf32>
    %579 = math.tanh %578 : vector<2x32xf32>
    %580 = arith.mulf %574, %579 : vector<2x32xf32>
    %c0_336 = arith.constant 0 : index
    %c0_337 = arith.constant 0 : index
    %581 = vector.load %arg16[%c0_336, %c0_337] : memref<2x32xf32, #tpu.memory_space<vmem>>, vector<2x32xf32>
    tpu.vector_store %arg16[%c0_336, %c0_337], %578 {strides = array<i32>} : memref<2x32xf32, #tpu.memory_space<vmem>>, vector<2x32xf32>,
    %c0_338 = arith.constant 0 : index
    %c0_339 = arith.constant 0 : index
    %582 = vector.load %arg15[%c0_338, %c0_339] : memref<2x32xf32, #tpu.memory_space<vmem>>, vector<2x32xf32>
    tpu.vector_store %arg15[%c0_338, %c0_339], %580 {strides = array<i32>} : memref<2x32xf32, #tpu.memory_space<vmem>>, vector<2x32xf32>,
    %583 = arith.index_cast %541 : i32 to index
    %c0_340 = arith.constant 0 : index
    %584 = vector.load %arg10[%583, %c0_340] : memref<16x32xf32, #tpu.memory_space<vmem>>, vector<2x32xf32>
    tpu.vector_store %arg10[%583, %c0_340], %580 {strides = array<i32>} : memref<16x32xf32, #tpu.memory_space<vmem>>, vector<2x32xf32>,
    %c3_i32_341 = arith.constant 3 : i32
    %c2_i32_342 = arith.constant 2 : i32
    %585 = arith.muli %c3_i32_341, %c2_i32_342 : i32
    %586 = tpu.assume_multiple %585, 2 : i32
    %c0_343 = arith.constant 0 : index
    %c0_344 = arith.constant 0 : index
    %587 = vector.load %arg15[%c0_343, %c0_344] : memref<2x32xf32, #tpu.memory_space<vmem>>, vector<2x32xf32>
    %588 = arith.index_cast %586 : i32 to index
    %c0_345 = arith.constant 0 : index
    %589 = vector.load %arg11[%588, %c0_345] : memref<16x32xf32, #tpu.memory_space<vmem>>, vector<2x32xf32>
    %cst_346 = arith.constant dense<0.000000e+00> : vector<2x32xf32>
    %590 = tpu.matmul %587, %439, %cst_346 {dimension_numbers = #tpu.dot_dimension_numbers<[1], [0], [0], [1], [0, 0, 1, 1], [], []>} : vector<2x32xf32>, vector<32x32xf32>, vector<2x32xf32> -> vector<2x32xf32>
    %591 = arith.addf %589, %590 : vector<2x32xf32>
    %592 = arith.negf %591 : vector<2x32xf32>
    %593 = math.exp %592 : vector<2x32xf32>
    %cst_347 = arith.constant 1.000000e+00 : f32
    %594 = vector.broadcast %cst_347 : f32 to vector<2x32xf32>
    %595 = arith.addf %594, %593 : vector<2x32xf32>
    %596 = arith.divf %594, %595 : vector<2x32xf32>
    %597 = arith.index_cast %586 : i32 to index
    %c0_348 = arith.constant 0 : index
    %598 = vector.load %arg12[%597, %c0_348] : memref<16x32xf32, #tpu.memory_space<vmem>>, vector<2x32xf32>
    %cst_349 = arith.constant dense<0.000000e+00> : vector<2x32xf32>
    %599 = tpu.matmul %587, %441, %cst_349 {dimension_numbers = #tpu.dot_dimension_numbers<[1], [0], [0], [1], [0, 0, 1, 1], [], []>} : vector<2x32xf32>, vector<32x32xf32>, vector<2x32xf32> -> vector<2x32xf32>
    %600 = arith.addf %598, %599 : vector<2x32xf32>
    %601 = arith.negf %600 : vector<2x32xf32>
    %602 = math.exp %601 : vector<2x32xf32>
    %cst_350 = arith.constant 1.000000e+00 : f32
    %603 = vector.broadcast %cst_350 : f32 to vector<2x32xf32>
    %604 = arith.addf %603, %602 : vector<2x32xf32>
    %605 = arith.divf %603, %604 : vector<2x32xf32>
    %606 = arith.index_cast %586 : i32 to index
    %c0_351 = arith.constant 0 : index
    %607 = vector.load %arg13[%606, %c0_351] : memref<16x32xf32, #tpu.memory_space<vmem>>, vector<2x32xf32>
    %cst_352 = arith.constant dense<0.000000e+00> : vector<2x32xf32>
    %608 = tpu.matmul %587, %443, %cst_352 {dimension_numbers = #tpu.dot_dimension_numbers<[1], [0], [0], [1], [0, 0, 1, 1], [], []>} : vector<2x32xf32>, vector<32x32xf32>, vector<2x32xf32> -> vector<2x32xf32>
    %609 = arith.addf %607, %608 : vector<2x32xf32>
    %610 = math.tanh %609 : vector<2x32xf32>
    %611 = arith.index_cast %586 : i32 to index
    %c0_353 = arith.constant 0 : index
    %612 = vector.load %arg14[%611, %c0_353] : memref<16x32xf32, #tpu.memory_space<vmem>>, vector<2x32xf32>
    %cst_354 = arith.constant dense<0.000000e+00> : vector<2x32xf32>
    %613 = tpu.matmul %587, %445, %cst_354 {dimension_numbers = #tpu.dot_dimension_numbers<[1], [0], [0], [1], [0, 0, 1, 1], [], []>} : vector<2x32xf32>, vector<32x32xf32>, vector<2x32xf32> -> vector<2x32xf32>
    %614 = arith.addf %612, %613 : vector<2x32xf32>
    %615 = arith.negf %614 : vector<2x32xf32>
    %616 = math.exp %615 : vector<2x32xf32>
    %cst_355 = arith.constant 1.000000e+00 : f32
    %617 = vector.broadcast %cst_355 : f32 to vector<2x32xf32>
    %618 = arith.addf %617, %616 : vector<2x32xf32>
    %619 = arith.divf %617, %618 : vector<2x32xf32>
    %c0_356 = arith.constant 0 : index
    %c0_357 = arith.constant 0 : index
    %620 = vector.load %arg16[%c0_356, %c0_357] : memref<2x32xf32, #tpu.memory_space<vmem>>, vector<2x32xf32>
    %621 = arith.mulf %605, %620 : vector<2x32xf32>
    %622 = arith.mulf %596, %610 : vector<2x32xf32>
    %623 = arith.addf %621, %622 : vector<2x32xf32>
    %624 = math.tanh %623 : vector<2x32xf32>
    %625 = arith.mulf %619, %624 : vector<2x32xf32>
    %c0_358 = arith.constant 0 : index
    %c0_359 = arith.constant 0 : index
    %626 = vector.load %arg16[%c0_358, %c0_359] : memref<2x32xf32, #tpu.memory_space<vmem>>, vector<2x32xf32>
    tpu.vector_store %arg16[%c0_358, %c0_359], %623 {strides = array<i32>} : memref<2x32xf32, #tpu.memory_space<vmem>>, vector<2x32xf32>,
    %c0_360 = arith.constant 0 : index
    %c0_361 = arith.constant 0 : index
    %627 = vector.load %arg15[%c0_360, %c0_361] : memref<2x32xf32, #tpu.memory_space<vmem>>, vector<2x32xf32>
    tpu.vector_store %arg15[%c0_360, %c0_361], %625 {strides = array<i32>} : memref<2x32xf32, #tpu.memory_space<vmem>>, vector<2x32xf32>,
    %628 = arith.index_cast %586 : i32 to index
    %c0_362 = arith.constant 0 : index
    %629 = vector.load %arg10[%628, %c0_362] : memref<16x32xf32, #tpu.memory_space<vmem>>, vector<2x32xf32>
    tpu.vector_store %arg10[%628, %c0_362], %625 {strides = array<i32>} : memref<16x32xf32, #tpu.memory_space<vmem>>, vector<2x32xf32>,
    %c4_i32_363 = arith.constant 4 : i32
    %c2_i32_364 = arith.constant 2 : i32
    %630 = arith.muli %c4_i32_363, %c2_i32_364 : i32
    %631 = tpu.assume_multiple %630, 2 : i32
    %c0_365 = arith.constant 0 : index
    %c0_366 = arith.constant 0 : index
    %632 = vector.load %arg15[%c0_365, %c0_366] : memref<2x32xf32, #tpu.memory_space<vmem>>, vector<2x32xf32>
    %633 = arith.index_cast %631 : i32 to index
    %c0_367 = arith.constant 0 : index
    %634 = vector.load %arg11[%633, %c0_367] : memref<16x32xf32, #tpu.memory_space<vmem>>, vector<2x32xf32>
    %cst_368 = arith.constant dense<0.000000e+00> : vector<2x32xf32>
    %635 = tpu.matmul %632, %439, %cst_368 {dimension_numbers = #tpu.dot_dimension_numbers<[1], [0], [0], [1], [0, 0, 1, 1], [], []>} : vector<2x32xf32>, vector<32x32xf32>, vector<2x32xf32> -> vector<2x32xf32>
    %636 = arith.addf %634, %635 : vector<2x32xf32>
    %637 = arith.negf %636 : vector<2x32xf32>
    %638 = math.exp %637 : vector<2x32xf32>
    %cst_369 = arith.constant 1.000000e+00 : f32
    %639 = vector.broadcast %cst_369 : f32 to vector<2x32xf32>
    %640 = arith.addf %639, %638 : vector<2x32xf32>
    %641 = arith.divf %639, %640 : vector<2x32xf32>
    %642 = arith.index_cast %631 : i32 to index
    %c0_370 = arith.constant 0 : index
    %643 = vector.load %arg12[%642, %c0_370] : memref<16x32xf32, #tpu.memory_space<vmem>>, vector<2x32xf32>
    %cst_371 = arith.constant dense<0.000000e+00> : vector<2x32xf32>
    %644 = tpu.matmul %632, %441, %cst_371 {dimension_numbers = #tpu.dot_dimension_numbers<[1], [0], [0], [1], [0, 0, 1, 1], [], []>} : vector<2x32xf32>, vector<32x32xf32>, vector<2x32xf32> -> vector<2x32xf32>
    %645 = arith.addf %643, %644 : vector<2x32xf32>
    %646 = arith.negf %645 : vector<2x32xf32>
    %647 = math.exp %646 : vector<2x32xf32>
    %cst_372 = arith.constant 1.000000e+00 : f32
    %648 = vector.broadcast %cst_372 : f32 to vector<2x32xf32>
    %649 = arith.addf %648, %647 : vector<2x32xf32>
    %650 = arith.divf %648, %649 : vector<2x32xf32>
    %651 = arith.index_cast %631 : i32 to index
    %c0_373 = arith.constant 0 : index
    %652 = vector.load %arg13[%651, %c0_373] : memref<16x32xf32, #tpu.memory_space<vmem>>, vector<2x32xf32>
    %cst_374 = arith.constant dense<0.000000e+00> : vector<2x32xf32>
    %653 = tpu.matmul %632, %443, %cst_374 {dimension_numbers = #tpu.dot_dimension_numbers<[1], [0], [0], [1], [0, 0, 1, 1], [], []>} : vector<2x32xf32>, vector<32x32xf32>, vector<2x32xf32> -> vector<2x32xf32>
    %654 = arith.addf %652, %653 : vector<2x32xf32>
    %655 = math.tanh %654 : vector<2x32xf32>
    %656 = arith.index_cast %631 : i32 to index
    %c0_375 = arith.constant 0 : index
    %657 = vector.load %arg14[%656, %c0_375] : memref<16x32xf32, #tpu.memory_space<vmem>>, vector<2x32xf32>
    %cst_376 = arith.constant dense<0.000000e+00> : vector<2x32xf32>
    %658 = tpu.matmul %632, %445, %cst_376 {dimension_numbers = #tpu.dot_dimension_numbers<[1], [0], [0], [1], [0, 0, 1, 1], [], []>} : vector<2x32xf32>, vector<32x32xf32>, vector<2x32xf32> -> vector<2x32xf32>
    %659 = arith.addf %657, %658 : vector<2x32xf32>
    %660 = arith.negf %659 : vector<2x32xf32>
    %661 = math.exp %660 : vector<2x32xf32>
    %cst_377 = arith.constant 1.000000e+00 : f32
    %662 = vector.broadcast %cst_377 : f32 to vector<2x32xf32>
    %663 = arith.addf %662, %661 : vector<2x32xf32>
    %664 = arith.divf %662, %663 : vector<2x32xf32>
    %c0_378 = arith.constant 0 : index
    %c0_379 = arith.constant 0 : index
    %665 = vector.load %arg16[%c0_378, %c0_379] : memref<2x32xf32, #tpu.memory_space<vmem>>, vector<2x32xf32>
    %666 = arith.mulf %650, %665 : vector<2x32xf32>
    %667 = arith.mulf %641, %655 : vector<2x32xf32>
    %668 = arith.addf %666, %667 : vector<2x32xf32>
    %669 = math.tanh %668 : vector<2x32xf32>
    %670 = arith.mulf %664, %669 : vector<2x32xf32>
    %c0_380 = arith.constant 0 : index
    %c0_381 = arith.constant 0 : index
    %671 = vector.load %arg16[%c0_380, %c0_381] : memref<2x32xf32, #tpu.memory_space<vmem>>, vector<2x32xf32>
    tpu.vector_store %arg16[%c0_380, %c0_381], %668 {strides = array<i32>} : memref<2x32xf32, #tpu.memory_space<vmem>>, vector<2x32xf32>,
    %c0_382 = arith.constant 0 : index
    %c0_383 = arith.constant 0 : index
    %672 = vector.load %arg15[%c0_382, %c0_383] : memref<2x32xf32, #tpu.memory_space<vmem>>, vector<2x32xf32>
    tpu.vector_store %arg15[%c0_382, %c0_383], %670 {strides = array<i32>} : memref<2x32xf32, #tpu.memory_space<vmem>>, vector<2x32xf32>,
    %673 = arith.index_cast %631 : i32 to index
    %c0_384 = arith.constant 0 : index
    %674 = vector.load %arg10[%673, %c0_384] : memref<16x32xf32, #tpu.memory_space<vmem>>, vector<2x32xf32>
    tpu.vector_store %arg10[%673, %c0_384], %670 {strides = array<i32>} : memref<16x32xf32, #tpu.memory_space<vmem>>, vector<2x32xf32>,
    %c5_i32_385 = arith.constant 5 : i32
    %c2_i32_386 = arith.constant 2 : i32
    %675 = arith.muli %c5_i32_385, %c2_i32_386 : i32
    %676 = tpu.assume_multiple %675, 2 : i32
    %c0_387 = arith.constant 0 : index
    %c0_388 = arith.constant 0 : index
    %677 = vector.load %arg15[%c0_387, %c0_388] : memref<2x32xf32, #tpu.memory_space<vmem>>, vector<2x32xf32>
    %678 = arith.index_cast %676 : i32 to index
    %c0_389 = arith.constant 0 : index
    %679 = vector.load %arg11[%678, %c0_389] : memref<16x32xf32, #tpu.memory_space<vmem>>, vector<2x32xf32>
    %cst_390 = arith.constant dense<0.000000e+00> : vector<2x32xf32>
    %680 = tpu.matmul %677, %439, %cst_390 {dimension_numbers = #tpu.dot_dimension_numbers<[1], [0], [0], [1], [0, 0, 1, 1], [], []>} : vector<2x32xf32>, vector<32x32xf32>, vector<2x32xf32> -> vector<2x32xf32>
    %681 = arith.addf %679, %680 : vector<2x32xf32>
    %682 = arith.negf %681 : vector<2x32xf32>
    %683 = math.exp %682 : vector<2x32xf32>
    %cst_391 = arith.constant 1.000000e+00 : f32
    %684 = vector.broadcast %cst_391 : f32 to vector<2x32xf32>
    %685 = arith.addf %684, %683 : vector<2x32xf32>
    %686 = arith.divf %684, %685 : vector<2x32xf32>
    %687 = arith.index_cast %676 : i32 to index
    %c0_392 = arith.constant 0 : index
    %688 = vector.load %arg12[%687, %c0_392] : memref<16x32xf32, #tpu.memory_space<vmem>>, vector<2x32xf32>
    %cst_393 = arith.constant dense<0.000000e+00> : vector<2x32xf32>
    %689 = tpu.matmul %677, %441, %cst_393 {dimension_numbers = #tpu.dot_dimension_numbers<[1], [0], [0], [1], [0, 0, 1, 1], [], []>} : vector<2x32xf32>, vector<32x32xf32>, vector<2x32xf32> -> vector<2x32xf32>
    %690 = arith.addf %688, %689 : vector<2x32xf32>
    %691 = arith.negf %690 : vector<2x32xf32>
    %692 = math.exp %691 : vector<2x32xf32>
    %cst_394 = arith.constant 1.000000e+00 : f32
    %693 = vector.broadcast %cst_394 : f32 to vector<2x32xf32>
    %694 = arith.addf %693, %692 : vector<2x32xf32>
    %695 = arith.divf %693, %694 : vector<2x32xf32>
    %696 = arith.index_cast %676 : i32 to index
    %c0_395 = arith.constant 0 : index
    %697 = vector.load %arg13[%696, %c0_395] : memref<16x32xf32, #tpu.memory_space<vmem>>, vector<2x32xf32>
    %cst_396 = arith.constant dense<0.000000e+00> : vector<2x32xf32>
    %698 = tpu.matmul %677, %443, %cst_396 {dimension_numbers = #tpu.dot_dimension_numbers<[1], [0], [0], [1], [0, 0, 1, 1], [], []>} : vector<2x32xf32>, vector<32x32xf32>, vector<2x32xf32> -> vector<2x32xf32>
    %699 = arith.addf %697, %698 : vector<2x32xf32>
    %700 = math.tanh %699 : vector<2x32xf32>
    %701 = arith.index_cast %676 : i32 to index
    %c0_397 = arith.constant 0 : index
    %702 = vector.load %arg14[%701, %c0_397] : memref<16x32xf32, #tpu.memory_space<vmem>>, vector<2x32xf32>
    %cst_398 = arith.constant dense<0.000000e+00> : vector<2x32xf32>
    %703 = tpu.matmul %677, %445, %cst_398 {dimension_numbers = #tpu.dot_dimension_numbers<[1], [0], [0], [1], [0, 0, 1, 1], [], []>} : vector<2x32xf32>, vector<32x32xf32>, vector<2x32xf32> -> vector<2x32xf32>
    %704 = arith.addf %702, %703 : vector<2x32xf32>
    %705 = arith.negf %704 : vector<2x32xf32>
    %706 = math.exp %705 : vector<2x32xf32>
    %cst_399 = arith.constant 1.000000e+00 : f32
    %707 = vector.broadcast %cst_399 : f32 to vector<2x32xf32>
    %708 = arith.addf %707, %706 : vector<2x32xf32>
    %709 = arith.divf %707, %708 : vector<2x32xf32>
    %c0_400 = arith.constant 0 : index
    %c0_401 = arith.constant 0 : index
    %710 = vector.load %arg16[%c0_400, %c0_401] : memref<2x32xf32, #tpu.memory_space<vmem>>, vector<2x32xf32>
    %711 = arith.mulf %695, %710 : vector<2x32xf32>
    %712 = arith.mulf %686, %700 : vector<2x32xf32>
    %713 = arith.addf %711, %712 : vector<2x32xf32>
    %714 = math.tanh %713 : vector<2x32xf32>
    %715 = arith.mulf %709, %714 : vector<2x32xf32>
    %c0_402 = arith.constant 0 : index
    %c0_403 = arith.constant 0 : index
    %716 = vector.load %arg16[%c0_402, %c0_403] : memref<2x32xf32, #tpu.memory_space<vmem>>, vector<2x32xf32>
    tpu.vector_store %arg16[%c0_402, %c0_403], %713 {strides = array<i32>} : memref<2x32xf32, #tpu.memory_space<vmem>>, vector<2x32xf32>,
    %c0_404 = arith.constant 0 : index
    %c0_405 = arith.constant 0 : index
    %717 = vector.load %arg15[%c0_404, %c0_405] : memref<2x32xf32, #tpu.memory_space<vmem>>, vector<2x32xf32>
    tpu.vector_store %arg15[%c0_404, %c0_405], %715 {strides = array<i32>} : memref<2x32xf32, #tpu.memory_space<vmem>>, vector<2x32xf32>,
    %718 = arith.index_cast %676 : i32 to index
    %c0_406 = arith.constant 0 : index
    %719 = vector.load %arg10[%718, %c0_406] : memref<16x32xf32, #tpu.memory_space<vmem>>, vector<2x32xf32>
    tpu.vector_store %arg10[%718, %c0_406], %715 {strides = array<i32>} : memref<16x32xf32, #tpu.memory_space<vmem>>, vector<2x32xf32>,
    %c6_i32_407 = arith.constant 6 : i32
    %c2_i32_408 = arith.constant 2 : i32
    %720 = arith.muli %c6_i32_407, %c2_i32_408 : i32
    %721 = tpu.assume_multiple %720, 2 : i32
    %c0_409 = arith.constant 0 : index
    %c0_410 = arith.constant 0 : index
    %722 = vector.load %arg15[%c0_409, %c0_410] : memref<2x32xf32, #tpu.memory_space<vmem>>, vector<2x32xf32>
    %723 = arith.index_cast %721 : i32 to index
    %c0_411 = arith.constant 0 : index
    %724 = vector.load %arg11[%723, %c0_411] : memref<16x32xf32, #tpu.memory_space<vmem>>, vector<2x32xf32>
    %cst_412 = arith.constant dense<0.000000e+00> : vector<2x32xf32>
    %725 = tpu.matmul %722, %439, %cst_412 {dimension_numbers = #tpu.dot_dimension_numbers<[1], [0], [0], [1], [0, 0, 1, 1], [], []>} : vector<2x32xf32>, vector<32x32xf32>, vector<2x32xf32> -> vector<2x32xf32>
    %726 = arith.addf %724, %725 : vector<2x32xf32>
    %727 = arith.negf %726 : vector<2x32xf32>
    %728 = math.exp %727 : vector<2x32xf32>
    %cst_413 = arith.constant 1.000000e+00 : f32
    %729 = vector.broadcast %cst_413 : f32 to vector<2x32xf32>
    %730 = arith.addf %729, %728 : vector<2x32xf32>
    %731 = arith.divf %729, %730 : vector<2x32xf32>
    %732 = arith.index_cast %721 : i32 to index
    %c0_414 = arith.constant 0 : index
    %733 = vector.load %arg12[%732, %c0_414] : memref<16x32xf32, #tpu.memory_space<vmem>>, vector<2x32xf32>
    %cst_415 = arith.constant dense<0.000000e+00> : vector<2x32xf32>
    %734 = tpu.matmul %722, %441, %cst_415 {dimension_numbers = #tpu.dot_dimension_numbers<[1], [0], [0], [1], [0, 0, 1, 1], [], []>} : vector<2x32xf32>, vector<32x32xf32>, vector<2x32xf32> -> vector<2x32xf32>
    %735 = arith.addf %733, %734 : vector<2x32xf32>
    %736 = arith.negf %735 : vector<2x32xf32>
    %737 = math.exp %736 : vector<2x32xf32>
    %cst_416 = arith.constant 1.000000e+00 : f32
    %738 = vector.broadcast %cst_416 : f32 to vector<2x32xf32>
    %739 = arith.addf %738, %737 : vector<2x32xf32>
    %740 = arith.divf %738, %739 : vector<2x32xf32>
    %741 = arith.index_cast %721 : i32 to index
    %c0_417 = arith.constant 0 : index
    %742 = vector.load %arg13[%741, %c0_417] : memref<16x32xf32, #tpu.memory_space<vmem>>, vector<2x32xf32>
    %cst_418 = arith.constant dense<0.000000e+00> : vector<2x32xf32>
    %743 = tpu.matmul %722, %443, %cst_418 {dimension_numbers = #tpu.dot_dimension_numbers<[1], [0], [0], [1], [0, 0, 1, 1], [], []>} : vector<2x32xf32>, vector<32x32xf32>, vector<2x32xf32> -> vector<2x32xf32>
    %744 = arith.addf %742, %743 : vector<2x32xf32>
    %745 = math.tanh %744 : vector<2x32xf32>
    %746 = arith.index_cast %721 : i32 to index
    %c0_419 = arith.constant 0 : index
    %747 = vector.load %arg14[%746, %c0_419] : memref<16x32xf32, #tpu.memory_space<vmem>>, vector<2x32xf32>
    %cst_420 = arith.constant dense<0.000000e+00> : vector<2x32xf32>
    %748 = tpu.matmul %722, %445, %cst_420 {dimension_numbers = #tpu.dot_dimension_numbers<[1], [0], [0], [1], [0, 0, 1, 1], [], []>} : vector<2x32xf32>, vector<32x32xf32>, vector<2x32xf32> -> vector<2x32xf32>
    %749 = arith.addf %747, %748 : vector<2x32xf32>
    %750 = arith.negf %749 : vector<2x32xf32>
    %751 = math.exp %750 : vector<2x32xf32>
    %cst_421 = arith.constant 1.000000e+00 : f32
    %752 = vector.broadcast %cst_421 : f32 to vector<2x32xf32>
    %753 = arith.addf %752, %751 : vector<2x32xf32>
    %754 = arith.divf %752, %753 : vector<2x32xf32>
    %c0_422 = arith.constant 0 : index
    %c0_423 = arith.constant 0 : index
    %755 = vector.load %arg16[%c0_422, %c0_423] : memref<2x32xf32, #tpu.memory_space<vmem>>, vector<2x32xf32>
    %756 = arith.mulf %740, %755 : vector<2x32xf32>
    %757 = arith.mulf %731, %745 : vector<2x32xf32>
    %758 = arith.addf %756, %757 : vector<2x32xf32>
    %759 = math.tanh %758 : vector<2x32xf32>
    %760 = arith.mulf %754, %759 : vector<2x32xf32>
    %c0_424 = arith.constant 0 : index
    %c0_425 = arith.constant 0 : index
    %761 = vector.load %arg16[%c0_424, %c0_425] : memref<2x32xf32, #tpu.memory_space<vmem>>, vector<2x32xf32>
    tpu.vector_store %arg16[%c0_424, %c0_425], %758 {strides = array<i32>} : memref<2x32xf32, #tpu.memory_space<vmem>>, vector<2x32xf32>,
    %c0_426 = arith.constant 0 : index
    %c0_427 = arith.constant 0 : index
    %762 = vector.load %arg15[%c0_426, %c0_427] : memref<2x32xf32, #tpu.memory_space<vmem>>, vector<2x32xf32>
    tpu.vector_store %arg15[%c0_426, %c0_427], %760 {strides = array<i32>} : memref<2x32xf32, #tpu.memory_space<vmem>>, vector<2x32xf32>,
    %763 = arith.index_cast %721 : i32 to index
    %c0_428 = arith.constant 0 : index
    %764 = vector.load %arg10[%763, %c0_428] : memref<16x32xf32, #tpu.memory_space<vmem>>, vector<2x32xf32>
    tpu.vector_store %arg10[%763, %c0_428], %760 {strides = array<i32>} : memref<16x32xf32, #tpu.memory_space<vmem>>, vector<2x32xf32>,
    %c7_i32_429 = arith.constant 7 : i32
    %c2_i32_430 = arith.constant 2 : i32
    %765 = arith.muli %c7_i32_429, %c2_i32_430 : i32
    %766 = tpu.assume_multiple %765, 2 : i32
    %c0_431 = arith.constant 0 : index
    %c0_432 = arith.constant 0 : index
    %767 = vector.load %arg15[%c0_431, %c0_432] : memref<2x32xf32, #tpu.memory_space<vmem>>, vector<2x32xf32>
    %768 = arith.index_cast %766 : i32 to index
    %c0_433 = arith.constant 0 : index
    %769 = vector.load %arg11[%768, %c0_433] : memref<16x32xf32, #tpu.memory_space<vmem>>, vector<2x32xf32>
    %cst_434 = arith.constant dense<0.000000e+00> : vector<2x32xf32>
    %770 = tpu.matmul %767, %439, %cst_434 {dimension_numbers = #tpu.dot_dimension_numbers<[1], [0], [0], [1], [0, 0, 1, 1], [], []>} : vector<2x32xf32>, vector<32x32xf32>, vector<2x32xf32> -> vector<2x32xf32>
    %771 = arith.addf %769, %770 : vector<2x32xf32>
    %772 = arith.negf %771 : vector<2x32xf32>
    %773 = math.exp %772 : vector<2x32xf32>
    %cst_435 = arith.constant 1.000000e+00 : f32
    %774 = vector.broadcast %cst_435 : f32 to vector<2x32xf32>
    %775 = arith.addf %774, %773 : vector<2x32xf32>
    %776 = arith.divf %774, %775 : vector<2x32xf32>
    %777 = arith.index_cast %766 : i32 to index
    %c0_436 = arith.constant 0 : index
    %778 = vector.load %arg12[%777, %c0_436] : memref<16x32xf32, #tpu.memory_space<vmem>>, vector<2x32xf32>
    %cst_437 = arith.constant dense<0.000000e+00> : vector<2x32xf32>
    %779 = tpu.matmul %767, %441, %cst_437 {dimension_numbers = #tpu.dot_dimension_numbers<[1], [0], [0], [1], [0, 0, 1, 1], [], []>} : vector<2x32xf32>, vector<32x32xf32>, vector<2x32xf32> -> vector<2x32xf32>
    %780 = arith.addf %778, %779 : vector<2x32xf32>
    %781 = arith.negf %780 : vector<2x32xf32>
    %782 = math.exp %781 : vector<2x32xf32>
    %cst_438 = arith.constant 1.000000e+00 : f32
    %783 = vector.broadcast %cst_438 : f32 to vector<2x32xf32>
    %784 = arith.addf %783, %782 : vector<2x32xf32>
    %785 = arith.divf %783, %784 : vector<2x32xf32>
    %786 = arith.index_cast %766 : i32 to index
    %c0_439 = arith.constant 0 : index
    %787 = vector.load %arg13[%786, %c0_439] : memref<16x32xf32, #tpu.memory_space<vmem>>, vector<2x32xf32>
    %cst_440 = arith.constant dense<0.000000e+00> : vector<2x32xf32>
    %788 = tpu.matmul %767, %443, %cst_440 {dimension_numbers = #tpu.dot_dimension_numbers<[1], [0], [0], [1], [0, 0, 1, 1], [], []>} : vector<2x32xf32>, vector<32x32xf32>, vector<2x32xf32> -> vector<2x32xf32>
    %789 = arith.addf %787, %788 : vector<2x32xf32>
    %790 = math.tanh %789 : vector<2x32xf32>
    %791 = arith.index_cast %766 : i32 to index
    %c0_441 = arith.constant 0 : index
    %792 = vector.load %arg14[%791, %c0_441] : memref<16x32xf32, #tpu.memory_space<vmem>>, vector<2x32xf32>
    %cst_442 = arith.constant dense<0.000000e+00> : vector<2x32xf32>
    %793 = tpu.matmul %767, %445, %cst_442 {dimension_numbers = #tpu.dot_dimension_numbers<[1], [0], [0], [1], [0, 0, 1, 1], [], []>} : vector<2x32xf32>, vector<32x32xf32>, vector<2x32xf32> -> vector<2x32xf32>
    %794 = arith.addf %792, %793 : vector<2x32xf32>
    %795 = arith.negf %794 : vector<2x32xf32>
    %796 = math.exp %795 : vector<2x32xf32>
    %cst_443 = arith.constant 1.000000e+00 : f32
    %797 = vector.broadcast %cst_443 : f32 to vector<2x32xf32>
    %798 = arith.addf %797, %796 : vector<2x32xf32>
    %799 = arith.divf %797, %798 : vector<2x32xf32>
    %c0_444 = arith.constant 0 : index
    %c0_445 = arith.constant 0 : index
    %800 = vector.load %arg16[%c0_444, %c0_445] : memref<2x32xf32, #tpu.memory_space<vmem>>, vector<2x32xf32>
    %801 = arith.mulf %785, %800 : vector<2x32xf32>
    %802 = arith.mulf %776, %790 : vector<2x32xf32>
    %803 = arith.addf %801, %802 : vector<2x32xf32>
    %804 = math.tanh %803 : vector<2x32xf32>
    %805 = arith.mulf %799, %804 : vector<2x32xf32>
    %c0_446 = arith.constant 0 : index
    %c0_447 = arith.constant 0 : index
    %806 = vector.load %arg16[%c0_446, %c0_447] : memref<2x32xf32, #tpu.memory_space<vmem>>, vector<2x32xf32>
    tpu.vector_store %arg16[%c0_446, %c0_447], %803 {strides = array<i32>} : memref<2x32xf32, #tpu.memory_space<vmem>>, vector<2x32xf32>,
    %c0_448 = arith.constant 0 : index
    %c0_449 = arith.constant 0 : index
    %807 = vector.load %arg15[%c0_448, %c0_449] : memref<2x32xf32, #tpu.memory_space<vmem>>, vector<2x32xf32>
    tpu.vector_store %arg15[%c0_448, %c0_449], %805 {strides = array<i32>} : memref<2x32xf32, #tpu.memory_space<vmem>>, vector<2x32xf32>,
    %808 = arith.index_cast %766 : i32 to index
    %c0_450 = arith.constant 0 : index
    %809 = vector.load %arg10[%808, %c0_450] : memref<16x32xf32, #tpu.memory_space<vmem>>, vector<2x32xf32>
    tpu.vector_store %arg10[%808, %c0_450], %805 {strides = array<i32>} : memref<16x32xf32, #tpu.memory_space<vmem>>, vector<2x32xf32>,
    %c8_i32_451 = arith.constant 8 : i32
    %c0_452 = arith.constant 0 : index
    %c0_453 = arith.constant 0 : index
    %810 = vector.load %arg10[%c0_452, %c0_453] : memref<16x32xf32, #tpu.memory_space<vmem>>, vector<16x32xf32>
    %c0_454 = arith.constant 0 : index
    %c0_455 = arith.constant 0 : index
    %811 = vector.load %arg7[%c0_454, %c0_455] : memref<32x128xf32, #tpu.memory_space<vmem>>, vector<32x128xf32>
    %cst_456 = arith.constant dense<0.000000e+00> : vector<16x128xf32>
    %812 = tpu.matmul %810, %811, %cst_456 {dimension_numbers = #tpu.dot_dimension_numbers<[1], [0], [0], [1], [0, 0, 1, 1], [], []>} : vector<16x32xf32>, vector<32x128xf32>, vector<16x128xf32> -> vector<16x128xf32>
    %c0_457 = arith.constant 0 : index
    %c0_458 = arith.constant 0 : index
    %813 = vector.load %arg8[%c0_457, %c0_458] : memref<1x128xf32, #tpu.memory_space<vmem>>, vector<1x128xf32>
    %814 = vector.broadcast %813 : vector<1x128xf32> to vector<16x128xf32>
    %815 = arith.addf %812, %814 : vector<16x128xf32>
    %c0_459 = arith.constant 0 : index
    %c0_460 = arith.constant 0 : index
    %816 = vector.load %arg9[%c0_459, %c0_460] : memref<16x128xf32, #tpu.memory_space<vmem>>, vector<16x128xf32>
    tpu.vector_store %arg9[%c0_459, %c0_460], %815 {strides = array<i32>} : memref<16x128xf32, #tpu.memory_space<vmem>>, vector<16x128xf32>,
    return
  }
}

</mosaic_0001>

<bundles_post_ra>
// kernel: tpu_custom_call.1
= control target key start
LH: loop header
LB: loop body
LE: loop exit
PB: predicated region body
PF: predicated region fallthrough
CT: control target
= control target key end

     0   :  { %14 = vsyncpa [#allocation10], 0  ;;  %s4441_s0 = inlined_call_operand.hbm [shape: f32[16,16], index: 0, kind: input, shape index: {}]   ;;  %s4442_s1 = inlined_call_operand.hbm [shape: f32[4,16,32], index: 1, kind: input, shape index: {}]   ;;  %s4443_s2 = inlined_call_operand.hbm [shape: f32[4,32,32], index: 2, kind: input, shape index: {}]   ;;  %s4444_s3 = inlined_call_operand.hbm [shape: f32[4,1,32], index: 3, kind: input, shape index: {}]   ;;  %s4445_s4 = inlined_call_operand.hbm [shape: f32[4,32,32], index: 4, kind: input, shape index: {}]   ;;  %s4446_s5 = inlined_call_operand.hbm [shape: f32[4,32,32], index: 5, kind: input, shape index: {}]   ;;  %s4447_s6 = inlined_call_operand.vmem [shape: f32[4,1,32], index: 6, kind: input, shape index: {}]   ;;  %s4448_s7 = inlined_call_operand.hbm [shape: f32[32,128], index: 7, kind: input, shape index: {}]   ;;  %s4449_s8 = inlined_call_operand.vmem [shape: f32[1,128], index: 8, kind: input, shape index: {}]   ;;  %s4450_s9 = inlined_call_operand.hbm [shape: f32[16,128], index: 9, kind: output, shape index: {}]  }
   0x1   :  { %15 = vsyncpa [#allocation13], 0 }
   0x2   :  { %16 = vsyncpa [#allocation16], 0 }
   0x3   :  { %17 = vsyncpa [#allocation19], 0 }
   0x4   :  { %18 = vsyncpa [#allocation11], 0  ;;  %s36_s11 = sshll.u32 %s4442_s1, 4  ;;  %s3760_s12 = smov [#allocation12]   ;;  %s37_s11 = int_to_ptr.hbm [resolvable:$true] %s36_s11 }
   0x5   :  { %s38_s13 = sshll.u32 %s3760_s12, 4  ;;  %s62_s16 = sshll.u32 %s4444_s3, 4  ;;  %s39_s13 = int_to_ptr.vmem [resolvable:$true] %s38_s13  ;;  %s63_s16 = int_to_ptr.hbm [resolvable:$true] %s62_s16 }
   0x6   :  { %s3761_s17 = smov 128   ;;  %s3762_s18 = smov 8  }
   0x7   :  { %44 = dma.hbm_to_vmem [thread:$0]  %s37_s11, 1024, %s39_s13, [#allocation13], %s3761_s17, %s3761_s17, %s3762_s18  }
   0x8   :  { %s3763_s19 = smov [#allocation15]   ;;  %s3764_s21 = smov 16  }
   0x9   :  { %s64_s20 = sshll.u32 %s3763_s19, 4  ;;  %s3765_s1 = smov 1   ;;  %s65_s20 = int_to_ptr.vmem [resolvable:$true] %s64_s20 }
   0xa   :  { %70 = dma.hbm_to_vmem [thread:$0]  %s63_s16, 64, %s65_s20, [#allocation16], %s3764_s21, %s3764_s21, %s3765_s1  }
   0xb   :  { %s88_s24 = sshll.u32 %s4446_s5, 4  ;;  %s3766_s25 = smov [#allocation18]   ;;  %s89_s24 = int_to_ptr.hbm [resolvable:$true] %s88_s24 }
   0xc   :  { %s90_s3 = sshll.u32 %s3766_s25, 4  ;;  %s23_s28 = sshll.u32 %s4441_s0, 4  ;;  %s91_s3 = int_to_ptr.vmem [resolvable:$true] %s90_s3  ;;  %s24_s28 = int_to_ptr.hbm [resolvable:$true] %s23_s28 }
   0xd   :  { %96 = dma.hbm_to_vmem [thread:$0]  %s89_s24, 2048, %s91_s3, [#allocation19], %s3761_s17, %s3761_s17, %s3762_s18  }
   0xe   :  { %s3767_s29 = smov [#allocation9]   ;;  %s49_s12 = sshll.u32 %s4443_s2, 4  ;;  %s50_s12 = int_to_ptr.hbm [resolvable:$true] %s49_s12 }
   0xf   :  { %s25_s30 = sshll.u32 %s3767_s29, 4  ;;  %s75_s0 = sshll.u32 %s4445_s4, 4  ;;  %s26_s30 = int_to_ptr.vmem [resolvable:$true] %s25_s30  ;;  %s76_s0 = int_to_ptr.hbm [resolvable:$true] %s75_s0 }
  0x10   :  { %31 = dma.hbm_to_vmem [thread:$0]  %s24_s28, 256, %s26_s30, [#allocation10], %s3761_s17, %s3761_s17, %s3762_s18  }
  0x11   :  { %s3768_s14 = smov [#allocation14]   ;;  %s3769_s16 = smov [#allocation17]  }
  0x12   :  { %s51_s15 = sshll.u32 %s3768_s14, 4  ;;  %s77_s2 = sshll.u32 %s3769_s16, 4  ;;  %s52_s15 = int_to_ptr.vmem [resolvable:$true] %s51_s15  ;;  %s78_s2 = int_to_ptr.vmem [resolvable:$true] %s77_s2 }
  0x13   :  { %57 = dma.hbm_to_vmem [thread:$0]  %s50_s12, 2048, %s52_s15, [#allocation13], %s3761_s17, %s3761_s17, %s3762_s18  }
  0x14   :  { %s103_s21 = sshll.u32 %s4448_s7, 4  ;;  %s3770_s4 = smov [#allocation20]   ;;  %s104_s21 = int_to_ptr.hbm [resolvable:$true] %s103_s21 }
  0x15   :  { %83 = dma.hbm_to_vmem [thread:$0]  %s76_s0, 2048, %s78_s2, [#allocation16], %s3761_s17, %s3761_s17, %s3762_s18  }
  0x16   :  { %s105_s1 = sshll.u32 %s3770_s4, 4  ;;  %s106_s1 = int_to_ptr.vmem [resolvable:$true] %s105_s1 }
  0x17   :  { %111 = dma.hbm_to_vmem [thread:$0]  %s104_s21, 512, %s106_s1, [#allocation19], %s3761_s17, %s3761_s17, %s3762_s18  }
  0x18   :  { %3750 = dma.done.wait [#allocation10], 256  }
  0x19   :  { %3751 = vsyncadd [#allocation10], 4294967040 }
  0x1a   :  { %3752 = dma.done.wait [#allocation13], 3072  }
  0x1b   :  { %3753 = vsyncadd [#allocation13], 4294964224 }
  0x1c   :  { %3754 = dma.done.wait [#allocation16], 2112  }
  0x1d   :  { %3755 = vsyncadd [#allocation16], 4294965184 }
  0x1e   :  { %3756 = dma.done.wait [#allocation19], 2560  }
  0x1f   :  { %3757 = vsyncadd [#allocation19], 4294964736  ;;  %vm301_vm0 = vcmask 254976   ;;  %v3771_v0 = vmov 0.0   ;;  %v145_v1 = vld [vmem:[#allocation12 + $0x8] sm:$0xff]  ;;  %v251_v2 = vld [vmem:[#allocation12 + $0x38] sm:$0xff] }
  0x20   :  { %302 = vst.msk [vmem:[#allocation7] sm:$0x3] %vm301_vm0, %v3771_v0  ;;  %v144_v3 = vld [vmem:[#allocation12] sm:$0xff]  ;;  %3246 = vmatpush.msra.mxu1 %v145_v1  ;;  %271 = vmatpush.msra.mxu3 %v251_v2  ;;  %v250_v4 = vld [vmem:[#allocation12 + $0x30] sm:$0xff]  ;;  %v143_v5 = vld [vmem:[#allocation9 + $0x8] sm:$0xff]  ;;  %vm150_vm1 = vcmask 130048  }
  0x21   :  { %303 = vst.msk [vmem:[#allocation8] sm:$0x3] %vm301_vm0, %v3771_v0  ;;  %171 = vmatpush.msra.mxu0 %v145_v1  ;;  %v185_v6 = vld [vmem:[#allocation12 + $0x18] sm:$0xff]  ;;  %v142_v7 = vld [vmem:[#allocation9] sm:$0xff]  ;;  %v218_v8 = vld [vmem:[#allocation12 + $0x28] sm:$0xff]  ;;  %vm180_vm2 = vcmask 261120  }
  0x22   :  { %3247 = vmatpush.msra.mxu1 %v144_v3  ;;  %272 = vmatpush.msra.mxu3 %v250_v4  ;;  %v184_v9 = vld [vmem:[#allocation12 + $0x10] sm:$0xff]  ;;  %v3867_v10 = vld [vmem:[#allocation14 + $0x18] sm:$0xff]  ;;  %v217_v12 = vld [vmem:[#allocation12 + $0x20] sm:$0xff]  ;;  %s3097_s11 = sshll.u32 %s4450_s9, 4  ;;  %s3098_s11 = int_to_ptr.hbm [resolvable:$true] %s3097_s11 }
  0x23   :  { %172 = vmatpush.msra.mxu0 %v144_v3  ;;  %3114 = vmatmul.msk.f32.vlgmr.msra.gmra.mxu1 %vm150_vm1, %v143_v5  ;;  %v3870_v11 = vld [vmem:[#allocation14 + $0x38] sm:$0xff]  ;;  %v3873_v13 = vld [vmem:[#allocation14 + $0x10] sm:$0xff]  ;;  %v3880_v16 = vld [vmem:[#allocation14 + $0x8] sm:$0xff] }
  0x24   :  { %205 = vmatpush.msrb.mxu1 %v185_v6  ;;  %3119 = vmatmul.msk.f32.vlgmr.msra.gmra.mxu3 %vm150_vm1, %v142_v7  ;;  %v3875_v14 = vld [vmem:[#allocation14 + $0x78] sm:$0xff]  ;;  %v3878_v15 = vld [vmem:[#allocation14 + $0x30] sm:$0xff]  ;;  %v3883_v17 = vld [vmem:[#allocation14] sm:$0xff] }
  0x25   :  { %3113 = vmatmul.msk.f32.vlgmr.msra.gmra.mxu0 %vm150_vm1, %v142_v7  ;;  %238 = vmatpush.msra.mxu2 %v218_v8  ;;  %v3885_v18 = vld [vmem:[#allocation14 + $0x70] sm:$0xff]  ;;  %v3889_v20 = vld [vmem:[#allocation14 + $0x68] sm:$0xff]  ;;  %v3891_v21 = vld [vmem:[#allocation14 + $0x58] sm:$0xff] }
  0x26   :  { %206 = vmatpush.msrb.mxu1 %v184_v9  ;;  %321 = vmatpush.msrb.mxu0 %v3867_v10  ;;  %v3898_v22 = vld [vmem:[#allocation14 + $0x28] sm:$0xff]  ;;  %v3901_v23 = vld [vmem:[#allocation14 + $0x50] sm:$0xff]  ;;  %v3905_v24 = vld [vmem:[#allocation14 + $0x60] sm:$0xff] }
  0x27   :  { %239 = vmatpush.msra.mxu2 %v217_v12  ;;  %426 = vmatpush.msrb.mxu3 %v3875_v14  ;;  %v304_v19 = vld [vmem:[#allocation7] sm:$0x3]  ;;  %v3909_v25 = vld [vmem:[#allocation14 + $0x20] sm:$0xff] }
  0x28   :  { %362 = vmatpush.msra.mxu1 %v3870_v11  ;;  %322 = vmatpush.msrb.mxu0 %v3873_v13  ;;  %v3911_v26 = vld [vmem:[#allocation14 + $0x48] sm:$0xff]  ;;  %v3916_v27 = vld [vmem:[#allocation14 + $0x40] sm:$0xff] }
  0x29   :  { %3117 = vmatmul.msk.f32.vlgmr.msra.gmra.mxu2 %vm150_vm1, %v142_v7  ;;  %427 = vmatpush.msrb.mxu3 %v3885_v18  ;;  %v3261_v28 = vld [vmem:[#allocation15] ss:$0 sm:$0xff]  ;;  %v3262_v33 = vld [vmem:[#allocation15 + $0x3] ss:$0 sm:$0xff]  ;;  %v3263_v34 = vld [vmem:[#allocation15 + $0x1] ss:$0 sm:$0xff] }
  0x2a   :  { %363 = vmatpush.msra.mxu1 %v3878_v15  ;;  %323 = vmatpush.msrb.mxu0 %v3880_v16  ;;  %v3264_v39 = vld [vmem:[#allocation15 + $0x2] ss:$0 sm:$0xff] }
  0x2b   :  { %3115 = vmatmul.msk.f32.vlgmr.msrb.gmra.mxu1 %vm150_vm1, %v142_v7  ;;  %403 = vmatpush.msrb.mxu2 %v3891_v21 }
  0x2c   :  { %3120 = vmatmul.msk.f32.gmra.mxu3 %vm150_vm1, %v143_v5  ;;  %324 = vmatpush.msrb.mxu0 %v3883_v17 }
  0x2d   :  { %3121 = vmatmul.msk.f32.vlgmr.msrb.gmra.mxu0 %vm180_vm2, %v304_v19  ;;  %428 = vmatpush.msrb.mxu3 %v3889_v20 }
  0x2e   :  { %364 = vmatpush.msra.mxu1 %v3898_v22  ;;  %404 = vmatpush.msrb.mxu2 %v3901_v23 }
  0x2f   :  { %429 = vmatpush.msrb.mxu3 %v3905_v24  ;;  %481 = vmatpush.msra.mxu0 %v3867_v10 }
  0x30   :  { %365 = vmatpush.msra.mxu1 %v3909_v25  ;;  %405 = vmatpush.msrb.mxu2 %v3911_v26 }
  0x31   :  { %3118 = vmatmul.msk.f32.gmra.mxu2 %vm150_vm1, %v143_v5  ;;  %589 = vmatpush.msra.mxu3 %v3875_v14 }
  0x32   :  { %523 = vmatpush.msrb.mxu1 %v3870_v11  ;;  %406 = vmatpush.msrb.mxu2 %v3916_v27 }
  0x33   :  { %3116 = vmatmul.msk.f32.gmra.mxu1 %vm150_vm1, %v143_v5  ;;  %482 = vmatpush.msra.mxu0 %v3873_v13 }
  0x34   :  { %565 = vmatpush.msra.mxu2 %v3891_v21  ;;  %3126 = vmatmul.msk.f32.vlgmr.msrb.gmra.mxu3 %vm180_vm2, %v304_v19 }
  0x35   :  { %524 = vmatpush.msrb.mxu1 %v3878_v15  ;;  %590 = vmatpush.msra.mxu3 %v3885_v18 }
  0x36   :  { %566 = vmatpush.msra.mxu2 %v3901_v23  ;;  %483 = vmatpush.msra.mxu0 %v3880_v16 }
  0x37   :  { %525 = vmatpush.msrb.mxu1 %v3898_v22  ;;  %591 = vmatpush.msra.mxu3 %v3889_v20 }
  0x38   :  { %567 = vmatpush.msra.mxu2 %v3911_v26  ;;  %484 = vmatpush.msra.mxu0 %v3883_v17 }
  0x39   :  { %3125 = vmatmul.msk.f32.vlgmr.msrb.gmra.mxu2 %vm180_vm2, %v304_v19  ;;  %526 = vmatpush.msrb.mxu1 %v3909_v25 }
  0x3a   :  { %568 = vmatpush.msra.mxu2 %v3916_v27  ;;  %592 = vmatpush.msra.mxu3 %v3905_v24 }
  0x3b   :  { %3123 = vmatmul.msk.f32.vlgmr.msra.gmra.mxu1 %vm180_vm2, %v304_v19  ;;  %645 = vmatpush.msrb.mxu0 %v3867_v10 }
  0x3c   :  { %687 = vmatpush.msra.mxu1 %v3870_v11  ;;  %729 = vmatpush.msrb.mxu2 %v3891_v21 }
  0x3d   :  { %753 = vmatpush.msrb.mxu3 %v3875_v14  ;;  %646 = vmatpush.msrb.mxu0 %v3873_v13 }
  0x3e   :  { %688 = vmatpush.msra.mxu1 %v3878_v15  ;;  %730 = vmatpush.msrb.mxu2 %v3901_v23 }
  0x3f   :  { %754 = vmatpush.msrb.mxu3 %v3885_v18  ;;  %647 = vmatpush.msrb.mxu0 %v3880_v16 }
  0x40   :  { %689 = vmatpush.msra.mxu1 %v3898_v22  ;;  %731 = vmatpush.msrb.mxu2 %v3911_v26 }
  0x41   :  { %755 = vmatpush.msrb.mxu3 %v3889_v20  ;;  %648 = vmatpush.msrb.mxu0 %v3883_v17 }
  0x42   :  { %690 = vmatpush.msra.mxu1 %v3909_v25  ;;  %732 = vmatpush.msrb.mxu2 %v3916_v27 }
  0x43   :  { %756 = vmatpush.msrb.mxu3 %v3905_v24 }
  0xa0   :  { %v177_v29 = vpop.f32.mrf.mxu1 }
  0xa1   :  { %v178_v30 = vadd.f32 %v3261_v28, %v177_v29 }
  0xa2   :  { %v174_v31 = vpop.f32.mrf.mxu0 }
  0xa3   :  { %182 = vst.msk [vmem:[#allocation3 + $0x8] sm:$0xff] %vm180_vm2, %v178_v30  ;;  %v175_v32 = vadd.f32 %v3261_v28, %v174_v31 }
  0xa5   :  { %181 = vst.msk [vmem:[#allocation3] sm:$0xff] %vm180_vm2, %v175_v32 }
  0xa7   :  { %v274_v35 = vpop.f32.mrf.mxu3 }
  0xa8   :  { %v275_v36 = vadd.f32 %v3262_v33, %v274_v35  ;;  %v208_v37 = vpop.f32.mrf.mxu1 }
  0xa9   :  { %v209_v38 = vadd.f32 %v3263_v34, %v208_v37 }
  0xaa   :  { %280 = vst.msk [vmem:[#allocation6] sm:$0xff] %vm180_vm2, %v275_v36  ;;  %v326_v40 = vpop.f32.mrf.mxu0 }
  0xab   :  { %214 = vst.msk [vmem:[#allocation4] sm:$0xff] %vm180_vm2, %v209_v38 }
  0xac   :  { %v305_v41 = vld [vmem:[#allocation3] sm:$0x3]  ;;  %v241_v42 = vpop.f32.mrf.mxu2 }
  0xad   :  { %v329_v43 = vadd.f32 %v326_v40, %v305_v41  ;;  %v242_v44 = vadd.f32 %v3264_v39, %v241_v42 }
  0xaf   :  { %v3122_v45 = vmul.f32 -1.442695, %v329_v43  ;;  %v277_v46 = vpop.f32.mrf.mxu3  ;;  %247 = vst.msk [vmem:[#allocation5] sm:$0xff] %vm180_vm2, %v242_v44 }
  0xb0   :  { %v278_v47 = vadd.f32 %v3262_v33, %v277_v46  ;;  %v211_v48 = vpop.f32.mrf.mxu1 }
  0xb1   :  { %3270 = vpow2.f32 %v3122_v45  ;;  %v212_v49 = vadd.f32 %v3263_v34, %v211_v48  ;;  %v413_v51 = vld [vmem:[#allocation6] sm:$0x3]  ;;  %v454_v45 = vld [vmem:[#allocation8] sm:$0x3] }
  0xb2   :  { %281 = vst.msk [vmem:[#allocation6 + $0x8] sm:$0xff] %vm180_vm2, %v278_v47  ;;  %v349_v57 = vld [vmem:[#allocation4] sm:$0x3] }
  0xb3   :  { %215 = vst.msk [vmem:[#allocation4 + $0x8] sm:$0xff] %vm180_vm2, %v212_v49 }
  0xb4   :  { %v244_v50 = vpop.f32.mrf.mxu2 }
  0xb5   :  { %v245_v52 = vadd.f32 %v3264_v39, %v244_v50 }
  0xb6   :  { %v390_v6 = vld [vmem:[#allocation5] sm:$0x3] }
  0xb7   :  { %v3271_v53 = vpop.eup %3270  ;;  %v431_v54 = vpop.f32.mrf.mxu3  ;;  %248 = vst.msk [vmem:[#allocation5 + $0x8] sm:$0xff] %vm180_vm2, %v245_v52 }
  0xb8   :  { %v333_v55 = vadd.f32 1.0, %v3271_v53  ;;  %v434_v56 = vadd.f32 %v431_v54, %v413_v51  ;;  %v367_v58 = vpop.f32.mrf.mxu1 }
  0xb9   :  { %v370_v59 = vadd.f32 %v367_v58, %v349_v57 }
  0xba   :  { %3272 = vrcp.f32 %v333_v55  ;;  %v3127_v60 = vmul.f32 -1.442695, %v434_v56  ;;  %vm339_vm3 = vweird.f32 %v333_v55  ;;  %v343_v28 = vand.u32 2147483647, %v333_v55 }
  0xbb   :  { %v3124_v61 = vmul.f32 -1.442695, %v370_v59  ;;  %v345_v29 = vand.u32 2147483648, %v333_v55 }
  0xbc   :  { %3274 = vpow2.f32 %v3127_v60  ;;  %v408_v7 = vpop.f32.mrf.mxu2  ;;  %vm344_vm6 = vcmp.eq.f32.partialorder %v343_v28, 8.507059e+37 }
  0xbd   :  { %3276 = vpow2.f32 %v3124_v61  ;;  %v411_v9 = vadd.f32 %v408_v7, %v390_v6  ;;  %v346_v36 = vor.u32 1.1754944e-38, %v345_v29  ;;  %v465_v61 = vld [vmem:[#allocation3 + $0x2] sm:$0x3]  ;;  %v576_v6 = vld [vmem:[#allocation6 + $0x2] sm:$0x3] }
  0xc0   :  { %v3273_v62 = vpop.eup %3272 }
  0xc1   :  { %v335_v63 = vmul.f32 %v3273_v62, %v333_v55  ;;  %vm340_vm4 = vweird.f32 %v3273_v62 }
  0xc2   :  { %v3275_v1 = vpop.eup %3274  ;;  %vm3966_vm5 = vmor %vm339_vm3, %vm340_vm4 }
  0xc3   :  { %v3277_v2 = vpop.eup %3276  ;;  %v438_v3 = vadd.f32 1.0, %v3275_v1  ;;  %v336_v5 = vsub.f32 1.0, %v335_v63  ;;  %v510_v63 = vld [vmem:[#allocation4 + $0x2] sm:$0x3] }
  0xc4   :  { %v374_v4 = vadd.f32 1.0, %v3277_v2 }
  0xc5   :  { %3278 = vrcp.f32 %v438_v3  ;;  %v337_v8 = vmul.f32 %v3273_v62, %v336_v5  ;;  %vm444_vm11 = vweird.f32 %v438_v3  ;;  %v450_v53 = vand.u32 2147483648, %v438_v3 }
  0xc6   :  { %3280 = vrcp.f32 %v374_v4  ;;  %v386_v35 = vand.u32 2147483648, %v374_v4  ;;  %v384_v39 = vand.u32 2147483647, %v374_v4  ;;  %vm380_vm8 = vweird.f32 %v374_v4 }
  0xc7   :  { %v338_v31 = vadd.f32 %v3273_v62, %v337_v8  ;;  %3282 = vtanh.f32 %v411_v9  ;;  %v448_v54 = vand.u32 2147483647, %v438_v3  ;;  %v451_v56 = vor.u32 1.1754944e-38, %v450_v53 }
  0xc8   :  { %v387_v43 = vor.u32 1.1754944e-38, %v386_v35  ;;  %vm385_vm10 = vcmp.eq.f32.partialorder %v384_v39, 8.507059e+37 }
  0xc9   :  { %v342_v38 = vsel %vm3966_vm5, %v3273_v62, %v338_v31  ;;  %vm449_vm14 = vcmp.eq.f32.partialorder %v448_v54, 8.507059e+37 }
  0xca   :  { %v347_v44 = vsel %vm344_vm6, %v346_v36, %v342_v38 }
  0xcb   :  { %v3279_v12 = vpop.eup %3278 }
  0xcc   :  { %v3281_v19 = vpop.eup %3280  ;;  %v440_v32 = vmul.f32 %v3279_v12, %v438_v3  ;;  %vm445_vm12 = vweird.f32 %v3279_v12 }
  0xcd   :  { %v376_v30 = vmul.f32 %v3281_v19, %v374_v4  ;;  %vm381_vm7 = vweird.f32 %v3281_v19  ;;  %v3283_v42 = vpop.eup %3282  ;;  %vm446_vm13 = vmor %vm444_vm11, %vm445_vm12 }
  0xce   :  { %v441_v40 = vsub.f32 1.0, %v440_v32  ;;  %vm382_vm9 = vmor %vm380_vm8, %vm381_vm7  ;;  %v456_v50 = vmul.f32 %v3283_v42, %v347_v44  ;;  %v552_v32 = vld [vmem:[#allocation5 + $0x2] sm:$0x3] }
  0xcf   :  { %v377_v34 = vsub.f32 1.0, %v376_v30 }
  0xd0   :  { %v442_v47 = vmul.f32 %v3279_v12, %v441_v40 }
  0xd1   :  { %v378_v37 = vmul.f32 %v3281_v19, %v377_v34 }
  0xd2   :  { %v443_v52 = vadd.f32 %v3279_v12, %v442_v47 }
  0xd3   :  { %v379_v41 = vadd.f32 %v3281_v19, %v378_v37 }
  0xd4   :  { %v447_v55 = vsel %vm446_vm13, %v3279_v12, %v443_v52 }
  0xd5   :  { %v383_v46 = vsel %vm382_vm9, %v3281_v19, %v379_v41  ;;  %v452_v58 = vsel %vm449_vm14, %v451_v56, %v447_v55 }
  0xd6   :  { %v388_v48 = vsel %vm385_vm10, %v387_v43, %v383_v46 }
  0xd7   :  { %v455_v49 = vmul.f32 %v454_v45, %v388_v48 }
  0xd9   :  { %v457_v51 = vadd.f32 %v456_v50, %v455_v49 }
  0xdb   :  { %3284 = vtanh.f32 %v457_v51  ;;  %460 = vst.msk [vmem:[#allocation8] sm:$0x3] %vm301_vm0, %v457_v51 }
  0xe1   :  { %v3285_v57 = vpop.eup %3284 }
  0xe2   :  { %v459_v59 = vmul.f32 %v3285_v57, %v452_v58  ;;  %v617_v58 = vld [vmem:[#allocation8] sm:$0x3] }
  0xe4   :  { %461 = vst.msk [vmem:[#allocation7] sm:$0x3] %vm301_vm0, %v459_v59 }
  0xe5   :  { %462 = vst.msk [vmem:[#allocation2] sm:$0x3] %vm301_vm0, %v459_v59 }
  0xeb   :  { %v463_v60 = vld [vmem:[#allocation7] sm:$0x3] }
  0xec   :  { %3128 = vmatmul.msk.f32.vlgmr.msra.gmra.mxu0 %vm180_vm2, %v463_v60  ;;  %3130 = vmatmul.msk.f32.vlgmr.msrb.gmra.mxu1 %vm180_vm2, %v463_v60 }
  0xed   :  { %3132 = vmatmul.msk.f32.vlgmr.msra.gmra.mxu2 %vm180_vm2, %v463_v60  ;;  %3133 = vmatmul.msk.f32.vlgmr.msra.gmra.mxu3 %vm180_vm2, %v463_v60 }
  0xee   :  { %809 = vmatpush.msra.mxu0 %v3867_v10  ;;  %851 = vmatpush.msrb.mxu1 %v3870_v11 }
  0xef   :  { %893 = vmatpush.msra.mxu2 %v3891_v21  ;;  %917 = vmatpush.msra.mxu3 %v3875_v14 }
  0xf0   :  { %810 = vmatpush.msra.mxu0 %v3873_v13  ;;  %852 = vmatpush.msrb.mxu1 %v3878_v15 }
  0xf1   :  { %894 = vmatpush.msra.mxu2 %v3901_v23  ;;  %918 = vmatpush.msra.mxu3 %v3885_v18 }
  0xf2   :  { %811 = vmatpush.msra.mxu0 %v3880_v16  ;;  %853 = vmatpush.msrb.mxu1 %v3898_v22 }
  0xf3   :  { %895 = vmatpush.msra.mxu2 %v3911_v26  ;;  %919 = vmatpush.msra.mxu3 %v3889_v20 }
  0xf4   :  { %812 = vmatpush.msra.mxu0 %v3883_v17  ;;  %854 = vmatpush.msrb.mxu1 %v3909_v25 }
  0xf5   :  { %896 = vmatpush.msra.mxu2 %v3916_v27  ;;  %920 = vmatpush.msra.mxu3 %v3905_v24 }
 0x169   :  { %v486_v62 = vpop.f32.mrf.mxu0  ;;  %v528_v1 = vpop.f32.mrf.mxu1 }
 0x16a   :  { %v489_v2 = vadd.f32 %v486_v62, %v465_v61  ;;  %v531_v3 = vadd.f32 %v528_v1, %v510_v63 }
 0x16c   :  { %v3129_v4 = vmul.f32 -1.442695, %v489_v2  ;;  %v3131_v5 = vmul.f32 -1.442695, %v531_v3 }
 0x16e   :  { %3286 = vpow2.f32 %v3129_v4 }
 0x16f   :  { %3288 = vpow2.f32 %v3131_v5 }
 0x170   :  { %v594_v7 = vpop.f32.mrf.mxu3  ;;  %v570_v30 = vpop.f32.mrf.mxu2 }
 0x171   :  { %v597_v8 = vadd.f32 %v594_v7, %v576_v6  ;;  %v573_v35 = vadd.f32 %v570_v30, %v552_v32 }
 0x173   :  { %v3134_v9 = vmul.f32 -1.442695, %v597_v8 }
 0x174   :  { %v3287_v12 = vpop.eup %3286 }
 0x175   :  { %v3289_v19 = vpop.eup %3288  ;;  %v493_v28 = vadd.f32 1.0, %v3287_v12  ;;  %3290 = vpow2.f32 %v3134_v9  ;;  %v629_v12 = vld [vmem:[#allocation3 + $0x4] sm:$0x3] }
 0x176   :  { %v535_v29 = vadd.f32 1.0, %v3289_v19 }
 0x177   :  { %3292 = vrcp.f32 %v493_v28  ;;  %v505_v41 = vand.u32 2147483648, %v493_v28  ;;  %v503_v44 = vand.u32 2147483647, %v493_v28  ;;  %vm499_vm3 = vweird.f32 %v493_v28 }
 0x178   :  { %3294 = vrcp.f32 %v535_v29  ;;  %v547_v42 = vand.u32 2147483648, %v535_v29  ;;  %v545_v46 = vand.u32 2147483647, %v535_v29  ;;  %vm541_vm4 = vweird.f32 %v535_v29 }
 0x179   :  { %v506_v49 = vor.u32 1.1754944e-38, %v505_v41  ;;  %vm504_vm7 = vcmp.eq.f32.partialorder %v503_v44, 8.507059e+37  ;;  %v716_v44 = vld [vmem:[#allocation5 + $0x4] sm:$0x3] }
 0x17a   :  { %v548_v52 = vor.u32 1.1754944e-38, %v547_v42  ;;  %vm546_vm8 = vcmp.eq.f32.partialorder %v545_v46, 8.507059e+37 }
 0x17b   :  { %v3291_v31 = vpop.eup %3290 }
 0x17c   :  { %v601_v33 = vadd.f32 1.0, %v3291_v31 }
 0x17d   :  { %v3293_v34 = vpop.eup %3292 }
 0x17e   :  { %v3295_v36 = vpop.eup %3294  ;;  %v495_v37 = vmul.f32 %v3293_v34, %v493_v28  ;;  %3296 = vrcp.f32 %v601_v33  ;;  %vm500_vm15 = vweird.f32 %v3293_v34  ;;  %v613_v2 = vand.u32 2147483648, %v601_v33  ;;  %v674_v28 = vld [vmem:[#allocation4 + $0x4] sm:$0x3] }
 0x17f   :  { %v537_v38 = vmul.f32 %v3295_v36, %v535_v29  ;;  %3298 = vtanh.f32 %v573_v35  ;;  %vm542_vm1 = vweird.f32 %v3295_v36  ;;  %vm501_vm5 = vmor %vm499_vm3, %vm500_vm15  ;;  %vm607_vm10 = vweird.f32 %v601_v33 }
 0x180   :  { %v496_v39 = vsub.f32 1.0, %v495_v37  ;;  %vm543_vm6 = vmor %vm541_vm4, %vm542_vm1  ;;  %v611_v3 = vand.u32 2147483647, %v601_v33  ;;  %v614_v5 = vor.u32 1.1754944e-38, %v613_v2 }
 0x181   :  { %v538_v40 = vsub.f32 1.0, %v537_v38 }
 0x182   :  { %v497_v43 = vmul.f32 %v3293_v34, %v496_v39  ;;  %vm612_vm12 = vcmp.eq.f32.partialorder %v611_v3, 8.507059e+37 }
 0x183   :  { %v539_v45 = vmul.f32 %v3295_v36, %v538_v40 }
 0x184   :  { %v3297_v47 = vpop.eup %3296  ;;  %v498_v48 = vadd.f32 %v3293_v34, %v497_v43 }
 0x185   :  { %v540_v50 = vadd.f32 %v3295_v36, %v539_v45  ;;  %v603_v51 = vmul.f32 %v3297_v47, %v601_v33  ;;  %v3299_v54 = vpop.eup %3298  ;;  %vm608_vm9 = vweird.f32 %v3297_v47 }
 0x186   :  { %v502_v53 = vsel %vm501_vm5, %v3293_v34, %v498_v48  ;;  %vm609_vm11 = vmor %vm607_vm10, %vm608_vm9  ;;  %v740_v34 = vld [vmem:[#allocation6 + $0x4] sm:$0x3] }
 0x187   :  { %v507_v55 = vsel %vm504_vm7, %v506_v49, %v502_v53  ;;  %v544_v56 = vsel %vm543_vm6, %v3295_v36, %v540_v50  ;;  %v604_v57 = vsub.f32 1.0, %v603_v51 }
 0x188   :  { %v549_v59 = vsel %vm546_vm8, %v548_v52, %v544_v56  ;;  %v619_v60 = vmul.f32 %v3299_v54, %v507_v55 }
 0x189   :  { %v618_v61 = vmul.f32 %v617_v58, %v549_v59  ;;  %v605_v62 = vmul.f32 %v3297_v47, %v604_v57 }
 0x18b   :  { %v620_v63 = vadd.f32 %v619_v60, %v618_v61  ;;  %v606_v1 = vadd.f32 %v3297_v47, %v605_v62 }
 0x18d   :  { %3300 = vtanh.f32 %v620_v63  ;;  %623 = vst.msk [vmem:[#allocation8] sm:$0x3] %vm301_vm0, %v620_v63  ;;  %v610_v4 = vsel %vm609_vm11, %v3297_v47, %v606_v1 }
 0x18e   :  { %v615_v7 = vsel %vm612_vm12, %v614_v5, %v610_v4 }
 0x193   :  { %v3301_v6 = vpop.eup %3300 }
 0x194   :  { %v622_v8 = vmul.f32 %v3301_v6, %v615_v7  ;;  %v781_v7 = vld [vmem:[#allocation8] sm:$0x3] }
 0x196   :  { %624 = vst.msk [vmem:[#allocation7] sm:$0x3] %vm301_vm0, %v622_v8 }
 0x197   :  { %626 = vst.msk [vmem:[#allocation2 + $0x2] sm:$0x3] %vm301_vm0, %v622_v8 }
 0x19d   :  { %v627_v9 = vld [vmem:[#allocation7] sm:$0x3] }
 0x19e   :  { %3135 = vmatmul.msk.f32.vlgmr.msrb.gmra.mxu0 %vm180_vm2, %v627_v9  ;;  %3137 = vmatmul.msk.f32.vlgmr.msra.gmra.mxu1 %vm180_vm2, %v627_v9 }
 0x19f   :  { %3139 = vmatmul.msk.f32.vlgmr.msrb.gmra.mxu2 %vm180_vm2, %v627_v9  ;;  %3140 = vmatmul.msk.f32.vlgmr.msrb.gmra.mxu3 %vm180_vm2, %v627_v9 }
 0x1a0   :  { %973 = vmatpush.msrb.mxu0 %v3867_v10  ;;  %1015 = vmatpush.msra.mxu1 %v3870_v11 }
 0x1a1   :  { %1057 = vmatpush.msrb.mxu2 %v3891_v21  ;;  %1081 = vmatpush.msrb.mxu3 %v3875_v14 }
 0x1a2   :  { %974 = vmatpush.msrb.mxu0 %v3873_v13  ;;  %1016 = vmatpush.msra.mxu1 %v3878_v15 }
 0x1a3   :  { %1058 = vmatpush.msrb.mxu2 %v3901_v23  ;;  %1082 = vmatpush.msrb.mxu3 %v3885_v18 }
 0x1a4   :  { %975 = vmatpush.msrb.mxu0 %v3880_v16  ;;  %1017 = vmatpush.msra.mxu1 %v3898_v22 }
 0x1a5   :  { %1059 = vmatpush.msrb.mxu2 %v3911_v26  ;;  %1083 = vmatpush.msrb.mxu3 %v3889_v20 }
 0x1a6   :  { %976 = vmatpush.msrb.mxu0 %v3883_v17  ;;  %1018 = vmatpush.msra.mxu1 %v3909_v25 }
 0x1a7   :  { %1060 = vmatpush.msrb.mxu2 %v3916_v27  ;;  %1084 = vmatpush.msrb.mxu3 %v3905_v24 }
 0x21b   :  { %v650_v19 = vpop.f32.mrf.mxu0  ;;  %v692_v29 = vpop.f32.mrf.mxu1 }
 0x21c   :  { %v653_v30 = vadd.f32 %v650_v19, %v629_v12  ;;  %v695_v31 = vadd.f32 %v692_v29, %v674_v28 }
 0x21e   :  { %v3136_v32 = vmul.f32 -1.442695, %v653_v30  ;;  %v3138_v33 = vmul.f32 -1.442695, %v695_v31 }
 0x220   :  { %3302 = vpow2.f32 %v3136_v32 }
 0x221   :  { %3304 = vpow2.f32 %v3138_v33 }
 0x222   :  { %v758_v35 = vpop.f32.mrf.mxu3  ;;  %v734_v42 = vpop.f32.mrf.mxu2 }
 0x223   :  { %v761_v36 = vadd.f32 %v758_v35, %v740_v34  ;;  %v737_v47 = vadd.f32 %v734_v42, %v716_v44 }
 0x225   :  { %v3141_v37 = vmul.f32 -1.442695, %v761_v36 }
 0x226   :  { %v3303_v38 = vpop.eup %3302 }
 0x227   :  { %v3305_v39 = vpop.eup %3304  ;;  %v657_v40 = vadd.f32 1.0, %v3303_v38  ;;  %3306 = vpow2.f32 %v3141_v37  ;;  %v793_v38 = vld [vmem:[#allocation3 + $0x6] sm:$0x3] }
 0x228   :  { %v699_v41 = vadd.f32 1.0, %v3305_v39 }
 0x229   :  { %3308 = vrcp.f32 %v657_v40  ;;  %v669_v53 = vand.u32 2147483648, %v657_v40  ;;  %v667_v56 = vand.u32 2147483647, %v657_v40  ;;  %vm663_vm15 = vweird.f32 %v657_v40 }
 0x22a   :  { %3310 = vrcp.f32 %v699_v41  ;;  %v711_v54 = vand.u32 2147483648, %v699_v41  ;;  %v709_v58 = vand.u32 2147483647, %v699_v41  ;;  %vm705_vm1 = vweird.f32 %v699_v41 }
 0x22b   :  { %v670_v61 = vor.u32 1.1754944e-38, %v669_v53  ;;  %vm668_vm5 = vcmp.eq.f32.partialorder %v667_v56, 8.507059e+37  ;;  %v880_v56 = vld [vmem:[#allocation5 + $0x6] sm:$0x3] }
 0x22c   :  { %v712_v1 = vor.u32 1.1754944e-38, %v711_v54  ;;  %vm710_vm6 = vcmp.eq.f32.partialorder %v709_v58, 8.507059e+37 }
 0x22d   :  { %v3307_v43 = vpop.eup %3306 }
 0x22e   :  { %v765_v45 = vadd.f32 1.0, %v3307_v43 }
 0x22f   :  { %v3309_v46 = vpop.eup %3308 }
 0x230   :  { %v3311_v48 = vpop.eup %3310  ;;  %v659_v49 = vmul.f32 %v3309_v46, %v657_v40  ;;  %3312 = vrcp.f32 %v765_v45  ;;  %vm664_vm13 = vweird.f32 %v3309_v46  ;;  %v777_v30 = vand.u32 2147483648, %v765_v45  ;;  %v838_v40 = vld [vmem:[#allocation4 + $0x6] sm:$0x3] }
 0x231   :  { %v701_v50 = vmul.f32 %v3311_v48, %v699_v41  ;;  %3314 = vtanh.f32 %v737_v47  ;;  %vm706_vm14 = vweird.f32 %v3311_v48  ;;  %vm665_vm3 = vmor %vm663_vm15, %vm664_vm13  ;;  %vm771_vm8 = vweird.f32 %v765_v45 }
 0x232   :  { %v660_v51 = vsub.f32 1.0, %v659_v49  ;;  %vm707_vm4 = vmor %vm705_vm1, %vm706_vm14  ;;  %v775_v31 = vand.u32 2147483647, %v765_v45  ;;  %v778_v33 = vor.u32 1.1754944e-38, %v777_v30 }
 0x233   :  { %v702_v52 = vsub.f32 1.0, %v701_v50 }
 0x234   :  { %v661_v55 = vmul.f32 %v3309_v46, %v660_v51  ;;  %vm776_vm10 = vcmp.eq.f32.partialorder %v775_v31, 8.507059e+37 }
 0x235   :  { %v703_v57 = vmul.f32 %v3311_v48, %v702_v52 }
 0x236   :  { %v3313_v59 = vpop.eup %3312  ;;  %v662_v60 = vadd.f32 %v3309_v46, %v661_v55 }
 0x237   :  { %v704_v62 = vadd.f32 %v3311_v48, %v703_v57  ;;  %v767_v63 = vmul.f32 %v3313_v59, %v765_v45  ;;  %v3315_v3 = vpop.eup %3314  ;;  %vm772_vm7 = vweird.f32 %v3313_v59 }
 0x238   :  { %v666_v2 = vsel %vm665_vm3, %v3309_v46, %v662_v60  ;;  %vm773_vm9 = vmor %vm771_vm8, %vm772_vm7  ;;  %v904_v46 = vld [vmem:[#allocation6 + $0x6] sm:$0x3] }
 0x239   :  { %v671_v4 = vsel %vm668_vm5, %v670_v61, %v666_v2  ;;  %v708_v5 = vsel %vm707_vm4, %v3311_v48, %v704_v62  ;;  %v768_v6 = vsub.f32 1.0, %v767_v63 }
 0x23a   :  { %v713_v8 = vsel %vm710_vm6, %v712_v1, %v708_v5  ;;  %v783_v9 = vmul.f32 %v3315_v3, %v671_v4 }
 0x23b   :  { %v782_v12 = vmul.f32 %v781_v7, %v713_v8  ;;  %v769_v19 = vmul.f32 %v3313_v59, %v768_v6 }
 0x23d   :  { %v784_v28 = vadd.f32 %v783_v9, %v782_v12  ;;  %v770_v29 = vadd.f32 %v3313_v59, %v769_v19 }
 0x23f   :  { %3316 = vtanh.f32 %v784_v28  ;;  %787 = vst.msk [vmem:[#allocation8] sm:$0x3] %vm301_vm0, %v784_v28  ;;  %v774_v32 = vsel %vm773_vm9, %v3313_v59, %v770_v29 }
 0x240   :  { %v779_v35 = vsel %vm776_vm10, %v778_v33, %v774_v32 }
 0x245   :  { %v3317_v34 = vpop.eup %3316 }
 0x246   :  { %v786_v36 = vmul.f32 %v3317_v34, %v779_v35  ;;  %v945_v35 = vld [vmem:[#allocation8] sm:$0x3] }
 0x248   :  { %788 = vst.msk [vmem:[#allocation7] sm:$0x3] %vm301_vm0, %v786_v36 }
 0x249   :  { %790 = vst.msk [vmem:[#allocation2 + $0x4] sm:$0x3] %vm301_vm0, %v786_v36 }
 0x24f   :  { %v791_v37 = vld [vmem:[#allocation7] sm:$0x3] }
 0x250   :  { %3142 = vmatmul.msk.f32.vlgmr.msra.gmra.mxu0 %vm180_vm2, %v791_v37  ;;  %3144 = vmatmul.msk.f32.vlgmr.msrb.gmra.mxu1 %vm180_vm2, %v791_v37 }
 0x251   :  { %3146 = vmatmul.msk.f32.vlgmr.msra.gmra.mxu2 %vm180_vm2, %v791_v37  ;;  %3147 = vmatmul.msk.f32.vlgmr.msra.gmra.mxu3 %vm180_vm2, %v791_v37 }
 0x252   :  { %1137 = vmatpush.msra.mxu0 %v3867_v10  ;;  %1179 = vmatpush.msrb.mxu1 %v3870_v11 }
 0x253   :  { %1221 = vmatpush.msra.mxu2 %v3891_v21  ;;  %1245 = vmatpush.msra.mxu3 %v3875_v14 }
 0x254   :  { %1138 = vmatpush.msra.mxu0 %v3873_v13  ;;  %1180 = vmatpush.msrb.mxu1 %v3878_v15 }
 0x255   :  { %1222 = vmatpush.msra.mxu2 %v3901_v23  ;;  %1246 = vmatpush.msra.mxu3 %v3885_v18 }
 0x256   :  { %1139 = vmatpush.msra.mxu0 %v3880_v16  ;;  %1181 = vmatpush.msrb.mxu1 %v3898_v22 }
 0x257   :  { %1223 = vmatpush.msra.mxu2 %v3911_v26  ;;  %1247 = vmatpush.msra.mxu3 %v3889_v20 }
 0x258   :  { %1140 = vmatpush.msra.mxu0 %v3883_v17  ;;  %1182 = vmatpush.msrb.mxu1 %v3909_v25 }
 0x259   :  { %1224 = vmatpush.msra.mxu2 %v3916_v27  ;;  %1248 = vmatpush.msra.mxu3 %v3905_v24 }
 0x2cd   :  { %v814_v39 = vpop.f32.mrf.mxu0  ;;  %v856_v41 = vpop.f32.mrf.mxu1 }
 0x2ce   :  { %v817_v42 = vadd.f32 %v814_v39, %v793_v38  ;;  %v859_v43 = vadd.f32 %v856_v41, %v838_v40 }
 0x2d0   :  { %v3143_v44 = vmul.f32 -1.442695, %v817_v42  ;;  %v3145_v45 = vmul.f32 -1.442695, %v859_v43 }
 0x2d2   :  { %3318 = vpow2.f32 %v3143_v44 }
 0x2d3   :  { %3320 = vpow2.f32 %v3145_v45 }
 0x2d4   :  { %v922_v47 = vpop.f32.mrf.mxu3  ;;  %v898_v54 = vpop.f32.mrf.mxu2 }
 0x2d5   :  { %v925_v48 = vadd.f32 %v922_v47, %v904_v46  ;;  %v901_v59 = vadd.f32 %v898_v54, %v880_v56 }
 0x2d7   :  { %v3148_v49 = vmul.f32 -1.442695, %v925_v48 }
 0x2d8   :  { %v3319_v50 = vpop.eup %3318 }
 0x2d9   :  { %v3321_v51 = vpop.eup %3320  ;;  %v821_v52 = vadd.f32 1.0, %v3319_v50  ;;  %3322 = vpow2.f32 %v3148_v49 }
 0x2da   :  { %v863_v53 = vadd.f32 1.0, %v3321_v51 }
 0x2db   :  { %3324 = vrcp.f32 %v821_v52  ;;  %v833_v2 = vand.u32 2147483648, %v821_v52  ;;  %v831_v5 = vand.u32 2147483647, %v821_v52  ;;  %vm827_vm13 = vweird.f32 %v821_v52 }
 0x2dc   :  { %3326 = vrcp.f32 %v863_v53  ;;  %v875_v3 = vand.u32 2147483648, %v863_v53  ;;  %v873_v7 = vand.u32 2147483647, %v863_v53  ;;  %vm869_vm14 = vweird.f32 %v863_v53 }
 0x2dd   :  { %v834_v12 = vor.u32 1.1754944e-38, %v833_v2  ;;  %vm832_vm3 = vcmp.eq.f32.partialorder %v831_v5, 8.507059e+37 }
 0x2de   :  { %v876_v29 = vor.u32 1.1754944e-38, %v875_v3  ;;  %vm874_vm4 = vcmp.eq.f32.partialorder %v873_v7, 8.507059e+37 }
 0x2df   :  { %v3323_v55 = vpop.eup %3322 }
 0x2e0   :  { %v929_v57 = vadd.f32 1.0, %v3323_v55 }
 0x2e1   :  { %v3325_v58 = vpop.eup %3324 }
 0x2e2   :  { %v3327_v60 = vpop.eup %3326  ;;  %v823_v61 = vmul.f32 %v3325_v58, %v821_v52  ;;  %3328 = vrcp.f32 %v929_v57  ;;  %vm828_vm11 = vweird.f32 %v3325_v58  ;;  %v941_v42 = vand.u32 2147483648, %v929_v57  ;;  %v1044_v52 = vld [vmem:[#allocation5 + $0x8] sm:$0x3] }
 0x2e3   :  { %v865_v62 = vmul.f32 %v3327_v60, %v863_v53  ;;  %3330 = vtanh.f32 %v901_v59  ;;  %vm870_vm12 = vweird.f32 %v3327_v60  ;;  %vm829_vm15 = vmor %vm827_vm13, %vm828_vm11  ;;  %vm935_vm6 = vweird.f32 %v929_v57 }
 0x2e4   :  { %v824_v63 = vsub.f32 1.0, %v823_v61  ;;  %vm871_vm1 = vmor %vm869_vm14, %vm870_vm12  ;;  %v939_v43 = vand.u32 2147483647, %v929_v57  ;;  %v942_v45 = vor.u32 1.1754944e-38, %v941_v42 }
 0x2e5   :  { %v866_v1 = vsub.f32 1.0, %v865_v62 }
 0x2e6   :  { %v825_v4 = vmul.f32 %v3325_v58, %v824_v63  ;;  %vm940_vm8 = vcmp.eq.f32.partialorder %v939_v43, 8.507059e+37 }
 0x2e7   :  { %v867_v6 = vmul.f32 %v3327_v60, %v866_v1 }
 0x2e8   :  { %v3329_v8 = vpop.eup %3328  ;;  %v826_v9 = vadd.f32 %v3325_v58, %v825_v4 }
 0x2e9   :  { %v868_v19 = vadd.f32 %v3327_v60, %v867_v6  ;;  %v931_v28 = vmul.f32 %v3329_v8, %v929_v57  ;;  %v3331_v31 = vpop.eup %3330  ;;  %vm936_vm5 = vweird.f32 %v3329_v8 }
 0x2ea   :  { %v830_v30 = vsel %vm829_vm15, %v3325_v58, %v826_v9  ;;  %vm937_vm7 = vmor %vm935_vm6, %vm936_vm5 }
 0x2eb   :  { %v835_v32 = vsel %vm832_vm3, %v834_v12, %v830_v30  ;;  %v872_v33 = vsel %vm871_vm1, %v3327_v60, %v868_v19  ;;  %v932_v34 = vsub.f32 1.0, %v931_v28 }
 0x2ec   :  { %v877_v36 = vsel %vm874_vm4, %v876_v29, %v872_v33  ;;  %v947_v37 = vmul.f32 %v3331_v31, %v835_v32 }
 0x2ed   :  { %v946_v38 = vmul.f32 %v945_v35, %v877_v36  ;;  %v933_v39 = vmul.f32 %v3329_v8, %v932_v34 }
 0x2ef   :  { %v948_v40 = vadd.f32 %v947_v37, %v946_v38  ;;  %v934_v41 = vadd.f32 %v3329_v8, %v933_v39 }
 0x2f1   :  { %3332 = vtanh.f32 %v948_v40  ;;  %951 = vst.msk [vmem:[#allocation8] sm:$0x3] %vm301_vm0, %v948_v40  ;;  %v938_v44 = vsel %vm937_vm7, %v3329_v8, %v934_v41 }
 0x2f2   :  { %v943_v47 = vsel %vm940_vm8, %v942_v45, %v938_v44 }
 0x2f7   :  { %v3333_v46 = vpop.eup %3332 }
 0x2f8   :  { %v950_v48 = vmul.f32 %v3333_v46, %v943_v47  ;;  %v1109_v32 = vld [vmem:[#allocation8] sm:$0x3]  ;;  %v3526_v46 = vld [vmem:[#allocation14 + $0x18] sm:$0xff] }
 0x2f9   :  { %v3527_v47 = vld [vmem:[#allocation14 + $0x38] sm:$0xff] }
 0x2fa   :  { %952 = vst.msk [vmem:[#allocation7] sm:$0x3] %vm301_vm0, %v950_v48 }
 0x2fb   :  { %954 = vst.msk [vmem:[#allocation2 + $0x6] sm:$0x3] %vm301_vm0, %v950_v48  ;;  %v3528_v48 = vld [vmem:[#allocation14 + $0x58] sm:$0xff] }
 0x301   :  { %v955_v49 = vld [vmem:[#allocation7] sm:$0x3] }
 0x302   :  { %3149 = vmatmul.msk.f32.vlgmr.msrb.gmra.mxu0 %vm180_vm2, %v955_v49  ;;  %3151 = vmatmul.msk.f32.vlgmr.msra.gmra.mxu1 %vm180_vm2, %v955_v49 }
 0x303   :  { %3153 = vmatmul.msk.f32.vlgmr.msrb.gmra.mxu2 %vm180_vm2, %v955_v49  ;;  %3154 = vmatmul.msk.f32.vlgmr.msrb.gmra.mxu3 %vm180_vm2, %v955_v49  ;;  %v3529_v49 = vld [vmem:[#allocation14 + $0x78] sm:$0xff] }
 0x304   :  { %1301 = vmatpush.msrb.mxu0 %v3867_v10  ;;  %1343 = vmatpush.msra.mxu1 %v3870_v11  ;;  %v957_v10 = vld [vmem:[#allocation3 + $0x8] sm:$0x3] }
 0x305   :  { %1385 = vmatpush.msrb.mxu2 %v3891_v21  ;;  %1409 = vmatpush.msrb.mxu3 %v3875_v14 }
 0x306   :  { %1302 = vmatpush.msrb.mxu0 %v3873_v13  ;;  %1344 = vmatpush.msra.mxu1 %v3878_v15  ;;  %v1002_v13 = vld [vmem:[#allocation4 + $0x8] sm:$0x3] }
 0x307   :  { %1386 = vmatpush.msrb.mxu2 %v3901_v23  ;;  %1410 = vmatpush.msrb.mxu3 %v3885_v18 }
 0x308   :  { %1303 = vmatpush.msrb.mxu0 %v3880_v16  ;;  %1345 = vmatpush.msra.mxu1 %v3898_v22  ;;  %v1068_v22 = vld [vmem:[#allocation6 + $0x8] sm:$0x3] }
 0x309   :  { %1387 = vmatpush.msrb.mxu2 %v3911_v26  ;;  %1411 = vmatpush.msrb.mxu3 %v3889_v20 }
 0x30a   :  { %1304 = vmatpush.msrb.mxu0 %v3883_v17  ;;  %1346 = vmatpush.msra.mxu1 %v3909_v25 }
 0x30b   :  { %1388 = vmatpush.msrb.mxu2 %v3916_v27  ;;  %1412 = vmatpush.msrb.mxu3 %v3905_v24 }
 0x37f   :  { %v978_v11 = vpop.f32.mrf.mxu0  ;;  %v1020_v14 = vpop.f32.mrf.mxu1 }
 0x380   :  { %v981_v15 = vadd.f32 %v978_v11, %v957_v10  ;;  %v1023_v16 = vadd.f32 %v1020_v14, %v1002_v13  ;;  %v3530_v10 = vld [vmem:[#allocation14 + $0x10] sm:$0xff] }
 0x381   :  { %v3531_v11 = vld [vmem:[#allocation14 + $0x30] sm:$0xff] }
 0x382   :  { %v3150_v18 = vmul.f32 -1.442695, %v981_v15  ;;  %v3152_v21 = vmul.f32 -1.442695, %v1023_v16  ;;  %v3532_v13 = vld [vmem:[#allocation14 + $0x50] sm:$0xff]  ;;  %v3534_v15 = vld [vmem:[#allocation14 + $0x8] sm:$0xff] }
 0x383   :  { %v3533_v14 = vld [vmem:[#allocation14 + $0x70] sm:$0xff]  ;;  %v3535_v16 = vld [vmem:[#allocation14 + $0x28] sm:$0xff] }
 0x384   :  { %3334 = vpow2.f32 %v3150_v18  ;;  %v3536_v18 = vld [vmem:[#allocation14 + $0x48] sm:$0xff] }
 0x385   :  { %3336 = vpow2.f32 %v3152_v21  ;;  %v3537_v21 = vld [vmem:[#allocation14 + $0x68] sm:$0xff] }
 0x386   :  { %v1086_v20 = vpop.f32.mrf.mxu3  ;;  %v1062_v24 = vpop.f32.mrf.mxu2 }
 0x387   :  { %v1089_v23 = vadd.f32 %v1086_v20, %v1068_v22  ;;  %v1065_v55 = vadd.f32 %v1062_v24, %v1044_v52  ;;  %v3538_v22 = vld [vmem:[#allocation14] sm:$0xff] }
 0x388   :  { %v3539_v20 = vld [vmem:[#allocation14 + $0x20] sm:$0xff] }
 0x389   :  { %v3155_v17 = vmul.f32 -1.442695, %v1089_v23  ;;  %v3540_v23 = vld [vmem:[#allocation14 + $0x40] sm:$0xff] }
 0x38a   :  { %v3335_v26 = vpop.eup %3334 }
 0x38b   :  { %v3337_v25 = vpop.eup %3336  ;;  %v985_v50 = vadd.f32 1.0, %v3335_v26  ;;  %3338 = vpow2.f32 %v3155_v17  ;;  %v3541_v17 = vld [vmem:[#allocation14 + $0x60] sm:$0xff]  ;;  %v1121_v26 = vld [vmem:[#allocation3 + $0xa] sm:$0x3] }
 0x38c   :  { %v1027_v27 = vadd.f32 1.0, %v3337_v25 }
 0x38d   :  { %3340 = vrcp.f32 %v985_v50  ;;  %v997_v61 = vand.u32 2147483648, %v985_v50  ;;  %v995_v1 = vand.u32 2147483647, %v985_v50  ;;  %vm991_vm11 = vweird.f32 %v985_v50 }
 0x38e   :  { %3342 = vrcp.f32 %v1027_v27  ;;  %v1039_v62 = vand.u32 2147483648, %v1027_v27  ;;  %v1037_v3 = vand.u32 2147483647, %v1027_v27  ;;  %vm1033_vm12 = vweird.f32 %v1027_v27 }
 0x38f   :  { %v998_v6 = vor.u32 1.1754944e-38, %v997_v61  ;;  %vm996_vm15 = vcmp.eq.f32.partialorder %v995_v1, 8.507059e+37  ;;  %v1208_v1 = vld [vmem:[#allocation5 + $0xa] sm:$0x3] }
 0x390   :  { %v1040_v9 = vor.u32 1.1754944e-38, %v1039_v62  ;;  %vm1038_vm1 = vcmp.eq.f32.partialorder %v1037_v3, 8.507059e+37 }
 0x391   :  { %v3339_v51 = vpop.eup %3338 }
 0x392   :  { %v1093_v53 = vadd.f32 1.0, %v3339_v51 }
 0x393   :  { %v3341_v54 = vpop.eup %3340 }
 0x394   :  { %v3343_v56 = vpop.eup %3342  ;;  %v987_v57 = vmul.f32 %v3341_v54, %v985_v50  ;;  %3344 = vrcp.f32 %v1093_v53  ;;  %vm992_vm9 = vweird.f32 %v3341_v54  ;;  %v1105_v38 = vand.u32 2147483648, %v1093_v53  ;;  %v1166_v50 = vld [vmem:[#allocation4 + $0xa] sm:$0x3] }
 0x395   :  { %v1029_v58 = vmul.f32 %v3343_v56, %v1027_v27  ;;  %3346 = vtanh.f32 %v1065_v55  ;;  %vm1034_vm10 = vweird.f32 %v3343_v56  ;;  %vm993_vm13 = vmor %vm991_vm11, %vm992_vm9  ;;  %vm1099_vm4 = vweird.f32 %v1093_v53 }
 0x396   :  { %v988_v59 = vsub.f32 1.0, %v987_v57  ;;  %vm1035_vm14 = vmor %vm1033_vm12, %vm1034_vm10  ;;  %v1103_v39 = vand.u32 2147483647, %v1093_v53  ;;  %v1106_v41 = vor.u32 1.1754944e-38, %v1105_v38 }
 0x397   :  { %v1030_v60 = vsub.f32 1.0, %v1029_v58 }
 0x398   :  { %v989_v63 = vmul.f32 %v3341_v54, %v988_v59  ;;  %vm1104_vm6 = vcmp.eq.f32.partialorder %v1103_v39, 8.507059e+37 }
 0x399   :  { %v1031_v2 = vmul.f32 %v3343_v56, %v1030_v60 }
 0x39a   :  { %v3345_v4 = vpop.eup %3344  ;;  %v990_v5 = vadd.f32 %v3341_v54, %v989_v63 }
 0x39b   :  { %v1032_v7 = vadd.f32 %v3343_v56, %v1031_v2  ;;  %v1095_v8 = vmul.f32 %v3345_v4, %v1093_v53  ;;  %v3347_v19 = vpop.eup %3346  ;;  %vm1100_vm3 = vweird.f32 %v3345_v4 }
 0x39c   :  { %v994_v12 = vsel %vm993_vm13, %v3341_v54, %v990_v5  ;;  %vm1101_vm5 = vmor %vm1099_vm4, %vm1100_vm3  ;;  %v1232_v54 = vld [vmem:[#allocation6 + $0xa] sm:$0x3] }
 0x39d   :  { %v999_v28 = vsel %vm996_vm15, %v998_v6, %v994_v12  ;;  %v1036_v29 = vsel %vm1035_vm14, %v3343_v56, %v1032_v7  ;;  %v1096_v30 = vsub.f32 1.0, %v1095_v8 }
 0x39e   :  { %v1041_v31 = vsel %vm1038_vm1, %v1040_v9, %v1036_v29  ;;  %v1111_v33 = vmul.f32 %v3347_v19, %v999_v28 }
 0x39f   :  { %v1110_v34 = vmul.f32 %v1109_v32, %v1041_v31  ;;  %v1097_v35 = vmul.f32 %v3345_v4, %v1096_v30 }
 0x3a1   :  { %v1112_v36 = vadd.f32 %v1111_v33, %v1110_v34  ;;  %v1098_v37 = vadd.f32 %v3345_v4, %v1097_v35 }
 0x3a3   :  { %3348 = vtanh.f32 %v1112_v36  ;;  %1115 = vst.msk [vmem:[#allocation8] sm:$0x3] %vm301_vm0, %v1112_v36  ;;  %v1102_v40 = vsel %vm1101_vm5, %v3345_v4, %v1098_v37 }
 0x3a4   :  { %v1107_v43 = vsel %vm1104_vm6, %v1106_v41, %v1102_v40 }
 0x3a9   :  { %v3349_v42 = vpop.eup %3348 }
 0x3aa   :  { %v1114_v44 = vmul.f32 %v3349_v42, %v1107_v43 }
 0x3ac   :  { %1116 = vst.msk [vmem:[#allocation7] sm:$0x3] %vm301_vm0, %v1114_v44 }
 0x3ad   :  { %1118 = vst.msk [vmem:[#allocation2 + $0x8] sm:$0x3] %vm301_vm0, %v1114_v44  ;;  %v1273_v44 = vld [vmem:[#allocation8] sm:$0x3] }
 0x3b3   :  { %v1119_v45 = vld [vmem:[#allocation7] sm:$0x3] }
 0x3b4   :  { %3156 = vmatmul.msk.f32.vlgmr.msra.gmra.mxu0 %vm180_vm2, %v1119_v45  ;;  %3158 = vmatmul.msk.f32.vlgmr.msrb.gmra.mxu1 %vm180_vm2, %v1119_v45 }
 0x3b5   :  { %3160 = vmatmul.msk.f32.vlgmr.msra.gmra.mxu2 %vm180_vm2, %v1119_v45  ;;  %3161 = vmatmul.msk.f32.vlgmr.msra.gmra.mxu3 %vm180_vm2, %v1119_v45 }
 0x3b6   :  { %1465 = vmatpush.msra.mxu0 %v3526_v46  ;;  %1507 = vmatpush.msrb.mxu1 %v3527_v47 }
 0x3b7   :  { %1549 = vmatpush.msra.mxu2 %v3528_v48  ;;  %1573 = vmatpush.msra.mxu3 %v3529_v49 }
 0x3b8   :  { %1466 = vmatpush.msra.mxu0 %v3530_v10  ;;  %1508 = vmatpush.msrb.mxu1 %v3531_v11 }
 0x3b9   :  { %1550 = vmatpush.msra.mxu2 %v3532_v13  ;;  %1574 = vmatpush.msra.mxu3 %v3533_v14 }
 0x3ba   :  { %1467 = vmatpush.msra.mxu0 %v3534_v15  ;;  %1509 = vmatpush.msrb.mxu1 %v3535_v16 }
 0x3bb   :  { %1551 = vmatpush.msra.mxu2 %v3536_v18  ;;  %1575 = vmatpush.msra.mxu3 %v3537_v21 }
 0x3bc   :  { %1468 = vmatpush.msra.mxu0 %v3538_v22  ;;  %1510 = vmatpush.msrb.mxu1 %v3539_v20  ;;  %v1285_v22 = vld [vmem:[#allocation3 + $0xc] sm:$0x3] }
 0x3bd   :  { %1552 = vmatpush.msra.mxu2 %v3540_v23  ;;  %1576 = vmatpush.msra.mxu3 %v3541_v17  ;;  %v1330_v23 = vld [vmem:[#allocation4 + $0xc] sm:$0x3] }
 0x431   :  { %v1142_v25 = vpop.f32.mrf.mxu0  ;;  %v1184_v27 = vpop.f32.mrf.mxu1 }
 0x432   :  { %v1145_v24 = vadd.f32 %v1142_v25, %v1121_v26  ;;  %v1187_v51 = vadd.f32 %v1184_v27, %v1166_v50 }
 0x434   :  { %v3157_v52 = vmul.f32 -1.442695, %v1145_v24  ;;  %v3159_v53 = vmul.f32 -1.442695, %v1187_v51  ;;  %v1396_v24 = vld [vmem:[#allocation6 + $0xc] sm:$0x3] }
 0x436   :  { %3350 = vpow2.f32 %v3157_v52 }
 0x437   :  { %3352 = vpow2.f32 %v3159_v53 }
 0x438   :  { %v1250_v55 = vpop.f32.mrf.mxu3  ;;  %v1226_v62 = vpop.f32.mrf.mxu2 }
 0x439   :  { %v1253_v56 = vadd.f32 %v1250_v55, %v1232_v54  ;;  %v1229_v4 = vadd.f32 %v1226_v62, %v1208_v1 }
 0x43b   :  { %v3162_v57 = vmul.f32 -1.442695, %v1253_v56 }
 0x43c   :  { %v3351_v58 = vpop.eup %3350 }
 0x43d   :  { %v3353_v59 = vpop.eup %3352  ;;  %v1149_v60 = vadd.f32 1.0, %v3351_v58  ;;  %3354 = vpow2.f32 %v3162_v57 }
 0x43e   :  { %v1191_v61 = vadd.f32 1.0, %v3353_v59 }
 0x43f   :  { %3356 = vrcp.f32 %v1149_v60  ;;  %v1161_v12 = vand.u32 2147483648, %v1149_v60  ;;  %v1159_v29 = vand.u32 2147483647, %v1149_v60  ;;  %vm1155_vm9 = vweird.f32 %v1149_v60 }
 0x440   :  { %3358 = vrcp.f32 %v1191_v61  ;;  %v1203_v19 = vand.u32 2147483648, %v1191_v61  ;;  %v1201_v31 = vand.u32 2147483647, %v1191_v61  ;;  %vm1197_vm10 = vweird.f32 %v1191_v61 }
 0x441   :  { %v1162_v34 = vor.u32 1.1754944e-38, %v1161_v12  ;;  %vm1160_vm13 = vcmp.eq.f32.partialorder %v1159_v29, 8.507059e+37  ;;  %v1690_v29 = vld [vmem:[#allocation17 + $0x50] sm:$0xff] }
 0x442   :  { %v1204_v37 = vor.u32 1.1754944e-38, %v1203_v19  ;;  %vm1202_vm14 = vcmp.eq.f32.partialorder %v1201_v31, 8.507059e+37  ;;  %v1615_v19 = vld [vmem:[#allocation17 + $0x10] sm:$0xff] }
 0x443   :  { %v3355_v63 = vpop.eup %3354 }
 0x444   :  { %v1257_v2 = vadd.f32 1.0, %v3355_v63 }
 0x445   :  { %v3357_v3 = vpop.eup %3356 }
 0x446   :  { %v3359_v5 = vpop.eup %3358  ;;  %v1151_v6 = vmul.f32 %v3357_v3, %v1149_v60  ;;  %3360 = vrcp.f32 %v1257_v2  ;;  %vm1156_vm7 = vweird.f32 %v3357_v3  ;;  %v1269_v10 = vand.u32 2147483648, %v1257_v2  ;;  %v1372_v60 = vld [vmem:[#allocation5 + $0xc] sm:$0x3] }
 0x447   :  { %v1193_v7 = vmul.f32 %v3359_v5, %v1191_v61  ;;  %3362 = vtanh.f32 %v1229_v4  ;;  %vm1198_vm8 = vweird.f32 %v3359_v5  ;;  %vm1157_vm11 = vmor %vm1155_vm9, %vm1156_vm7  ;;  %vm1263_vm1 = vweird.f32 %v1257_v2  ;;  %v1616_v4 = vld [vmem:[#allocation17 + $0x18] sm:$0xff] }
 0x448   :  { %v1152_v8 = vsub.f32 1.0, %v1151_v6  ;;  %vm1199_vm12 = vmor %vm1197_vm10, %vm1198_vm8  ;;  %v1267_v11 = vand.u32 2147483647, %v1257_v2  ;;  %v1270_v14 = vor.u32 1.1754944e-38, %v1269_v10 }
 0x449   :  { %v1194_v9 = vsub.f32 1.0, %v1193_v7  ;;  %v1691_v7 = vld [vmem:[#allocation17 + $0x58] sm:$0xff] }
 0x44a   :  { %v1153_v28 = vmul.f32 %v3357_v3, %v1152_v8  ;;  %vm1268_vm4 = vcmp.eq.f32.partialorder %v1267_v11, 8.507059e+37  ;;  %v1726_v8 = vld [vmem:[#allocation17 + $0x78] sm:$0xff] }
 0x44b   :  { %v1195_v30 = vmul.f32 %v3359_v5, %v1194_v9 }
 0x44c   :  { %v3361_v32 = vpop.eup %3360  ;;  %v1154_v33 = vadd.f32 %v3357_v3, %v1153_v28  ;;  %v1655_v28 = vld [vmem:[#allocation17 + $0x30] sm:$0xff] }
 0x44d   :  { %v1196_v35 = vadd.f32 %v3359_v5, %v1195_v30  ;;  %v1259_v36 = vmul.f32 %v3361_v32, %v1257_v2  ;;  %v3363_v39 = vpop.eup %3362  ;;  %vm1264_vm15 = vweird.f32 %v3361_v32 }
 0x44e   :  { %v1158_v38 = vsel %vm1157_vm11, %v3357_v3, %v1154_v33  ;;  %vm1265_vm3 = vmor %vm1263_vm1, %vm1264_vm15  ;;  %v1725_v33 = vld [vmem:[#allocation17 + $0x70] sm:$0xff] }
 0x44f   :  { %v1163_v40 = vsel %vm1160_vm13, %v1162_v34, %v1158_v38  ;;  %v1200_v41 = vsel %vm1199_vm12, %v3359_v5, %v1196_v35  ;;  %v1260_v42 = vsub.f32 1.0, %v1259_v36  ;;  %v1656_v5 = vld [vmem:[#allocation17 + $0x38] sm:$0xff]  ;;  %v1614_v34 = vld [vmem:[#allocation17 + $0x8] sm:$0xff] }
 0x450   :  { %v1205_v43 = vsel %vm1202_vm14, %v1204_v37, %v1200_v41  ;;  %v1275_v45 = vmul.f32 %v3363_v39, %v1163_v40  ;;  %v1654_v35 = vld [vmem:[#allocation17 + $0x28] sm:$0xff]  ;;  %v1613_v40 = vld [vmem:[#allocation17] sm:$0xff] }
 0x451   :  { %v1274_v46 = vmul.f32 %v1273_v44, %v1205_v43  ;;  %v1261_v47 = vmul.f32 %v3361_v32, %v1260_v42  ;;  %v1689_v38 = vld [vmem:[#allocation17 + $0x48] sm:$0xff]  ;;  %v1653_v43 = vld [vmem:[#allocation17 + $0x20] sm:$0xff] }
 0x452   :  { %v1724_v39 = vld [vmem:[#allocation17 + $0x68] sm:$0xff]  ;;  %v1688_v44 = vld [vmem:[#allocation17 + $0x40] sm:$0xff] }
 0x453   :  { %v1276_v48 = vadd.f32 %v1275_v45, %v1274_v46  ;;  %v1262_v49 = vadd.f32 %v3361_v32, %v1261_v47  ;;  %v1723_v45 = vld [vmem:[#allocation17 + $0x60] sm:$0xff] }
 0x455   :  { %3364 = vtanh.f32 %v1276_v48  ;;  %1279 = vst.msk [vmem:[#allocation8] sm:$0x3] %vm301_vm0, %v1276_v48  ;;  %v1266_v13 = vsel %vm1265_vm3, %v3361_v32, %v1262_v49 }
 0x456   :  { %v1271_v16 = vsel %vm1268_vm4, %v1270_v14, %v1266_v13 }
 0x45b   :  { %v3365_v15 = vpop.eup %3364 }
 0x45c   :  { %v1278_v18 = vmul.f32 %v3365_v15, %v1271_v16 }
 0x45e   :  { %1280 = vst.msk [vmem:[#allocation7] sm:$0x3] %vm301_vm0, %v1278_v18 }
 0x45f   :  { %1282 = vst.msk [vmem:[#allocation2 + $0xa] sm:$0x3] %vm301_vm0, %v1278_v18  ;;  %v1437_v18 = vld [vmem:[#allocation8] sm:$0x3] }
 0x465   :  { %v1283_v21 = vld [vmem:[#allocation7] sm:$0x3] }
 0x466   :  { %3163 = vmatmul.msk.f32.vlgmr.msrb.gmra.mxu0 %vm180_vm2, %v1283_v21  ;;  %3165 = vmatmul.msk.f32.vlgmr.msra.gmra.mxu1 %vm180_vm2, %v1283_v21 }
 0x467   :  { %3167 = vmatmul.msk.f32.vlgmr.msrb.gmra.mxu2 %vm180_vm2, %v1283_v21  ;;  %3168 = vmatmul.msk.f32.vlgmr.msrb.gmra.mxu3 %vm180_vm2, %v1283_v21 }
 0x468   :  { %1639 = vmatpush.msrb.mxu0 %v1616_v4  ;;  %1674 = vmatpush.msra.mxu1 %v1656_v5 }
 0x469   :  { %1709 = vmatpush.msrb.mxu2 %v1691_v7  ;;  %1744 = vmatpush.msrb.mxu3 %v1726_v8 }
 0x46a   :  { %1640 = vmatpush.msrb.mxu0 %v1615_v19  ;;  %1675 = vmatpush.msra.mxu1 %v1655_v28 }
 0x46b   :  { %1710 = vmatpush.msrb.mxu2 %v1690_v29  ;;  %1745 = vmatpush.msrb.mxu3 %v1725_v33 }
 0x46c   :  { %1641 = vmatpush.msrb.mxu0 %v1614_v34  ;;  %1676 = vmatpush.msra.mxu1 %v1654_v35  ;;  %v4150_v35 = vld [vmem:[#allocation18 + $0x18] sm:$0xff] }
 0x46d   :  { %1711 = vmatpush.msrb.mxu2 %v1689_v38  ;;  %1746 = vmatpush.msrb.mxu3 %v1724_v39 }
 0x46e   :  { %1642 = vmatpush.msrb.mxu0 %v1613_v40  ;;  %1677 = vmatpush.msra.mxu1 %v1653_v43  ;;  %v4160_v40 = vld [vmem:[#allocation18 + $0x30] sm:$0xff] }
 0x46f   :  { %1712 = vmatpush.msrb.mxu2 %v1688_v44  ;;  %1747 = vmatpush.msrb.mxu3 %v1723_v45  ;;  %v1536_v43 = vld [vmem:[#allocation5 + $0xe] sm:$0x3] }
 0x4e3   :  { %v1306_v20 = vpop.f32.mrf.mxu0  ;;  %v1348_v17 = vpop.f32.mrf.mxu1 }
 0x4e4   :  { %v1309_v26 = vadd.f32 %v1306_v20, %v1285_v22  ;;  %v1351_v25 = vadd.f32 %v1348_v17, %v1330_v23 }
 0x4e6   :  { %v3164_v50 = vmul.f32 -1.442695, %v1309_v26  ;;  %v3166_v27 = vmul.f32 -1.442695, %v1351_v25 }
 0x4e8   :  { %3366 = vpow2.f32 %v3164_v50 }
 0x4e9   :  { %3368 = vpow2.f32 %v3166_v27 }
 0x4ea   :  { %v1414_v51 = vpop.f32.mrf.mxu3  ;;  %v1390_v58 = vpop.f32.mrf.mxu2 }
 0x4eb   :  { %v1417_v52 = vadd.f32 %v1414_v51, %v1396_v24  ;;  %v1393_v63 = vadd.f32 %v1390_v58, %v1372_v60 }
 0x4ed   :  { %v3169_v53 = vmul.f32 -1.442695, %v1417_v52 }
 0x4ee   :  { %v3367_v54 = vpop.eup %3366 }
 0x4ef   :  { %v3369_v55 = vpop.eup %3368  ;;  %v4078_v56 = vadd.f32 1.0, %v3367_v54  ;;  %3370 = vpow2.f32 %v3169_v53  ;;  %v1611_v54 = vld [vmem:[#allocation2] sm:$0xff] }
 0x4f0   :  { %v4080_v57 = vadd.f32 1.0, %v3369_v55  ;;  %v1449_v55 = vld [vmem:[#allocation3 + $0xe] sm:$0x3] }
 0x4f1   :  { %3372 = vrcp.f32 %v4078_v56  ;;  %v1325_v12 = vand.u32 2147483648, %v4078_v56  ;;  %v1323_v32 = vand.u32 2147483647, %v4078_v56  ;;  %vm1319_vm7 = vweird.f32 %v4078_v56 }
 0x4f2   :  { %3374 = vrcp.f32 %v4080_v57  ;;  %v1367_v30 = vand.u32 2147483648, %v4080_v57  ;;  %v1365_v37 = vand.u32 2147483647, %v4080_v57  ;;  %vm1361_vm8 = vweird.f32 %v4080_v57 }
 0x4f3   :  { %v1326_v46 = vor.u32 1.1754944e-38, %v1325_v12  ;;  %vm1324_vm11 = vcmp.eq.f32.partialorder %v1323_v32, 8.507059e+37 }
 0x4f4   :  { %v1368_v49 = vor.u32 1.1754944e-38, %v1367_v30  ;;  %vm1366_vm12 = vcmp.eq.f32.partialorder %v1365_v37, 8.507059e+37  ;;  %v4139_v30 = vld [vmem:[%s4447_s6 + $0x2] ss:$0 sm:$0xff]  ;;  %v4154_v37 = vld [vmem:[#allocation18 + $0x10] sm:$0xff] }
 0x4f5   :  { %v3371_v59 = vpop.eup %3370 }
 0x4f6   :  { %v4084_v61 = vadd.f32 1.0, %v3371_v59 }
 0x4f7   :  { %v3373_v62 = vpop.eup %3372 }
 0x4f8   :  { %v4086_v1 = vpop.eup %3374  ;;  %v1315_v2 = vmul.f32 %v3373_v62, %v4078_v56  ;;  %3376 = vrcp.f32 %v4084_v61  ;;  %vm1320_vm5 = vweird.f32 %v3373_v62  ;;  %v1433_v26 = vand.u32 2147483648, %v4084_v61 }
 0x4f9   :  { %v1357_v3 = vmul.f32 %v4086_v1, %v4080_v57  ;;  %3378 = vtanh.f32 %v1393_v63  ;;  %vm1362_vm6 = vweird.f32 %v4086_v1  ;;  %vm1321_vm9 = vmor %vm1319_vm7, %vm1320_vm5  ;;  %vm1427_vm14 = vweird.f32 %v4084_v61  ;;  %v1494_v57 = vld [vmem:[#allocation4 + $0xe] sm:$0x3]  ;;  %v4123_v63 = vld [vmem:[%s4447_s6] ss:$0 sm:$0xff] }
 0x4fa   :  { %v1316_v6 = vsub.f32 1.0, %v1315_v2  ;;  %vm1363_vm10 = vmor %vm1361_vm8, %vm1362_vm6  ;;  %v1431_v25 = vand.u32 2147483647, %v4084_v61  ;;  %v1434_v27 = vor.u32 1.1754944e-38, %v1433_v26  ;;  %v4193_v26 = vld [vmem:[#allocation18 + $0x20] sm:$0xff] }
 0x4fb   :  { %v1358_v9 = vsub.f32 1.0, %v1357_v3  ;;  %v1560_v3 = vld [vmem:[#allocation6 + $0xe] sm:$0x3] }
 0x4fc   :  { %v1317_v31 = vmul.f32 %v3373_v62, %v1316_v6  ;;  %vm1432_vm1 = vcmp.eq.f32.partialorder %v1431_v25, 8.507059e+37 }
 0x4fd   :  { %v1359_v36 = vmul.f32 %v4086_v1, %v1358_v9 }
 0x4fe   :  { %v3377_v41 = vpop.eup %3376  ;;  %v1318_v42 = vadd.f32 %v3373_v62, %v1317_v31  ;;  %v4144_v31 = vld [vmem:[%s4447_s6 + $0x3] ss:$0 sm:$0xff] }
 0x4ff   :  { %v1360_v47 = vadd.f32 %v4086_v1, %v1359_v36  ;;  %v1423_v48 = vmul.f32 %v3377_v41, %v4084_v61  ;;  %v3379_v11 = vpop.eup %3378  ;;  %vm1428_vm13 = vweird.f32 %v3377_v41  ;;  %v4152_v36 = vld [vmem:[#allocation18 + $0x38] sm:$0xff] }
 0x500   :  { %v1322_v10 = vsel %vm1321_vm9, %v3373_v62, %v1318_v42  ;;  %vm1429_vm15 = vmor %vm1427_vm14, %vm1428_vm13 }
 0x501   :  { %v1327_v13 = vsel %vm1324_vm11, %v1326_v46, %v1322_v10  ;;  %v1364_v14 = vsel %vm1363_vm10, %v4086_v1, %v1360_v47  ;;  %v1424_v15 = vsub.f32 1.0, %v1423_v48  ;;  %v4128_v1 = vld [vmem:[%s4447_s6 + $0x1] ss:$0 sm:$0xff] }
 0x502   :  { %v1369_v16 = vsel %vm1366_vm12, %v1368_v49, %v1364_v14  ;;  %v1439_v21 = vmul.f32 %v3379_v11, %v1327_v13  ;;  %v4174_v11 = vld [vmem:[#allocation18 + $0x8] sm:$0xff] }
 0x503   :  { %v1438_v22 = vmul.f32 %v1437_v18, %v1369_v16  ;;  %v1425_v20 = vmul.f32 %v3377_v41, %v1424_v15  ;;  %v4176_v13 = vld [vmem:[#allocation18 + $0x28] sm:$0xff]  ;;  %v4181_v16 = vld [vmem:[#allocation18 + $0x58] sm:$0xff]  ;;  %v4183_v18 = vld [vmem:[#allocation18 + $0x70] sm:$0xff] }
 0x505   :  { %v1440_v23 = vadd.f32 %v1439_v21, %v1438_v22  ;;  %v1426_v17 = vadd.f32 %v3377_v41, %v1425_v20  ;;  %v4185_v21 = vld [vmem:[#allocation18 + $0x50] sm:$0xff] }
 0x507   :  { %3380 = vtanh.f32 %v1440_v23  ;;  %1443 = vst.msk [vmem:[#allocation8] sm:$0x3] %vm301_vm0, %v1440_v23  ;;  %v1430_v50 = vsel %vm1429_vm15, %v3377_v41, %v1426_v17  ;;  %v4162_v41 = vld [vmem:[#allocation18 + $0x78] sm:$0xff]  ;;  %v4191_v17 = vld [vmem:[#allocation18] sm:$0xff] }
 0x508   :  { %v1435_v51 = vsel %vm1432_vm1, %v1434_v27, %v1430_v50  ;;  %v4198_v27 = vld [vmem:[#allocation18 + $0x48] sm:$0xff] }
 0x50d   :  { %v3381_v24 = vpop.eup %3380 }
 0x50e   :  { %v1442_v52 = vmul.f32 %v3381_v24, %v1435_v51  ;;  %v4200_v24 = vld [vmem:[#allocation18 + $0x68] sm:$0xff]  ;;  %v4202_v51 = vld [vmem:[#allocation18 + $0x60] sm:$0xff] }
 0x510   :  { %1444 = vst.msk [vmem:[#allocation7] sm:$0x3] %vm301_vm0, %v1442_v52 }
 0x511   :  { %1446 = vst.msk [vmem:[#allocation2 + $0xc] sm:$0x3] %vm301_vm0, %v1442_v52 }
 0x517   :  { %v1447_v53 = vld [vmem:[#allocation7] sm:$0x3] }
 0x518   :  { %3170 = vmatmul.msk.f32.vlgmr.msra.gmra.mxu0 %vm180_vm2, %v1447_v53  ;;  %3172 = vmatmul.msk.f32.vlgmr.msrb.gmra.mxu1 %vm180_vm2, %v1447_v53 }
 0x519   :  { %3174 = vmatmul.msk.f32.vlgmr.msra.gmra.mxu2 %vm180_vm2, %v1447_v53  ;;  %3175 = vmatmul.msk.f32.vlgmr.msra.gmra.mxu3 %vm180_vm2, %v1447_v53 }
 0x51a   :  { %1795 = vmatpush.msra.mxu0 %v4150_v35  ;;  %1836 = vmatpush.msrb.mxu1 %v4152_v36 }
 0x51b   :  { %1900 = vmatpush.msra.mxu3 %v4162_v41  ;;  %1877 = vmatpush.msra.mxu2 %v4181_v16 }
 0x51c   :  { %1796 = vmatpush.msra.mxu0 %v4154_v37  ;;  %1837 = vmatpush.msrb.mxu1 %v4160_v40 }
 0x51d   :  { %1901 = vmatpush.msra.mxu3 %v4183_v18  ;;  %1878 = vmatpush.msra.mxu2 %v4185_v21 }
 0x51e   :  { %1797 = vmatpush.msra.mxu0 %v4174_v11  ;;  %1838 = vmatpush.msrb.mxu1 %v4176_v13 }
 0x51f   :  { %1902 = vmatpush.msra.mxu3 %v4200_v24  ;;  %1879 = vmatpush.msra.mxu2 %v4198_v27 }
 0x520   :  { %3177 = vmatmul.msk.f32.vlgmr.msrb.gmra.mxu0 %vm180_vm2, %v1611_v54  ;;  %3180 = vmatmul.msk.f32.vlgmr.msra.gmra.mxu1 %vm180_vm2, %v1611_v54 }
 0x521   :  { %3183 = vmatmul.msk.f32.vlgmr.msrb.gmra.mxu2 %vm180_vm2, %v1611_v54  ;;  %3186 = vmatmul.msk.f32.vlgmr.msrb.gmra.mxu3 %vm180_vm2, %v1611_v54 }
 0x522   :  { %1798 = vmatpush.msra.mxu0 %v4191_v17  ;;  %1839 = vmatpush.msrb.mxu1 %v4193_v26 }
 0x523   :  { %1903 = vmatpush.msra.mxu3 %v4202_v51 }
 0x524   :  { %1954 = vmatpush.msrb.mxu0 %v4150_v35  ;;  %1995 = vmatpush.msra.mxu1 %v4152_v36 }
 0x525   :  { %2059 = vmatpush.msrb.mxu3 %v4162_v41 }
 0x526   :  { %1955 = vmatpush.msrb.mxu0 %v4154_v37  ;;  %1996 = vmatpush.msra.mxu1 %v4160_v40 }
 0x527   :  { %2060 = vmatpush.msrb.mxu3 %v4183_v18 }
 0x528   :  { %1956 = vmatpush.msrb.mxu0 %v4174_v11  ;;  %1997 = vmatpush.msra.mxu1 %v4176_v13 }
 0x529   :  { %2061 = vmatpush.msrb.mxu3 %v4200_v24 }
 0x52a   :  { %1957 = vmatpush.msrb.mxu0 %v4191_v17  ;;  %1998 = vmatpush.msra.mxu1 %v4193_v26 }
 0x52b   :  { %2062 = vmatpush.msrb.mxu3 %v4202_v51 }
 0x595   :  { %v1470_v56 = vpop.f32.mrf.mxu0  ;;  %v1512_v58 = vpop.f32.mrf.mxu1 }
 0x596   :  { %v1473_v59 = vadd.f32 %v1470_v56, %v1449_v55  ;;  %v1515_v60 = vadd.f32 %v1512_v58, %v1494_v57  ;;  %v4210_v57 = vld [vmem:[#allocation18 + $0x40] sm:$0xff] }
 0x597   :  { %1880 = vmatpush.msra.mxu2 %v4210_v57 }
 0x598   :  { %v3171_v61 = vmul.f32 -1.442695, %v1473_v59  ;;  %v3173_v62 = vmul.f32 -1.442695, %v1515_v60 }
 0x599   :  { %2036 = vmatpush.msrb.mxu2 %v4181_v16 }
 0x59a   :  { %3382 = vpow2.f32 %v3171_v61 }
 0x59b   :  { %3384 = vpow2.f32 %v3173_v62  ;;  %2037 = vmatpush.msrb.mxu2 %v4185_v21 }
 0x59c   :  { %v1554_v2 = vpop.f32.mrf.mxu2  ;;  %v1578_v4 = vpop.f32.mrf.mxu3 }
 0x59d   :  { %v1581_v5 = vadd.f32 %v1578_v4, %v1560_v3  ;;  %v1644_v6 = vpop.f32.mrf.mxu0  ;;  %v1679_v7 = vpop.f32.mrf.mxu1  ;;  %v1557_v46 = vadd.f32 %v1554_v2, %v1536_v43  ;;  %v1601_v4 = vld [vmem:[#allocation8] sm:$0x3]  ;;  %2038 = vmatpush.msrb.mxu2 %v4198_v27 }
 0x59e   :  { %v1645_v8 = vadd.f32 %v4123_v63, %v1644_v6  ;;  %v1680_v9 = vadd.f32 %v4128_v1, %v1679_v7 }
 0x59f   :  { %v3176_v12 = vmul.f32 -1.442695, %v1581_v5  ;;  %2039 = vmatpush.msrb.mxu2 %v4210_v57 }
 0x5a0   :  { %v3383_v19 = vpop.eup %3382  ;;  %1650 = vst.msk [vmem:[#allocation3] sm:$0xff] %vm180_vm2, %v1645_v8 }
 0x5a1   :  { %v3385_v28 = vpop.eup %3384  ;;  %v4133_v29 = vadd.f32 1.0, %v3383_v19  ;;  %3386 = vpow2.f32 %v3176_v12  ;;  %1685 = vst.msk [vmem:[#allocation4] sm:$0xff] %vm180_vm2, %v1680_v9 }
 0x5a2   :  { %v4146_v32 = vadd.f32 1.0, %v3385_v28 }
 0x5a3   :  { %3388 = vrcp.f32 %v4133_v29  ;;  %v1489_v15 = vand.u32 2147483648, %v4133_v29  ;;  %v1487_v23 = vand.u32 2147483647, %v4133_v29  ;;  %vm1483_vm5 = vweird.f32 %v4133_v29 }
 0x5a4   :  { %3390 = vrcp.f32 %v4146_v32  ;;  %v1714_v33 = vpop.f32.mrf.mxu2  ;;  %v1749_v34 = vpop.f32.mrf.mxu3  ;;  %v1531_v22 = vand.u32 2147483648, %v4146_v32  ;;  %v1529_v50 = vand.u32 2147483647, %v4146_v32  ;;  %vm1525_vm6 = vweird.f32 %v4146_v32 }
 0x5a5   :  { %v1715_v38 = vadd.f32 %v4139_v30, %v1714_v33  ;;  %v1750_v39 = vadd.f32 %v4144_v31, %v1749_v34  ;;  %v1490_v54 = vor.u32 1.1754944e-38, %v1489_v15  ;;  %vm1488_vm9 = vcmp.eq.f32.partialorder %v1487_v23, 8.507059e+37 }
 0x5a6   :  { %v1532_v58 = vor.u32 1.1754944e-38, %v1531_v22  ;;  %vm1530_vm10 = vcmp.eq.f32.partialorder %v1529_v50, 8.507059e+37 }
 0x5a7   :  { %v3387_v42 = vpop.eup %3386  ;;  %1720 = vst.msk [vmem:[#allocation5] sm:$0xff] %vm180_vm2, %v1715_v38 }
 0x5a8   :  { %v4168_v44 = vadd.f32 1.0, %v3387_v42  ;;  %1755 = vst.msk [vmem:[#allocation6] sm:$0xff] %vm180_vm2, %v1750_v39 }
 0x5a9   :  { %v3389_v45 = vpop.eup %3388 }
 0x5aa   :  { %v3391_v47 = vpop.eup %3390  ;;  %v1479_v48 = vmul.f32 %v3389_v45, %v4133_v29  ;;  %3392 = vrcp.f32 %v4168_v44  ;;  %vm1484_vm3 = vweird.f32 %v3389_v45  ;;  %v1597_v12 = vand.u32 2147483648, %v4168_v44 }
 0x5ab   :  { %v1521_v49 = vmul.f32 %v3391_v47, %v4146_v32  ;;  %3394 = vtanh.f32 %v1557_v46  ;;  %vm1526_vm4 = vweird.f32 %v3391_v47  ;;  %vm1485_vm7 = vmor %vm1483_vm5, %vm1484_vm3  ;;  %vm1591_vm12 = vweird.f32 %v4168_v44 }
 0x5ac   :  { %v1480_v10 = vsub.f32 1.0, %v1479_v48  ;;  %vm1527_vm8 = vmor %vm1525_vm6, %vm1526_vm4  ;;  %v1595_v19 = vand.u32 2147483647, %v4168_v44  ;;  %v1598_v29 = vor.u32 1.1754944e-38, %v1597_v12 }
 0x5ad   :  { %v1522_v14 = vsub.f32 1.0, %v1521_v49  ;;  %v1779_v49 = vld [vmem:[#allocation3] sm:$0x3] }
 0x5ae   :  { %v1481_v20 = vmul.f32 %v3389_v45, %v1480_v10  ;;  %vm1596_vm14 = vcmp.eq.f32.partialorder %v1595_v19, 8.507059e+37 }
 0x5af   :  { %v1523_v25 = vmul.f32 %v3391_v47, %v1522_v14  ;;  %v1823_v14 = vld [vmem:[#allocation4] sm:$0x3] }
 0x5b0   :  { %v3393_v52 = vpop.eup %3392  ;;  %v1482_v53 = vadd.f32 %v3389_v45, %v1481_v20  ;;  %v1887_v23 = vld [vmem:[#allocation6] sm:$0x3] }
 0x5b1   :  { %v1524_v55 = vadd.f32 %v3391_v47, %v1523_v25  ;;  %v1587_v56 = vmul.f32 %v3393_v52, %v4168_v44  ;;  %v3395_v60 = vpop.eup %3394  ;;  %vm1592_vm11 = vweird.f32 %v3393_v52 }
 0x5b2   :  { %v1486_v59 = vsel %vm1485_vm7, %v3389_v45, %v1482_v53  ;;  %vm1593_vm13 = vmor %vm1591_vm12, %vm1592_vm11 }
 0x5b3   :  { %v1491_v61 = vsel %vm1488_vm9, %v1490_v54, %v1486_v59  ;;  %v1528_v62 = vsel %vm1527_vm8, %v3391_v47, %v1524_v55  ;;  %v1588_v2 = vsub.f32 1.0, %v1587_v56 }
 0x5b4   :  { %v1533_v3 = vsel %vm1530_vm10, %v1532_v58, %v1528_v62  ;;  %v1603_v5 = vmul.f32 %v3395_v60, %v1491_v61  ;;  %v1864_v58 = vld [vmem:[#allocation5] sm:$0x3] }
 0x5b5   :  { %v1602_v6 = vmul.f32 %v1601_v4, %v1533_v3  ;;  %v1589_v7 = vmul.f32 %v3393_v52, %v1588_v2 }
 0x5b7   :  { %v1604_v8 = vadd.f32 %v1603_v5, %v1602_v6  ;;  %v1590_v9 = vadd.f32 %v3393_v52, %v1589_v7 }
 0x5b9   :  { %3396 = vtanh.f32 %v1604_v8  ;;  %1607 = vst.msk [vmem:[#allocation8] sm:$0x3] %vm301_vm0, %v1604_v8  ;;  %v1594_v28 = vsel %vm1593_vm13, %v3393_v52, %v1590_v9 }
 0x5ba   :  { %1777 = vst.msk [vmem:[#allocation8] sm:$0x3] %vm301_vm0, %v3771_v0  ;;  %v1599_v33 = vsel %vm1596_vm14, %v1598_v29, %v1594_v28 }
 0x5bf   :  { %v3397_v32 = vpop.eup %3396 }
 0x5c0   :  { %v1606_v34 = vmul.f32 %v3397_v32, %v1599_v33 }
 0x5c2   :  { %1608 = vst.msk [vmem:[#allocation7] sm:$0x3] %vm301_vm0, %v1606_v34 }
 0x5c3   :  { %1610 = vst.msk [vmem:[#allocation2 + $0xe] sm:$0x3] %vm301_vm0, %v1606_v34 }
 0x5c4   :  { %1776 = vst.msk [vmem:[#allocation7] sm:$0x3] %vm301_vm0, %v3771_v0 }
 0x5ca   :  { %v1612_v38 = vld [vmem:[#allocation2 + $0x8] sm:$0xff] }
 0x5cb   :  { %3178 = vmatmul.msk.f32.gmra.mxu0 %vm180_vm2, %v1612_v38  ;;  %3181 = vmatmul.msk.f32.gmra.mxu1 %vm180_vm2, %v1612_v38  ;;  %v1778_v39 = vld [vmem:[#allocation7] sm:$0x3] }
 0x5cc   :  { %3184 = vmatmul.msk.f32.gmra.mxu2 %vm180_vm2, %v1612_v38  ;;  %3187 = vmatmul.msk.f32.gmra.mxu3 %vm180_vm2, %v1612_v38 }
 0x5d3   :  { %3188 = vmatmul.msk.f32.vlgmr.msra.gmra.mxu0 %vm180_vm2, %v1778_v39  ;;  %3190 = vmatmul.msk.f32.vlgmr.msrb.gmra.mxu1 %vm180_vm2, %v1778_v39 }
 0x5d4   :  { %3192 = vmatmul.msk.f32.vlgmr.msra.gmra.mxu2 %vm180_vm2, %v1778_v39  ;;  %3193 = vmatmul.msk.f32.vlgmr.msra.gmra.mxu3 %vm180_vm2, %v1778_v39 }
 0x5d5   :  { %2113 = vmatpush.msra.mxu0 %v4150_v35  ;;  %2154 = vmatpush.msrb.mxu1 %v4152_v36 }
 0x5d6   :  { %2195 = vmatpush.msra.mxu2 %v4181_v16  ;;  %2218 = vmatpush.msra.mxu3 %v4162_v41 }
 0x5d7   :  { %2114 = vmatpush.msra.mxu0 %v4154_v37  ;;  %2155 = vmatpush.msrb.mxu1 %v4160_v40 }
 0x5d8   :  { %2196 = vmatpush.msra.mxu2 %v4185_v21  ;;  %2219 = vmatpush.msra.mxu3 %v4183_v18 }
 0x5d9   :  { %2115 = vmatpush.msra.mxu0 %v4174_v11  ;;  %2156 = vmatpush.msrb.mxu1 %v4176_v13 }
 0x5da   :  { %2197 = vmatpush.msra.mxu2 %v4198_v27  ;;  %2220 = vmatpush.msra.mxu3 %v4200_v24 }
 0x5db   :  { %2116 = vmatpush.msra.mxu0 %v4191_v17  ;;  %2157 = vmatpush.msrb.mxu1 %v4193_v26 }
 0x5dc   :  { %2198 = vmatpush.msra.mxu2 %v4210_v57  ;;  %2221 = vmatpush.msra.mxu3 %v4202_v51 }
 0x648   :  { %v1647_v0 = vpop.f32.mrf.mxu0  ;;  %v1682_v42 = vpop.f32.mrf.mxu1 }
 0x649   :  { %v1648_v43 = vadd.f32 %v4123_v63, %v1647_v0  ;;  %v1683_v44 = vadd.f32 %v4128_v1, %v1682_v42  ;;  %v1928_v0 = vld [vmem:[#allocation8] sm:$0x3] }
 0x64b   :  { %1651 = vst.msk [vmem:[#allocation3 + $0x8] sm:$0xff] %vm180_vm2, %v1648_v43 }
 0x64c   :  { %1686 = vst.msk [vmem:[#allocation4 + $0x8] sm:$0xff] %vm180_vm2, %v1683_v44 }
 0x64f   :  { %v1717_v45 = vpop.f32.mrf.mxu2  ;;  %v1752_v46 = vpop.f32.mrf.mxu3 }
 0x650   :  { %v1718_v47 = vadd.f32 %v4139_v30, %v1717_v45  ;;  %v1753_v48 = vadd.f32 %v4144_v31, %v1752_v46  ;;  %v1800_v10 = vpop.f32.mrf.mxu0  ;;  %v1841_v15 = vpop.f32.mrf.mxu1 }
 0x651   :  { %v1803_v22 = vadd.f32 %v1800_v10, %v1779_v49  ;;  %v1844_v20 = vadd.f32 %v1841_v15, %v1823_v14 }
 0x652   :  { %1721 = vst.msk [vmem:[#allocation5 + $0x8] sm:$0xff] %vm180_vm2, %v1718_v47 }
 0x653   :  { %1756 = vst.msk [vmem:[#allocation6 + $0x8] sm:$0xff] %vm180_vm2, %v1753_v48  ;;  %v3189_v63 = vmul.f32 -1.442695, %v1803_v22  ;;  %v3191_v1 = vmul.f32 -1.442695, %v1844_v20 }
 0x655   :  { %3398 = vpow2.f32 %v3189_v63 }
 0x656   :  { %3400 = vpow2.f32 %v3191_v1 }
 0x657   :  { %v1905_v25 = vpop.f32.mrf.mxu3  ;;  %v1882_v55 = vpop.f32.mrf.mxu2 }
 0x658   :  { %v1908_v50 = vadd.f32 %v1905_v25, %v1887_v23  ;;  %v1885_v61 = vadd.f32 %v1882_v55, %v1864_v58 }
 0x65a   :  { %v3194_v30 = vmul.f32 -1.442695, %v1908_v50 }
 0x65b   :  { %v3399_v52 = vpop.eup %3398 }
 0x65c   :  { %v3401_v31 = vpop.eup %3400  ;;  %v1807_v53 = vadd.f32 1.0, %v3399_v52  ;;  %3402 = vpow2.f32 %v3194_v30  ;;  %v1938_v30 = vld [vmem:[#allocation3 + $0x2] sm:$0x3] }
 0x65d   :  { %v1848_v54 = vadd.f32 1.0, %v3401_v31  ;;  %v1982_v31 = vld [vmem:[#allocation4 + $0x2] sm:$0x3] }
 0x65e   :  { %3404 = vrcp.f32 %v1807_v53  ;;  %v1819_v6 = vand.u32 2147483648, %v1807_v53  ;;  %v1817_v9 = vand.u32 2147483647, %v1807_v53  ;;  %vm1813_vm3 = vweird.f32 %v1807_v53 }
 0x65f   :  { %3406 = vrcp.f32 %v1848_v54  ;;  %v1860_v7 = vand.u32 2147483648, %v1848_v54  ;;  %v1858_v19 = vand.u32 2147483647, %v1848_v54  ;;  %vm1854_vm4 = vweird.f32 %v1848_v54 }
 0x660   :  { %v1820_v32 = vor.u32 1.1754944e-38, %v1819_v6  ;;  %vm1818_vm7 = vcmp.eq.f32.partialorder %v1817_v9, 8.507059e+37 }
 0x661   :  { %v1861_v38 = vor.u32 1.1754944e-38, %v1860_v7  ;;  %vm1859_vm8 = vcmp.eq.f32.partialorder %v1858_v19, 8.507059e+37 }
 0x662   :  { %v3403_v56 = vpop.eup %3402 }
 0x663   :  { %v1912_v59 = vadd.f32 1.0, %v3403_v56 }
 0x664   :  { %v3405_v60 = vpop.eup %3404 }
 0x665   :  { %v3407_v62 = vpop.eup %3406  ;;  %v1809_v2 = vmul.f32 %v3405_v60, %v1807_v53  ;;  %3408 = vrcp.f32 %v1912_v59  ;;  %vm1814_vm15 = vweird.f32 %v3405_v60  ;;  %v1924_v15 = vand.u32 2147483648, %v1912_v59 }
 0x666   :  { %v1850_v3 = vmul.f32 %v3407_v62, %v1848_v54  ;;  %3410 = vtanh.f32 %v1885_v61  ;;  %vm1855_vm1 = vweird.f32 %v3407_v62  ;;  %vm1815_vm5 = vmor %vm1813_vm3, %vm1814_vm15  ;;  %vm1918_vm10 = vweird.f32 %v1912_v59 }
 0x667   :  { %v1810_v4 = vsub.f32 1.0, %v1809_v2  ;;  %vm1856_vm6 = vmor %vm1854_vm4, %vm1855_vm1  ;;  %v1922_v22 = vand.u32 2147483647, %v1912_v59  ;;  %v1925_v63 = vor.u32 1.1754944e-38, %v1924_v15 }
 0x668   :  { %v1851_v5 = vsub.f32 1.0, %v1850_v3 }
 0x669   :  { %v1811_v8 = vmul.f32 %v3405_v60, %v1810_v4  ;;  %vm1923_vm12 = vcmp.eq.f32.partialorder %v1922_v22, 8.507059e+37 }
 0x66a   :  { %v1852_v12 = vmul.f32 %v3407_v62, %v1851_v5 }
 0x66b   :  { %v3409_v28 = vpop.eup %3408  ;;  %v1812_v29 = vadd.f32 %v3405_v60, %v1811_v8  ;;  %v2023_v8 = vld [vmem:[#allocation5 + $0x2] sm:$0x3] }
 0x66c   :  { %v1853_v33 = vadd.f32 %v3407_v62, %v1852_v12  ;;  %v1914_v34 = vmul.f32 %v3409_v28, %v1912_v59  ;;  %v3411_v42 = vpop.eup %3410  ;;  %vm1919_vm9 = vweird.f32 %v3409_v28  ;;  %v2046_v59 = vld [vmem:[#allocation6 + $0x2] sm:$0x3] }
 0x66d   :  { %v1816_v39 = vsel %vm1815_vm5, %v3405_v60, %v1812_v29  ;;  %vm1920_vm11 = vmor %vm1918_vm10, %vm1919_vm9 }
 0x66e   :  { %v1821_v43 = vsel %vm1818_vm7, %v1820_v32, %v1816_v39  ;;  %v1857_v44 = vsel %vm1856_vm6, %v3407_v62, %v1853_v33  ;;  %v1915_v45 = vsub.f32 1.0, %v1914_v34 }
 0x66f   :  { %v1862_v46 = vsel %vm1859_vm8, %v1861_v38, %v1857_v44  ;;  %v1930_v47 = vmul.f32 %v3411_v42, %v1821_v43 }
 0x670   :  { %v1929_v48 = vmul.f32 %v1928_v0, %v1862_v46  ;;  %v1916_v49 = vmul.f32 %v3409_v28, %v1915_v45 }
 0x672   :  { %v1931_v10 = vadd.f32 %v1930_v47, %v1929_v48  ;;  %v1917_v14 = vadd.f32 %v3409_v28, %v1916_v49 }
 0x674   :  { %3412 = vtanh.f32 %v1931_v10  ;;  %1934 = vst.msk [vmem:[#allocation8] sm:$0x3] %vm301_vm0, %v1931_v10  ;;  %v1921_v20 = vsel %vm1920_vm11, %v3409_v28, %v1917_v14 }
 0x675   :  { %v1926_v23 = vsel %vm1923_vm12, %v1925_v63, %v1921_v20 }
 0x67a   :  { %v3413_v1 = vpop.eup %3412 }
 0x67b   :  { %v1933_v25 = vmul.f32 %v3413_v1, %v1926_v23  ;;  %v2087_v23 = vld [vmem:[#allocation8] sm:$0x3] }
 0x67d   :  { %1936 = vst.msk [vmem:[#allocation2] sm:$0x3] %vm301_vm0, %v1933_v25 }
 0x67e   :  { %1935 = vst.msk [vmem:[#allocation7] sm:$0x3] %vm301_vm0, %v1933_v25 }
 0x685   :  { %v1937_v50 = vld [vmem:[#allocation7] sm:$0x3] }
 0x686   :  { %3195 = vmatmul.msk.f32.vlgmr.msrb.gmra.mxu0 %vm180_vm2, %v1937_v50  ;;  %3197 = vmatmul.msk.f32.vlgmr.msra.gmra.mxu1 %vm180_vm2, %v1937_v50 }
 0x687   :  { %3199 = vmatmul.msk.f32.vlgmr.msrb.gmra.mxu2 %vm180_vm2, %v1937_v50  ;;  %3200 = vmatmul.msk.f32.vlgmr.msrb.gmra.mxu3 %vm180_vm2, %v1937_v50 }
 0x688   :  { %2272 = vmatpush.msrb.mxu0 %v4150_v35  ;;  %2313 = vmatpush.msra.mxu1 %v4152_v36 }
 0x689   :  { %2354 = vmatpush.msrb.mxu2 %v4181_v16  ;;  %2377 = vmatpush.msrb.mxu3 %v4162_v41 }
 0x68a   :  { %2273 = vmatpush.msrb.mxu0 %v4154_v37  ;;  %2314 = vmatpush.msra.mxu1 %v4160_v40 }
 0x68b   :  { %2355 = vmatpush.msrb.mxu2 %v4185_v21  ;;  %2378 = vmatpush.msrb.mxu3 %v4183_v18 }
 0x68c   :  { %2274 = vmatpush.msrb.mxu0 %v4174_v11  ;;  %2315 = vmatpush.msra.mxu1 %v4176_v13 }
 0x68d   :  { %2356 = vmatpush.msrb.mxu2 %v4198_v27  ;;  %2379 = vmatpush.msrb.mxu3 %v4200_v24 }
 0x68e   :  { %2275 = vmatpush.msrb.mxu0 %v4191_v17  ;;  %2316 = vmatpush.msra.mxu1 %v4193_v26 }
 0x68f   :  { %2357 = vmatpush.msrb.mxu2 %v4210_v57  ;;  %2380 = vmatpush.msrb.mxu3 %v4202_v51 }
 0x703   :  { %v1959_v52 = vpop.f32.mrf.mxu0  ;;  %v2000_v53 = vpop.f32.mrf.mxu1 }
 0x704   :  { %v1962_v54 = vadd.f32 %v1959_v52, %v1938_v30  ;;  %v2003_v55 = vadd.f32 %v2000_v53, %v1982_v31 }
 0x706   :  { %v3196_v56 = vmul.f32 -1.442695, %v1962_v54  ;;  %v3198_v58 = vmul.f32 -1.442695, %v2003_v55 }
 0x708   :  { %3414 = vpow2.f32 %v3196_v56 }
 0x709   :  { %3416 = vpow2.f32 %v3198_v58 }
 0x70a   :  { %v2064_v60 = vpop.f32.mrf.mxu3  ;;  %v2041_v6 = vpop.f32.mrf.mxu2 }
 0x70b   :  { %v2067_v61 = vadd.f32 %v2064_v60, %v2046_v59  ;;  %v2044_v19 = vadd.f32 %v2041_v6, %v2023_v8 }
 0x70d   :  { %v3201_v62 = vmul.f32 -1.442695, %v2067_v61 }
 0x70e   :  { %v3415_v2 = vpop.eup %3414 }
 0x70f   :  { %v3417_v3 = vpop.eup %3416  ;;  %v1966_v4 = vadd.f32 1.0, %v3415_v2  ;;  %3418 = vpow2.f32 %v3201_v62  ;;  %v2097_v62 = vld [vmem:[#allocation3 + $0x4] sm:$0x3] }
 0x710   :  { %v2007_v5 = vadd.f32 1.0, %v3417_v3  ;;  %v2141_v3 = vld [vmem:[#allocation4 + $0x4] sm:$0x3] }
 0x711   :  { %3420 = vrcp.f32 %v1966_v4  ;;  %v1978_v38 = vand.u32 2147483648, %v1966_v4  ;;  %v1976_v42 = vand.u32 2147483647, %v1966_v4  ;;  %vm1972_vm15 = vweird.f32 %v1966_v4 }
 0x712   :  { %3422 = vrcp.f32 %v2007_v5  ;;  %v2019_v39 = vand.u32 2147483648, %v2007_v5  ;;  %v2017_v44 = vand.u32 2147483647, %v2007_v5  ;;  %vm2013_vm1 = vweird.f32 %v2007_v5 }
 0x713   :  { %v1979_v47 = vor.u32 1.1754944e-38, %v1978_v38  ;;  %vm1977_vm5 = vcmp.eq.f32.partialorder %v1976_v42, 8.507059e+37 }
 0x714   :  { %v2020_v10 = vor.u32 1.1754944e-38, %v2019_v39  ;;  %vm2018_vm6 = vcmp.eq.f32.partialorder %v2017_v44, 8.507059e+37 }
 0x715   :  { %v3419_v7 = vpop.eup %3418 }
 0x716   :  { %v2071_v9 = vadd.f32 1.0, %v3419_v7 }
 0x717   :  { %v3421_v12 = vpop.eup %3420 }
 0x718   :  { %v3423_v28 = vpop.eup %3422  ;;  %v1968_v29 = vmul.f32 %v3421_v12, %v1966_v4  ;;  %3424 = vrcp.f32 %v2071_v9  ;;  %vm1973_vm13 = vweird.f32 %v3421_v12  ;;  %v2083_v53 = vand.u32 2147483648, %v2071_v9 }
 0x719   :  { %v2009_v32 = vmul.f32 %v3423_v28, %v2007_v5  ;;  %3426 = vtanh.f32 %v2044_v19  ;;  %vm2014_vm14 = vweird.f32 %v3423_v28  ;;  %vm1974_vm3 = vmor %vm1972_vm15, %vm1973_vm13  ;;  %vm2077_vm8 = vweird.f32 %v2071_v9 }
 0x71a   :  { %v1969_v33 = vsub.f32 1.0, %v1968_v29  ;;  %vm2015_vm4 = vmor %vm2013_vm1, %vm2014_vm14  ;;  %v2081_v54 = vand.u32 2147483647, %v2071_v9  ;;  %v2084_v56 = vor.u32 1.1754944e-38, %v2083_v53 }
 0x71b   :  { %v2010_v34 = vsub.f32 1.0, %v2009_v32 }
 0x71c   :  { %v1970_v0 = vmul.f32 %v3421_v12, %v1969_v33  ;;  %vm2082_vm10 = vcmp.eq.f32.partialorder %v2081_v54, 8.507059e+37 }
 0x71d   :  { %v2011_v43 = vmul.f32 %v3423_v28, %v2010_v34 }
 0x71e   :  { %v3425_v45 = vpop.eup %3424  ;;  %v1971_v46 = vadd.f32 %v3421_v12, %v1970_v0  ;;  %v2182_v0 = vld [vmem:[#allocation5 + $0x4] sm:$0x3] }
 0x71f   :  { %v2012_v48 = vadd.f32 %v3423_v28, %v2011_v43  ;;  %v2073_v49 = vmul.f32 %v3425_v45, %v2071_v9  ;;  %v3427_v15 = vpop.eup %3426  ;;  %vm2078_vm7 = vweird.f32 %v3425_v45  ;;  %v2205_v9 = vld [vmem:[#allocation6 + $0x4] sm:$0x3] }
 0x720   :  { %v1975_v14 = vsel %vm1974_vm3, %v3421_v12, %v1971_v46  ;;  %vm2079_vm9 = vmor %vm2077_vm8, %vm2078_vm7 }
 0x721   :  { %v1980_v22 = vsel %vm1977_vm5, %v1979_v47, %v1975_v14  ;;  %v2016_v20 = vsel %vm2015_vm4, %v3423_v28, %v2012_v48  ;;  %v2074_v63 = vsub.f32 1.0, %v2073_v49 }
 0x722   :  { %v2021_v1 = vsel %vm2018_vm6, %v2020_v10, %v2016_v20  ;;  %v2089_v25 = vmul.f32 %v3427_v15, %v1980_v22 }
 0x723   :  { %v2088_v50 = vmul.f32 %v2087_v23, %v2021_v1  ;;  %v2075_v30 = vmul.f32 %v3425_v45, %v2074_v63 }
 0x725   :  { %v2090_v52 = vadd.f32 %v2089_v25, %v2088_v50  ;;  %v2076_v31 = vadd.f32 %v3425_v45, %v2075_v30 }
 0x727   :  { %3428 = vtanh.f32 %v2090_v52  ;;  %2093 = vst.msk [vmem:[#allocation8] sm:$0x3] %vm301_vm0, %v2090_v52  ;;  %v2080_v55 = vsel %vm2079_vm9, %v3425_v45, %v2076_v31 }
 0x728   :  { %v2085_v59 = vsel %vm2082_vm10, %v2084_v56, %v2080_v55 }
 0x72d   :  { %v3429_v58 = vpop.eup %3428 }
 0x72e   :  { %v2092_v60 = vmul.f32 %v3429_v58, %v2085_v59  ;;  %v2246_v59 = vld [vmem:[#allocation8] sm:$0x3] }
 0x730   :  { %2095 = vst.msk [vmem:[#allocation2 + $0x2] sm:$0x3] %vm301_vm0, %v2092_v60 }
 0x731   :  { %2094 = vst.msk [vmem:[#allocation7] sm:$0x3] %vm301_vm0, %v2092_v60 }
 0x738   :  { %v2096_v61 = vld [vmem:[#allocation7] sm:$0x3] }
 0x739   :  { %3202 = vmatmul.msk.f32.vlgmr.msra.gmra.mxu0 %vm180_vm2, %v2096_v61  ;;  %3204 = vmatmul.msk.f32.vlgmr.msrb.gmra.mxu1 %vm180_vm2, %v2096_v61 }
 0x73a   :  { %3206 = vmatmul.msk.f32.vlgmr.msra.gmra.mxu2 %vm180_vm2, %v2096_v61  ;;  %3207 = vmatmul.msk.f32.vlgmr.msra.gmra.mxu3 %vm180_vm2, %v2096_v61 }
 0x73b   :  { %2431 = vmatpush.msra.mxu0 %v4150_v35  ;;  %2472 = vmatpush.msrb.mxu1 %v4152_v36 }
 0x73c   :  { %2513 = vmatpush.msra.mxu2 %v4181_v16  ;;  %2536 = vmatpush.msra.mxu3 %v4162_v41 }
 0x73d   :  { %2432 = vmatpush.msra.mxu0 %v4154_v37  ;;  %2473 = vmatpush.msrb.mxu1 %v4160_v40 }
 0x73e   :  { %2514 = vmatpush.msra.mxu2 %v4185_v21  ;;  %2537 = vmatpush.msra.mxu3 %v4183_v18 }
 0x73f   :  { %2433 = vmatpush.msra.mxu0 %v4174_v11  ;;  %2474 = vmatpush.msrb.mxu1 %v4176_v13 }
 0x740   :  { %2515 = vmatpush.msra.mxu2 %v4198_v27  ;;  %2538 = vmatpush.msra.mxu3 %v4200_v24 }
 0x741   :  { %2434 = vmatpush.msra.mxu0 %v4191_v17  ;;  %2475 = vmatpush.msrb.mxu1 %v4193_v26 }
 0x742   :  { %2516 = vmatpush.msra.mxu2 %v4210_v57  ;;  %2539 = vmatpush.msra.mxu3 %v4202_v51 }
 0x7b6   :  { %v2118_v2 = vpop.f32.mrf.mxu0  ;;  %v2159_v4 = vpop.f32.mrf.mxu1 }
 0x7b7   :  { %v2121_v5 = vadd.f32 %v2118_v2, %v2097_v62  ;;  %v2162_v6 = vadd.f32 %v2159_v4, %v2141_v3 }
 0x7b9   :  { %v3203_v7 = vmul.f32 -1.442695, %v2121_v5  ;;  %v3205_v8 = vmul.f32 -1.442695, %v2162_v6 }
 0x7bb   :  { %3430 = vpow2.f32 %v3203_v7 }
 0x7bc   :  { %3432 = vpow2.f32 %v3205_v8 }
 0x7bd   :  { %v2223_v12 = vpop.f32.mrf.mxu3  ;;  %v2200_v38 = vpop.f32.mrf.mxu2 }
 0x7be   :  { %v2226_v19 = vadd.f32 %v2223_v12, %v2205_v9  ;;  %v2203_v44 = vadd.f32 %v2200_v38, %v2182_v0 }
 0x7c0   :  { %v3208_v28 = vmul.f32 -1.442695, %v2226_v19 }
 0x7c1   :  { %v3431_v29 = vpop.eup %3430 }
 0x7c2   :  { %v3433_v32 = vpop.eup %3432  ;;  %v2125_v33 = vadd.f32 1.0, %v3431_v29  ;;  %3434 = vpow2.f32 %v3208_v28 }
 0x7c3   :  { %v2166_v34 = vadd.f32 1.0, %v3433_v32 }
 0x7c4   :  { %3436 = vrcp.f32 %v2125_v33  ;;  %v2137_v10 = vand.u32 2147483648, %v2125_v33  ;;  %v2135_v22 = vand.u32 2147483647, %v2125_v33  ;;  %vm2131_vm13 = vweird.f32 %v2125_v33 }
 0x7c5   :  { %3438 = vrcp.f32 %v2166_v34  ;;  %v2178_v14 = vand.u32 2147483648, %v2166_v34  ;;  %v2176_v63 = vand.u32 2147483647, %v2166_v34  ;;  %vm2172_vm14 = vweird.f32 %v2166_v34 }
 0x7c6   :  { %v2138_v25 = vor.u32 1.1754944e-38, %v2137_v10  ;;  %vm2136_vm3 = vcmp.eq.f32.partialorder %v2135_v22, 8.507059e+37 }
 0x7c7   :  { %v2179_v52 = vor.u32 1.1754944e-38, %v2178_v14  ;;  %vm2177_vm4 = vcmp.eq.f32.partialorder %v2176_v63, 8.507059e+37 }
 0x7c8   :  { %v3435_v39 = vpop.eup %3434 }
 0x7c9   :  { %v2230_v42 = vadd.f32 1.0, %v3435_v39  ;;  %v2341_v39 = vld [vmem:[#allocation5 + $0x6] sm:$0x3] }
 0x7ca   :  { %v3437_v43 = vpop.eup %3436 }
 0x7cb   :  { %v3439_v45 = vpop.eup %3438  ;;  %v2127_v46 = vmul.f32 %v3437_v43, %v2125_v33  ;;  %3440 = vrcp.f32 %v2230_v42  ;;  %vm2132_vm11 = vweird.f32 %v3437_v43  ;;  %v2242_v4 = vand.u32 2147483648, %v2230_v42 }
 0x7cc   :  { %v2168_v47 = vmul.f32 %v3439_v45, %v2166_v34  ;;  %3442 = vtanh.f32 %v2203_v44  ;;  %vm2173_vm12 = vweird.f32 %v3439_v45  ;;  %vm2133_vm15 = vmor %vm2131_vm13, %vm2132_vm11  ;;  %vm2236_vm6 = vweird.f32 %v2230_v42 }
 0x7cd   :  { %v2128_v48 = vsub.f32 1.0, %v2127_v46  ;;  %vm2174_vm1 = vmor %vm2172_vm14, %vm2173_vm12  ;;  %v2240_v5 = vand.u32 2147483647, %v2230_v42  ;;  %v2243_v7 = vor.u32 1.1754944e-38, %v2242_v4 }
 0x7ce   :  { %v2169_v49 = vsub.f32 1.0, %v2168_v47 }
 0x7cf   :  { %v2129_v15 = vmul.f32 %v3437_v43, %v2128_v48  ;;  %vm2241_vm8 = vcmp.eq.f32.partialorder %v2240_v5, 8.507059e+37 }
 0x7d0   :  { %v2170_v20 = vmul.f32 %v3439_v45, %v2169_v49 }
 0x7d1   :  { %v3441_v1 = vpop.eup %3440  ;;  %v2130_v23 = vadd.f32 %v3437_v43, %v2129_v15 }
 0x7d2   :  { %v2171_v50 = vadd.f32 %v3439_v45, %v2170_v20  ;;  %v2232_v30 = vmul.f32 %v3441_v1, %v2230_v42  ;;  %v3443_v53 = vpop.eup %3442  ;;  %vm2237_vm5 = vweird.f32 %v3441_v1 }
 0x7d3   :  { %v2134_v31 = vsel %vm2133_vm15, %v3437_v43, %v2130_v23  ;;  %vm2238_vm7 = vmor %vm2236_vm6, %vm2237_vm5 }
 0x7d4   :  { %v2139_v54 = vsel %vm2136_vm3, %v2138_v25, %v2134_v31  ;;  %v2175_v55 = vsel %vm2174_vm1, %v3439_v45, %v2171_v50  ;;  %v2233_v56 = vsub.f32 1.0, %v2232_v30 }
 0x7d5   :  { %v2180_v58 = vsel %vm2177_vm4, %v2179_v52, %v2175_v55  ;;  %v2248_v60 = vmul.f32 %v3443_v53, %v2139_v54 }
 0x7d6   :  { %v2247_v61 = vmul.f32 %v2246_v59, %v2180_v58  ;;  %v2234_v62 = vmul.f32 %v3441_v1, %v2233_v56 }
 0x7d8   :  { %v2249_v2 = vadd.f32 %v2248_v60, %v2247_v61  ;;  %v2235_v3 = vadd.f32 %v3441_v1, %v2234_v62 }
 0x7da   :  { %3444 = vtanh.f32 %v2249_v2  ;;  %2252 = vst.msk [vmem:[#allocation8] sm:$0x3] %vm301_vm0, %v2249_v2  ;;  %v2239_v6 = vsel %vm2238_vm7, %v3441_v1, %v2235_v3 }
 0x7db   :  { %v2244_v9 = vsel %vm2241_vm8, %v2243_v7, %v2239_v6 }
 0x7e0   :  { %v3445_v8 = vpop.eup %3444 }
 0x7e1   :  { %v2251_v12 = vmul.f32 %v3445_v8, %v2244_v9  ;;  %v2405_v58 = vld [vmem:[#allocation8] sm:$0x3] }
 0x7e3   :  { %2254 = vst.msk [vmem:[#allocation2 + $0x4] sm:$0x3] %vm301_vm0, %v2251_v12 }
 0x7e4   :  { %2253 = vst.msk [vmem:[#allocation7] sm:$0x3] %vm301_vm0, %v2251_v12 }
 0x7eb   :  { %v2255_v19 = vld [vmem:[#allocation7] sm:$0x3] }
 0x7ec   :  { %3209 = vmatmul.msk.f32.vlgmr.msrb.gmra.mxu0 %vm180_vm2, %v2255_v19  ;;  %3211 = vmatmul.msk.f32.vlgmr.msra.gmra.mxu1 %vm180_vm2, %v2255_v19 }
 0x7ed   :  { %3213 = vmatmul.msk.f32.vlgmr.msrb.gmra.mxu2 %vm180_vm2, %v2255_v19  ;;  %3214 = vmatmul.msk.f32.vlgmr.msrb.gmra.mxu3 %vm180_vm2, %v2255_v19  ;;  %v4350_v19 = vld [vmem:[#allocation18 + $0x18] sm:$0xff] }
 0x7ee   :  { %2590 = vmatpush.msrb.mxu0 %v4150_v35  ;;  %2631 = vmatpush.msra.mxu1 %v4152_v36  ;;  %v2256_v35 = vld [vmem:[#allocation3 + $0x6] sm:$0x3] }
 0x7ef   :  { %2672 = vmatpush.msrb.mxu2 %v4181_v16  ;;  %2695 = vmatpush.msrb.mxu3 %v4162_v41 }
 0x7f0   :  { %2591 = vmatpush.msrb.mxu0 %v4154_v37  ;;  %2632 = vmatpush.msra.mxu1 %v4160_v40  ;;  %v2300_v37 = vld [vmem:[#allocation4 + $0x6] sm:$0x3] }
 0x7f1   :  { %2673 = vmatpush.msrb.mxu2 %v4185_v21  ;;  %2696 = vmatpush.msrb.mxu3 %v4183_v18  ;;  %v2364_v18 = vld [vmem:[#allocation6 + $0x6] sm:$0x3] }
 0x7f2   :  { %2592 = vmatpush.msrb.mxu0 %v4174_v11  ;;  %2633 = vmatpush.msra.mxu1 %v4176_v13 }
 0x7f3   :  { %2674 = vmatpush.msrb.mxu2 %v4198_v27  ;;  %2697 = vmatpush.msrb.mxu3 %v4200_v24 }
 0x7f4   :  { %2593 = vmatpush.msrb.mxu0 %v4191_v17  ;;  %2634 = vmatpush.msra.mxu1 %v4193_v26 }
 0x7f5   :  { %2675 = vmatpush.msrb.mxu2 %v4210_v57  ;;  %2698 = vmatpush.msrb.mxu3 %v4202_v51 }
 0x869   :  { %v2277_v36 = vpop.f32.mrf.mxu0  ;;  %v2318_v40 = vpop.f32.mrf.mxu1 }
 0x86a   :  { %v2280_v41 = vadd.f32 %v2277_v36, %v2256_v35  ;;  %v2321_v11 = vadd.f32 %v2318_v40, %v2300_v37  ;;  %v4353_v35 = vld [vmem:[#allocation18 + $0x38] sm:$0xff]  ;;  %v4362_v40 = vld [vmem:[#allocation18 + $0x10] sm:$0xff] }
 0x86b   :  { %v4356_v36 = vld [vmem:[#allocation18 + $0x58] sm:$0xff] }
 0x86c   :  { %v3210_v16 = vmul.f32 -1.442695, %v2280_v41  ;;  %v3212_v13 = vmul.f32 -1.442695, %v2321_v11  ;;  %v4359_v37 = vld [vmem:[#allocation18 + $0x78] sm:$0xff]  ;;  %v4365_v41 = vld [vmem:[#allocation18 + $0x30] sm:$0xff] }
 0x86d   :  { %v4368_v11 = vld [vmem:[#allocation18 + $0x50] sm:$0xff] }
 0x86e   :  { %3446 = vpow2.f32 %v3210_v16  ;;  %v4371_v16 = vld [vmem:[#allocation18 + $0x70] sm:$0xff] }
 0x86f   :  { %3448 = vpow2.f32 %v3212_v13  ;;  %v4374_v13 = vld [vmem:[#allocation18 + $0x8] sm:$0xff] }
 0x870   :  { %v2382_v21 = vpop.f32.mrf.mxu3  ;;  %v2359_v34 = vpop.f32.mrf.mxu2 }
 0x871   :  { %v2385_v28 = vadd.f32 %v2382_v21, %v2364_v18  ;;  %v2362_v43 = vadd.f32 %v2359_v34, %v2341_v39  ;;  %v4377_v18 = vld [vmem:[#allocation18 + $0x28] sm:$0xff]  ;;  %v4382_v21 = vld [vmem:[#allocation18] sm:$0xff] }
 0x873   :  { %v3215_v17 = vmul.f32 -1.442695, %v2385_v28  ;;  %v4385_v28 = vld [vmem:[#allocation18 + $0x20] sm:$0xff] }
 0x874   :  { %v3447_v29 = vpop.eup %3446 }
 0x875   :  { %v3449_v26 = vpop.eup %3448  ;;  %v2284_v32 = vadd.f32 1.0, %v3447_v29  ;;  %3450 = vpow2.f32 %v3215_v17  ;;  %v2415_v17 = vld [vmem:[#allocation3 + $0x8] sm:$0x3] }
 0x876   :  { %v2325_v33 = vadd.f32 1.0, %v3449_v26  ;;  %v2459_v26 = vld [vmem:[#allocation4 + $0x8] sm:$0x3] }
 0x877   :  { %3452 = vrcp.f32 %v2284_v32  ;;  %v2296_v49 = vand.u32 2147483648, %v2284_v32  ;;  %v2294_v15 = vand.u32 2147483647, %v2284_v32  ;;  %vm2290_vm11 = vweird.f32 %v2284_v32 }
 0x878   :  { %3454 = vrcp.f32 %v2325_v33  ;;  %v2337_v10 = vand.u32 2147483648, %v2325_v33  ;;  %v2335_v20 = vand.u32 2147483647, %v2325_v33  ;;  %vm2331_vm12 = vweird.f32 %v2325_v33 }
 0x879   :  { %v2297_v23 = vor.u32 1.1754944e-38, %v2296_v49  ;;  %vm2295_vm15 = vcmp.eq.f32.partialorder %v2294_v15, 8.507059e+37 }
 0x87a   :  { %v2338_v30 = vor.u32 1.1754944e-38, %v2337_v10  ;;  %vm2336_vm1 = vcmp.eq.f32.partialorder %v2335_v20, 8.507059e+37 }
 0x87b   :  { %v3451_v38 = vpop.eup %3450 }
 0x87c   :  { %v2389_v0 = vadd.f32 1.0, %v3451_v38  ;;  %v2523_v38 = vld [vmem:[#allocation6 + $0x8] sm:$0x3] }
 0x87d   :  { %v3453_v42 = vpop.eup %3452 }
 0x87e   :  { %v3455_v44 = vpop.eup %3454  ;;  %v2286_v45 = vmul.f32 %v3453_v42, %v2284_v32  ;;  %3456 = vrcp.f32 %v2389_v0  ;;  %vm2291_vm9 = vweird.f32 %v3453_v42  ;;  %v2401_v3 = vand.u32 2147483648, %v2389_v0 }
 0x87f   :  { %v2327_v46 = vmul.f32 %v3455_v44, %v2325_v33  ;;  %3458 = vtanh.f32 %v2362_v43  ;;  %vm2332_vm10 = vweird.f32 %v3455_v44  ;;  %vm2292_vm13 = vmor %vm2290_vm11, %vm2291_vm9  ;;  %vm2395_vm4 = vweird.f32 %v2389_v0 }
 0x880   :  { %v2287_v47 = vsub.f32 1.0, %v2286_v45  ;;  %vm2333_vm14 = vmor %vm2331_vm12, %vm2332_vm10  ;;  %v2399_v4 = vand.u32 2147483647, %v2389_v0  ;;  %v2402_v6 = vor.u32 1.1754944e-38, %v2401_v3 }
 0x881   :  { %v2328_v48 = vsub.f32 1.0, %v2327_v46 }
 0x882   :  { %v2288_v14 = vmul.f32 %v3453_v42, %v2287_v47  ;;  %vm2400_vm6 = vcmp.eq.f32.partialorder %v2399_v4, 8.507059e+37  ;;  %v2500_v47 = vld [vmem:[#allocation5 + $0x8] sm:$0x3] }
 0x883   :  { %v2329_v22 = vmul.f32 %v3455_v44, %v2328_v48 }
 0x884   :  { %v3457_v63 = vpop.eup %3456  ;;  %v2289_v1 = vadd.f32 %v3453_v42, %v2288_v14 }
 0x885   :  { %v2330_v25 = vadd.f32 %v3455_v44, %v2329_v22  ;;  %v2391_v50 = vmul.f32 %v3457_v63, %v2389_v0  ;;  %v3459_v31 = vpop.eup %3458  ;;  %vm2396_vm3 = vweird.f32 %v3457_v63 }
 0x886   :  { %v2293_v52 = vsel %vm2292_vm13, %v3453_v42, %v2289_v1  ;;  %vm2397_vm5 = vmor %vm2395_vm4, %vm2396_vm3 }
 0x887   :  { %v2298_v53 = vsel %vm2295_vm15, %v2297_v23, %v2293_v52  ;;  %v2334_v54 = vsel %vm2333_vm14, %v3455_v44, %v2330_v25  ;;  %v2392_v55 = vsub.f32 1.0, %v2391_v50 }
 0x888   :  { %v2339_v56 = vsel %vm2336_vm1, %v2338_v30, %v2334_v54  ;;  %v2407_v59 = vmul.f32 %v3459_v31, %v2298_v53 }
 0x889   :  { %v2406_v60 = vmul.f32 %v2405_v58, %v2339_v56  ;;  %v2393_v61 = vmul.f32 %v3457_v63, %v2392_v55 }
 0x88b   :  { %v2408_v62 = vadd.f32 %v2407_v59, %v2406_v60  ;;  %v2394_v2 = vadd.f32 %v3457_v63, %v2393_v61 }
 0x88d   :  { %3460 = vtanh.f32 %v2408_v62  ;;  %2411 = vst.msk [vmem:[#allocation8] sm:$0x3] %vm301_vm0, %v2408_v62  ;;  %v2398_v5 = vsel %vm2397_vm5, %v3457_v63, %v2394_v2 }
 0x88e   :  { %v2403_v8 = vsel %vm2400_vm6, %v2402_v6, %v2398_v5 }
 0x893   :  { %v3461_v7 = vpop.eup %3460 }
 0x894   :  { %v2410_v9 = vmul.f32 %v3461_v7, %v2403_v8  ;;  %v2564_v4 = vld [vmem:[#allocation8] sm:$0x3] }
 0x896   :  { %2413 = vst.msk [vmem:[#allocation2 + $0x6] sm:$0x3] %vm301_vm0, %v2410_v9 }
 0x897   :  { %2412 = vst.msk [vmem:[#allocation7] sm:$0x3] %vm301_vm0, %v2410_v9 }
 0x89e   :  { %v2414_v12 = vld [vmem:[#allocation7] sm:$0x3] }
 0x89f   :  { %3216 = vmatmul.msk.f32.vlgmr.msra.gmra.mxu0 %vm180_vm2, %v2414_v12  ;;  %3218 = vmatmul.msk.f32.vlgmr.msrb.gmra.mxu1 %vm180_vm2, %v2414_v12 }
 0x8a0   :  { %3220 = vmatmul.msk.f32.vlgmr.msra.gmra.mxu2 %vm180_vm2, %v2414_v12  ;;  %3221 = vmatmul.msk.f32.vlgmr.msra.gmra.mxu3 %vm180_vm2, %v2414_v12 }
 0x8a1   :  { %2749 = vmatpush.msra.mxu0 %v4350_v19  ;;  %2790 = vmatpush.msrb.mxu1 %v4353_v35 }
 0x8a2   :  { %2831 = vmatpush.msra.mxu2 %v4356_v36  ;;  %2854 = vmatpush.msra.mxu3 %v4359_v37 }
 0x8a3   :  { %2750 = vmatpush.msra.mxu0 %v4362_v40  ;;  %2791 = vmatpush.msrb.mxu1 %v4365_v41 }
 0x8a4   :  { %2832 = vmatpush.msra.mxu2 %v4368_v11  ;;  %2855 = vmatpush.msra.mxu3 %v4371_v16 }
 0x8a5   :  { %2751 = vmatpush.msra.mxu0 %v4374_v13  ;;  %2792 = vmatpush.msrb.mxu1 %v4377_v18 }
 0x8a6   :  { %2833 = vmatpush.msra.mxu2 %v4198_v27  ;;  %2856 = vmatpush.msra.mxu3 %v4200_v24 }
 0x8a7   :  { %2752 = vmatpush.msra.mxu0 %v4382_v21  ;;  %2793 = vmatpush.msrb.mxu1 %v4385_v28 }
 0x8a8   :  { %2834 = vmatpush.msra.mxu2 %v4210_v57  ;;  %2857 = vmatpush.msra.mxu3 %v4202_v51 }
 0x91c   :  { %v2436_v29 = vpop.f32.mrf.mxu0  ;;  %v2477_v32 = vpop.f32.mrf.mxu1 }
 0x91d   :  { %v2439_v33 = vadd.f32 %v2436_v29, %v2415_v17  ;;  %v2480_v27 = vadd.f32 %v2477_v32, %v2459_v26 }
 0x91f   :  { %v3217_v34 = vmul.f32 -1.442695, %v2439_v33  ;;  %v3219_v24 = vmul.f32 -1.442695, %v2480_v27 }
 0x921   :  { %3462 = vpow2.f32 %v3217_v34 }
 0x922   :  { %3464 = vpow2.f32 %v3219_v24  ;;  %v3554_v24 = vld [vmem:[#allocation18 + $0x48] sm:$0xff] }
 0x923   :  { %v2541_v39 = vpop.f32.mrf.mxu3  ;;  %v2518_v51 = vpop.f32.mrf.mxu2 }
 0x924   :  { %v2544_v0 = vadd.f32 %v2541_v39, %v2523_v38  ;;  %v2521_v10 = vadd.f32 %v2518_v51, %v2500_v47  ;;  %v2682_v39 = vld [vmem:[#allocation6 + $0xa] sm:$0x3] }
 0x926   :  { %v3222_v42 = vmul.f32 -1.442695, %v2544_v0 }
 0x927   :  { %v3463_v43 = vpop.eup %3462 }
 0x928   :  { %v3465_v44 = vpop.eup %3464  ;;  %v2443_v45 = vadd.f32 1.0, %v3463_v43  ;;  %3466 = vpow2.f32 %v3222_v42 }
 0x929   :  { %v2484_v57 = vadd.f32 1.0, %v3465_v44 }
 0x92a   :  { %3468 = vrcp.f32 %v2443_v45  ;;  %v2455_v1 = vand.u32 2147483648, %v2443_v45  ;;  %v2453_v50 = vand.u32 2147483647, %v2443_v45  ;;  %vm2449_vm9 = vweird.f32 %v2443_v45 }
 0x92b   :  { %3470 = vrcp.f32 %v2484_v57  ;;  %v2496_v23 = vand.u32 2147483648, %v2484_v57  ;;  %v2494_v52 = vand.u32 2147483647, %v2484_v57  ;;  %vm2490_vm10 = vweird.f32 %v2484_v57 }
 0x92c   :  { %v2456_v54 = vor.u32 1.1754944e-38, %v2455_v1  ;;  %vm2454_vm13 = vcmp.eq.f32.partialorder %v2453_v50, 8.507059e+37 }
 0x92d   :  { %v2497_v58 = vor.u32 1.1754944e-38, %v2496_v23  ;;  %vm2495_vm14 = vcmp.eq.f32.partialorder %v2494_v52, 8.507059e+37 }
 0x92e   :  { %v3467_v46 = vpop.eup %3466 }
 0x92f   :  { %v2548_v48 = vadd.f32 1.0, %v3467_v46  ;;  %v2659_v46 = vld [vmem:[#allocation5 + $0xa] sm:$0x3] }
 0x930   :  { %v3469_v49 = vpop.eup %3468 }
 0x931   :  { %v3471_v14 = vpop.eup %3470  ;;  %v2445_v15 = vmul.f32 %v3469_v49, %v2443_v45  ;;  %3472 = vrcp.f32 %v2548_v48  ;;  %vm2450_vm7 = vweird.f32 %v3469_v49  ;;  %v2560_v12 = vand.u32 2147483648, %v2548_v48 }
 0x932   :  { %v2486_v22 = vmul.f32 %v3471_v14, %v2484_v57  ;;  %3474 = vtanh.f32 %v2521_v10  ;;  %vm2491_vm8 = vweird.f32 %v3471_v14  ;;  %vm2451_vm11 = vmor %vm2449_vm9, %vm2450_vm7  ;;  %vm2554_vm1 = vweird.f32 %v2548_v48 }
 0x933   :  { %v2446_v20 = vsub.f32 1.0, %v2445_v15  ;;  %vm2492_vm12 = vmor %vm2490_vm10, %vm2491_vm8  ;;  %v2558_v17 = vand.u32 2147483647, %v2548_v48  ;;  %v2561_v26 = vor.u32 1.1754944e-38, %v2560_v12 }
 0x934   :  { %v2487_v63 = vsub.f32 1.0, %v2486_v22 }
 0x935   :  { %v2447_v25 = vmul.f32 %v3469_v49, %v2446_v20  ;;  %vm2559_vm4 = vcmp.eq.f32.partialorder %v2558_v17, 8.507059e+37 }
 0x936   :  { %v2488_v30 = vmul.f32 %v3471_v14, %v2487_v63 }
 0x937   :  { %v3473_v31 = vpop.eup %3472  ;;  %v2448_v53 = vadd.f32 %v3469_v49, %v2447_v25 }
 0x938   :  { %v2489_v55 = vadd.f32 %v3471_v14, %v2488_v30  ;;  %v2550_v56 = vmul.f32 %v3473_v31, %v2548_v48  ;;  %v3475_v60 = vpop.eup %3474  ;;  %vm2555_vm15 = vweird.f32 %v3473_v31 }
 0x939   :  { %v2452_v59 = vsel %vm2451_vm11, %v3469_v49, %v2448_v53  ;;  %vm2556_vm3 = vmor %vm2554_vm1, %vm2555_vm15 }
 0x93a   :  { %v2457_v61 = vsel %vm2454_vm13, %v2456_v54, %v2452_v59  ;;  %v2493_v62 = vsel %vm2492_vm12, %v3471_v14, %v2489_v55  ;;  %v2551_v2 = vsub.f32 1.0, %v2550_v56 }
 0x93b   :  { %v2498_v3 = vsel %vm2495_vm14, %v2497_v58, %v2493_v62  ;;  %v2566_v5 = vmul.f32 %v3475_v60, %v2457_v61 }
 0x93c   :  { %v2565_v6 = vmul.f32 %v2564_v4, %v2498_v3  ;;  %v2552_v7 = vmul.f32 %v3473_v31, %v2551_v2 }
 0x93e   :  { %v2567_v8 = vadd.f32 %v2566_v5, %v2565_v6  ;;  %v2553_v9 = vadd.f32 %v3473_v31, %v2552_v7 }
 0x940   :  { %3476 = vtanh.f32 %v2567_v8  ;;  %2570 = vst.msk [vmem:[#allocation8] sm:$0x3] %vm301_vm0, %v2567_v8  ;;  %v2557_v29 = vsel %vm2556_vm3, %v3473_v31, %v2553_v9 }
 0x941   :  { %v2562_v33 = vsel %vm2559_vm4, %v2561_v26, %v2557_v29 }
 0x946   :  { %v3477_v32 = vpop.eup %3476 }
 0x947   :  { %v2569_v27 = vmul.f32 %v3477_v32, %v2562_v33  ;;  %v2723_v3 = vld [vmem:[#allocation8] sm:$0x3] }
 0x949   :  { %2572 = vst.msk [vmem:[#allocation2 + $0x8] sm:$0x3] %vm301_vm0, %v2569_v27 }
 0x94a   :  { %2571 = vst.msk [vmem:[#allocation7] sm:$0x3] %vm301_vm0, %v2569_v27 }
 0x951   :  { %v2573_v34 = vld [vmem:[#allocation7] sm:$0x3] }
 0x952   :  { %3223 = vmatmul.msk.f32.vlgmr.msrb.gmra.mxu0 %vm180_vm2, %v2573_v34  ;;  %3225 = vmatmul.msk.f32.vlgmr.msra.gmra.mxu1 %vm180_vm2, %v2573_v34 }
 0x953   :  { %3227 = vmatmul.msk.f32.vlgmr.msrb.gmra.mxu2 %vm180_vm2, %v2573_v34  ;;  %3228 = vmatmul.msk.f32.vlgmr.msrb.gmra.mxu3 %vm180_vm2, %v2573_v34  ;;  %v2733_v34 = vld [vmem:[#allocation3 + $0xc] sm:$0x3] }
 0x954   :  { %2908 = vmatpush.msrb.mxu0 %v4350_v19  ;;  %2949 = vmatpush.msra.mxu1 %v4353_v35  ;;  %v3555_v19 = vld [vmem:[#allocation18 + $0x68] sm:$0xff]  ;;  %v3556_v35 = vld [vmem:[#allocation18 + $0x40] sm:$0xff] }
 0x955   :  { %2990 = vmatpush.msrb.mxu2 %v4356_v36  ;;  %3013 = vmatpush.msrb.mxu3 %v4359_v37  ;;  %v3557_v36 = vld [vmem:[#allocation18 + $0x60] sm:$0xff]  ;;  %v2574_v37 = vld [vmem:[#allocation3 + $0xa] sm:$0x3] }
 0x956   :  { %2909 = vmatpush.msrb.mxu0 %v4362_v40  ;;  %2950 = vmatpush.msra.mxu1 %v4365_v41  ;;  %v2618_v41 = vld [vmem:[#allocation4 + $0xa] sm:$0x3] }
 0x957   :  { %2991 = vmatpush.msrb.mxu2 %v4368_v11  ;;  %3014 = vmatpush.msrb.mxu3 %v4371_v16 }
 0x958   :  { %2910 = vmatpush.msrb.mxu0 %v4374_v13  ;;  %2951 = vmatpush.msra.mxu1 %v4377_v18 }
 0x959   :  { %2992 = vmatpush.msrb.mxu2 %v3554_v24  ;;  %3015 = vmatpush.msrb.mxu3 %v3555_v19  ;;  %v2777_v19 = vld [vmem:[#allocation4 + $0xc] sm:$0x3] }
 0x95a   :  { %2911 = vmatpush.msrb.mxu0 %v4382_v21  ;;  %2952 = vmatpush.msra.mxu1 %v4385_v28 }
 0x95b   :  { %2993 = vmatpush.msrb.mxu2 %v3556_v35  ;;  %3016 = vmatpush.msrb.mxu3 %v3557_v36 }
 0x9cf   :  { %v2595_v40 = vpop.f32.mrf.mxu0  ;;  %v2636_v11 = vpop.f32.mrf.mxu1 }
 0x9d0   :  { %v2598_v16 = vadd.f32 %v2595_v40, %v2574_v37  ;;  %v2639_v13 = vadd.f32 %v2636_v11, %v2618_v41  ;;  %v2841_v11 = vld [vmem:[#allocation6 + $0xc] sm:$0x3] }
 0x9d2   :  { %v3224_v38 = vmul.f32 -1.442695, %v2598_v16  ;;  %v3226_v18 = vmul.f32 -1.442695, %v2639_v13 }
 0x9d4   :  { %3478 = vpow2.f32 %v3224_v38 }
 0x9d5   :  { %3480 = vpow2.f32 %v3226_v18 }
 0x9d6   :  { %v2700_v0 = vpop.f32.mrf.mxu3  ;;  %v2677_v57 = vpop.f32.mrf.mxu2 }
 0x9d7   :  { %v2703_v42 = vadd.f32 %v2700_v0, %v2682_v39  ;;  %v2680_v49 = vadd.f32 %v2677_v57, %v2659_v46 }
 0x9d9   :  { %v3229_v21 = vmul.f32 -1.442695, %v2703_v42 }
 0x9da   :  { %v3479_v43 = vpop.eup %3478 }
 0x9db   :  { %v3481_v28 = vpop.eup %3480  ;;  %v2602_v44 = vadd.f32 1.0, %v3479_v43  ;;  %3482 = vpow2.f32 %v3229_v21 }
 0x9dc   :  { %v2643_v45 = vadd.f32 1.0, %v3481_v28  ;;  %v2818_v28 = vld [vmem:[#allocation5 + $0xc] sm:$0x3] }
 0x9dd   :  { %3484 = vrcp.f32 %v2602_v44  ;;  %v2614_v63 = vand.u32 2147483648, %v2602_v44  ;;  %v2612_v25 = vand.u32 2147483647, %v2602_v44  ;;  %vm2608_vm7 = vweird.f32 %v2602_v44 }
 0x9de   :  { %3486 = vrcp.f32 %v2643_v45  ;;  %v2655_v1 = vand.u32 2147483648, %v2643_v45  ;;  %v2653_v30 = vand.u32 2147483647, %v2643_v45  ;;  %vm2649_vm8 = vweird.f32 %v2643_v45 }
 0x9df   :  { %v2615_v53 = vor.u32 1.1754944e-38, %v2614_v63  ;;  %vm2613_vm11 = vcmp.eq.f32.partialorder %v2612_v25, 8.507059e+37 }
 0x9e0   :  { %v2656_v56 = vor.u32 1.1754944e-38, %v2655_v1  ;;  %vm2654_vm12 = vcmp.eq.f32.partialorder %v2653_v30, 8.507059e+37  ;;  %v3053_v1 = vld [vmem:[#allocation20 + $0x8] sm:$0xff] }
 0x9e1   :  { %v3483_v51 = vpop.eup %3482 }
 0x9e2   :  { %v2707_v47 = vadd.f32 1.0, %v3483_v51 }
 0x9e3   :  { %v3485_v48 = vpop.eup %3484 }
 0x9e4   :  { %v3487_v10 = vpop.eup %3486  ;;  %v2604_v14 = vmul.f32 %v3485_v48, %v2602_v44  ;;  %3488 = vrcp.f32 %v2707_v47  ;;  %vm2609_vm5 = vweird.f32 %v3485_v48  ;;  %v2719_v9 = vand.u32 2147483648, %v2707_v47 }
 0x9e5   :  { %v2645_v15 = vmul.f32 %v3487_v10, %v2643_v45  ;;  %3490 = vtanh.f32 %v2680_v49  ;;  %vm2650_vm6 = vweird.f32 %v3487_v10  ;;  %vm2610_vm9 = vmor %vm2608_vm7, %vm2609_vm5  ;;  %vm2713_vm14 = vweird.f32 %v2707_v47  ;;  %v3055_v49 = vld [vmem:[#allocation20 + $0x18] sm:$0xff] }
 0x9e6   :  { %v2605_v22 = vsub.f32 1.0, %v2604_v14  ;;  %vm2651_vm10 = vmor %vm2649_vm8, %vm2650_vm6  ;;  %v2717_v12 = vand.u32 2147483647, %v2707_v47  ;;  %v2720_v29 = vor.u32 1.1754944e-38, %v2719_v9 }
 0x9e7   :  { %v2646_v20 = vsub.f32 1.0, %v2645_v15 }
 0x9e8   :  { %v2606_v23 = vmul.f32 %v3485_v48, %v2605_v22  ;;  %vm2718_vm1 = vcmp.eq.f32.partialorder %v2717_v12, 8.507059e+37 }
 0x9e9   :  { %v2647_v50 = vmul.f32 %v3487_v10, %v2646_v20 }
 0x9ea   :  { %v3489_v52 = vpop.eup %3488  ;;  %v2607_v31 = vadd.f32 %v3485_v48, %v2606_v23 }
 0x9eb   :  { %v2648_v54 = vadd.f32 %v3487_v10, %v2647_v50  ;;  %v2709_v55 = vmul.f32 %v3489_v52, %v2707_v47  ;;  %v3491_v59 = vpop.eup %3490  ;;  %vm2714_vm13 = vweird.f32 %v3489_v52 }
 0x9ec   :  { %v2611_v58 = vsel %vm2610_vm9, %v3485_v48, %v2607_v31  ;;  %vm2715_vm15 = vmor %vm2713_vm14, %vm2714_vm13 }
 0x9ed   :  { %v2616_v60 = vsel %vm2613_vm11, %v2615_v53, %v2611_v58  ;;  %v2652_v61 = vsel %vm2651_vm10, %v3487_v10, %v2648_v54  ;;  %v2710_v62 = vsub.f32 1.0, %v2709_v55  ;;  %v3054_v10 = vld [vmem:[#allocation20 + $0x10] sm:$0xff] }
 0x9ee   :  { %v2657_v2 = vsel %vm2654_vm12, %v2656_v56, %v2652_v61  ;;  %v2725_v4 = vmul.f32 %v3491_v59, %v2616_v60 }
 0x9ef   :  { %v2724_v5 = vmul.f32 %v2723_v3, %v2657_v2  ;;  %v2711_v6 = vmul.f32 %v3489_v52, %v2710_v62 }
 0x9f1   :  { %v2726_v7 = vadd.f32 %v2725_v4, %v2724_v5  ;;  %v2712_v8 = vadd.f32 %v3489_v52, %v2711_v6 }
 0x9f3   :  { %3492 = vtanh.f32 %v2726_v7  ;;  %2729 = vst.msk [vmem:[#allocation8] sm:$0x3] %vm301_vm0, %v2726_v7  ;;  %v2716_v17 = vsel %vm2715_vm15, %v3489_v52, %v2712_v8  ;;  %v3052_v52 = vld [vmem:[#allocation20] sm:$0xff] }
 0x9f4   :  { %v2721_v32 = vsel %vm2718_vm1, %v2720_v29, %v2716_v17 }
 0x9f9   :  { %v3493_v26 = vpop.eup %3492 }
 0x9fa   :  { %v2728_v33 = vmul.f32 %v3493_v26, %v2721_v32  ;;  %v2882_v2 = vld [vmem:[#allocation8] sm:$0x3] }
 0x9fc   :  { %2731 = vst.msk [vmem:[#allocation2 + $0xa] sm:$0x3] %vm301_vm0, %v2728_v33 }
 0x9fd   :  { %2730 = vst.msk [vmem:[#allocation7] sm:$0x3] %vm301_vm0, %v2728_v33 }
 0xa04   :  { %v2732_v27 = vld [vmem:[#allocation7] sm:$0x3] }
 0xa05   :  { %3230 = vmatmul.msk.f32.vlgmr.msra.gmra.mxu0 %vm180_vm2, %v2732_v27  ;;  %3232 = vmatmul.msk.f32.vlgmr.msrb.gmra.mxu1 %vm180_vm2, %v2732_v27 }
 0xa06   :  { %3234 = vmatmul.msk.f32.vlgmr.msra.gmra.mxu2 %vm180_vm2, %v2732_v27  ;;  %3235 = vmatmul.msk.f32.vlgmr.msra.gmra.mxu3 %vm180_vm2, %v2732_v27  ;;  %v3050_v27 = vld [vmem:[#allocation2] sm:$0xff] }
 0xa07   :  { %3078 = vmatpush.msra.mxu0 %v3055_v49 }
 0xa09   :  { %3079 = vmatpush.msra.mxu0 %v3054_v10 }
 0xa0b   :  { %3080 = vmatpush.msra.mxu0 %v3053_v1 }
 0xa0d   :  { %3081 = vmatpush.msra.mxu0 %v3052_v52 }
 0xa82   :  { %v2754_v24 = vpop.f32.mrf.mxu0  ;;  %v2795_v35 = vpop.f32.mrf.mxu1 }
 0xa83   :  { %v2757_v36 = vadd.f32 %v2754_v24, %v2733_v34  ;;  %v2798_v37 = vadd.f32 %v2795_v35, %v2777_v19  ;;  %v2892_v34 = vld [vmem:[#allocation3 + $0xe] sm:$0x3]  ;;  %v2936_v19 = vld [vmem:[#allocation4 + $0xe] sm:$0x3] }
 0xa85   :  { %v3231_v40 = vmul.f32 -1.442695, %v2757_v36  ;;  %v3233_v41 = vmul.f32 -1.442695, %v2798_v37 }
 0xa87   :  { %3494 = vpow2.f32 %v3231_v40 }
 0xa88   :  { %3496 = vpow2.f32 %v3233_v41 }
 0xa89   :  { %v2859_v16 = vpop.f32.mrf.mxu3  ;;  %v2836_v21 = vpop.f32.mrf.mxu2 }
 0xa8a   :  { %v2862_v13 = vadd.f32 %v2859_v16, %v2841_v11  ;;  %v2839_v57 = vadd.f32 %v2836_v21, %v2818_v28  ;;  %v4427_v11 = vld [vmem:[%s4449_s8] ss:$0 sm:$0xff]  ;;  %v3000_v16 = vld [vmem:[#allocation6 + $0xe] sm:$0x3]  ;;  %s3772_s8 = smov [#allocation21]  }
 0xa8b   :  { %s3095_s29 = sshll.u32 %s3772_s8, 4  ;;  %s3096_s29 = int_to_ptr.vmem [resolvable:$true] %s3095_s29 }
 0xa8c   :  { %v3236_v38 = vmul.f32 -1.442695, %v2862_v13 }
 0xa8d   :  { %v3495_v18 = vpop.eup %3494 }
 0xa8e   :  { %v3497_v39 = vpop.eup %3496  ;;  %v2761_v0 = vadd.f32 1.0, %v3495_v18  ;;  %3498 = vpow2.f32 %v3236_v38 }
 0xa8f   :  { %v2802_v42 = vadd.f32 1.0, %v3497_v39 }
 0xa90   :  { %3500 = vrcp.f32 %v2761_v0  ;;  %v2773_v15 = vand.u32 2147483648, %v2761_v0  ;;  %v2771_v63 = vand.u32 2147483647, %v2761_v0  ;;  %vm2767_vm5 = vweird.f32 %v2761_v0 }
 0xa91   :  { %3502 = vrcp.f32 %v2802_v42  ;;  %v2814_v22 = vand.u32 2147483648, %v2802_v42  ;;  %v2812_v25 = vand.u32 2147483647, %v2802_v42  ;;  %vm2808_vm6 = vweird.f32 %v2802_v42 }
 0xa92   :  { %v2774_v31 = vor.u32 1.1754944e-38, %v2773_v15  ;;  %vm2772_vm9 = vcmp.eq.f32.partialorder %v2771_v63, 8.507059e+37 }
 0xa93   :  { %v2815_v55 = vor.u32 1.1754944e-38, %v2814_v22  ;;  %vm2813_vm10 = vcmp.eq.f32.partialorder %v2812_v25, 8.507059e+37 }
 0xa94   :  { %v3499_v43 = vpop.eup %3498 }
 0xa95   :  { %v2866_v44 = vadd.f32 1.0, %v3499_v43 }
 0xa96   :  { %v3501_v45 = vpop.eup %3500 }
 0xa97   :  { %v3503_v51 = vpop.eup %3502  ;;  %v2763_v46 = vmul.f32 %v3501_v45, %v2761_v0  ;;  %3504 = vrcp.f32 %v2866_v44  ;;  %vm2768_vm3 = vweird.f32 %v3501_v45  ;;  %v2878_v8 = vand.u32 2147483648, %v2866_v44 }
 0xa98   :  { %v2804_v47 = vmul.f32 %v3503_v51, %v2802_v42  ;;  %3506 = vtanh.f32 %v2839_v57  ;;  %vm2809_vm4 = vweird.f32 %v3503_v51  ;;  %vm2769_vm7 = vmor %vm2767_vm5, %vm2768_vm3  ;;  %vm2872_vm12 = vweird.f32 %v2866_v44  ;;  %v2977_v57 = vld [vmem:[#allocation5 + $0xe] sm:$0x3] }
 0xa99   :  { %v2764_v48 = vsub.f32 1.0, %v2763_v46  ;;  %vm2810_vm8 = vmor %vm2808_vm6, %vm2809_vm4  ;;  %v2876_v9 = vand.u32 2147483647, %v2866_v44  ;;  %v2879_v17 = vor.u32 1.1754944e-38, %v2878_v8 }
 0xa9a   :  { %v2805_v14 = vsub.f32 1.0, %v2804_v47 }
 0xa9b   :  { %v2765_v20 = vmul.f32 %v3501_v45, %v2764_v48  ;;  %vm2877_vm14 = vcmp.eq.f32.partialorder %v2876_v9, 8.507059e+37 }
 0xa9c   :  { %v2806_v23 = vmul.f32 %v3503_v51, %v2805_v14 }
 0xa9d   :  { %v3505_v50 = vpop.eup %3504  ;;  %v2766_v30 = vadd.f32 %v3501_v45, %v2765_v20 }
 0xa9e   :  { %v2807_v53 = vadd.f32 %v3503_v51, %v2806_v23  ;;  %v2868_v54 = vmul.f32 %v3505_v50, %v2866_v44  ;;  %v3507_v58 = vpop.eup %3506  ;;  %vm2873_vm11 = vweird.f32 %v3505_v50 }
 0xa9f   :  { %v2770_v56 = vsel %vm2769_vm7, %v3501_v45, %v2766_v30  ;;  %vm2874_vm13 = vmor %vm2872_vm12, %vm2873_vm11 }
 0xaa0   :  { %v2775_v59 = vsel %vm2772_vm9, %v2774_v31, %v2770_v56  ;;  %v2811_v60 = vsel %vm2810_vm8, %v3503_v51, %v2807_v53  ;;  %v2869_v61 = vsub.f32 1.0, %v2868_v54 }
 0xaa1   :  { %v2816_v62 = vsel %vm2813_vm10, %v2815_v55, %v2811_v60  ;;  %v2884_v3 = vmul.f32 %v3507_v58, %v2775_v59 }
 0xaa2   :  { %v2883_v4 = vmul.f32 %v2882_v2, %v2816_v62  ;;  %v2870_v5 = vmul.f32 %v3505_v50, %v2869_v61 }
 0xaa4   :  { %v2885_v6 = vadd.f32 %v2884_v3, %v2883_v4  ;;  %v2871_v7 = vadd.f32 %v3505_v50, %v2870_v5 }
 0xaa6   :  { %3508 = vtanh.f32 %v2885_v6  ;;  %2888 = vst.msk [vmem:[#allocation8] sm:$0x3] %vm301_vm0, %v2885_v6  ;;  %v2875_v12 = vsel %vm2874_vm13, %v3505_v50, %v2871_v7 }
 0xaa7   :  { %v2880_v26 = vsel %vm2877_vm14, %v2879_v17, %v2875_v12 }
 0xaac   :  { %v3509_v29 = vpop.eup %3508 }
 0xaad   :  { %v2887_v32 = vmul.f32 %v3509_v29, %v2880_v26  ;;  %v3041_v62 = vld [vmem:[#allocation8] sm:$0x3] }
 0xaaf   :  { %2890 = vst.msk [vmem:[#allocation2 + $0xc] sm:$0x3] %vm301_vm0, %v2887_v32 }
 0xab0   :  { %2889 = vst.msk [vmem:[#allocation7] sm:$0x3] %vm301_vm0, %v2887_v32 }
 0xab7   :  { %v2891_v33 = vld [vmem:[#allocation7] sm:$0x3] }
 0xab8   :  { %3237 = vmatmul.msk.f32.vlgmr.msrb.gmra.mxu0 %vm180_vm2, %v2891_v33  ;;  %3239 = vmatmul.msk.f32.vlgmr.msra.gmra.mxu1 %vm180_vm2, %v2891_v33 }
 0xab9   :  { %3241 = vmatmul.msk.f32.vlgmr.msrb.gmra.mxu2 %vm180_vm2, %v2891_v33  ;;  %3242 = vmatmul.msk.f32.vlgmr.msrb.gmra.mxu3 %vm180_vm2, %v2891_v33 }
 0xac0   :  { %3244 = vmatmul.msk.f32.vlgmr.msra.gmra.mxu0 %vm180_vm2, %v3050_v27 }
 0xb35   :  { %v2913_v24 = vpop.f32.mrf.mxu0  ;;  %v2954_v35 = vpop.f32.mrf.mxu1 }
 0xb36   :  { %v2916_v36 = vadd.f32 %v2913_v24, %v2892_v34  ;;  %v2957_v37 = vadd.f32 %v2954_v35, %v2936_v19 }
 0xb38   :  { %v3238_v40 = vmul.f32 -1.442695, %v2916_v36  ;;  %v3240_v41 = vmul.f32 -1.442695, %v2957_v37 }
 0xb3a   :  { %3510 = vpow2.f32 %v3238_v40 }
 0xb3b   :  { %3512 = vpow2.f32 %v3240_v41 }
 0xb3c   :  { %v3018_v13 = vpop.f32.mrf.mxu3  ;;  %v2995_v44 = vpop.f32.mrf.mxu2 }
 0xb3d   :  { %v3021_v38 = vadd.f32 %v3018_v13, %v3000_v16  ;;  %v3083_v18 = vpop.f32.mrf.mxu0  ;;  %v2998_v47 = vadd.f32 %v2995_v44, %v2977_v57 }
 0xb3e   :  { %v3084_v39 = vadd.f32 %v4427_v11, %v3083_v18 }
 0xb3f   :  { %v3243_v0 = vmul.f32 -1.442695, %v3021_v38 }
 0xb40   :  { %v3511_v42 = vpop.eup %3510  ;;  %3089 = vst [vmem:[#allocation21] sm:$0xff] %v3084_v39 }
 0xb41   :  { %v3513_v21 = vpop.eup %3512  ;;  %v2920_v43 = vadd.f32 1.0, %v3511_v42  ;;  %3514 = vpow2.f32 %v3243_v0 }
 0xb42   :  { %v2961_v28 = vadd.f32 1.0, %v3513_v21 }
 0xb43   :  { %3516 = vrcp.f32 %v2920_v43  ;;  %v2932_v22 = vand.u32 2147483648, %v2920_v43  ;;  %v2930_v1 = vand.u32 2147483647, %v2920_v43  ;;  %vm2926_vm3 = vweird.f32 %v2920_v43 }
 0xb44   :  { %3518 = vrcp.f32 %v2961_v28  ;;  %v2973_v20 = vand.u32 2147483648, %v2961_v28  ;;  %v2971_v25 = vand.u32 2147483647, %v2961_v28  ;;  %vm2967_vm4 = vweird.f32 %v2961_v28 }
 0xb45   :  { %v2933_v52 = vor.u32 1.1754944e-38, %v2932_v22  ;;  %vm2931_vm7 = vcmp.eq.f32.partialorder %v2930_v1, 8.507059e+37 }
 0xb46   :  { %v2974_v54 = vor.u32 1.1754944e-38, %v2973_v20  ;;  %vm2972_vm8 = vcmp.eq.f32.partialorder %v2971_v25, 8.507059e+37 }
 0xb47   :  { %v3515_v45 = vpop.eup %3514 }
 0xb48   :  { %v3025_v51 = vadd.f32 1.0, %v3515_v45 }
 0xb49   :  { %v3517_v46 = vpop.eup %3516 }
 0xb4a   :  { %v3519_v48 = vpop.eup %3518  ;;  %v2922_v49 = vmul.f32 %v3517_v46, %v2920_v43  ;;  %3520 = vrcp.f32 %v3025_v51  ;;  %vm2927_vm15 = vweird.f32 %v3517_v46  ;;  %v3037_v7 = vand.u32 2147483648, %v3025_v51 }
 0xb4b   :  { %v2963_v10 = vmul.f32 %v3519_v48, %v2961_v28  ;;  %3522 = vtanh.f32 %v2998_v47  ;;  %vm2968_vm1 = vweird.f32 %v3519_v48  ;;  %vm2928_vm5 = vmor %vm2926_vm3, %vm2927_vm15  ;;  %vm3031_vm10 = vweird.f32 %v3025_v51 }
 0xb4c   :  { %v2923_v14 = vsub.f32 1.0, %v2922_v49  ;;  %vm2969_vm6 = vmor %vm2967_vm4, %vm2968_vm1  ;;  %v3035_v8 = vand.u32 2147483647, %v3025_v51  ;;  %v3038_v12 = vor.u32 1.1754944e-38, %v3037_v7 }
 0xb4d   :  { %v2964_v15 = vsub.f32 1.0, %v2963_v10 }
 0xb4e   :  { %v2924_v63 = vmul.f32 %v3517_v46, %v2923_v14  ;;  %vm3036_vm12 = vcmp.eq.f32.partialorder %v3035_v8, 8.507059e+37 }
 0xb4f   :  { %v2965_v23 = vmul.f32 %v3519_v48, %v2964_v15 }
 0xb50   :  { %v3521_v50 = vpop.eup %3520  ;;  %v2925_v30 = vadd.f32 %v3517_v46, %v2924_v63 }
 0xb51   :  { %v2966_v31 = vadd.f32 %v3519_v48, %v2965_v23  ;;  %v3027_v53 = vmul.f32 %v3521_v50, %v3025_v51  ;;  %v3523_v56 = vpop.eup %3522  ;;  %vm3032_vm9 = vweird.f32 %v3521_v50 }
 0xb52   :  { %v2929_v55 = vsel %vm2928_vm5, %v3517_v46, %v2925_v30  ;;  %vm3033_vm11 = vmor %vm3031_vm10, %vm3032_vm9 }
 0xb53   :  { %v2934_v58 = vsel %vm2931_vm7, %v2933_v52, %v2929_v55  ;;  %v2970_v59 = vsel %vm2969_vm6, %v3519_v48, %v2966_v31  ;;  %v3028_v60 = vsub.f32 1.0, %v3027_v53 }
 0xb54   :  { %v2975_v61 = vsel %vm2972_vm8, %v2974_v54, %v2970_v59  ;;  %v3043_v2 = vmul.f32 %v3523_v56, %v2934_v58 }
 0xb55   :  { %v3042_v3 = vmul.f32 %v3041_v62, %v2975_v61  ;;  %v3029_v4 = vmul.f32 %v3521_v50, %v3028_v60 }
 0xb57   :  { %v3044_v5 = vadd.f32 %v3043_v2, %v3042_v3  ;;  %v3030_v6 = vadd.f32 %v3521_v50, %v3029_v4 }
 0xb59   :  { %3524 = vtanh.f32 %v3044_v5  ;;  %3047 = vst.msk [vmem:[#allocation8] sm:$0x3] %vm301_vm0, %v3044_v5  ;;  %v3034_v9 = vsel %vm3033_vm11, %v3521_v50, %v3030_v6 }
 0xb5a   :  { %v3039_v29 = vsel %vm3036_vm12, %v3038_v12, %v3034_v9 }
 0xb5f   :  { %v3525_v17 = vpop.eup %3524 }
 0xb60   :  { %v3046_v26 = vmul.f32 %v3525_v17, %v3039_v29 }
 0xb62   :  { %3048 = vst.msk [vmem:[#allocation7] sm:$0x3] %vm301_vm0, %v3046_v26 }
 0xb63   :  { %3049 = vst.msk [vmem:[#allocation2 + $0xe] sm:$0x3] %vm301_vm0, %v3046_v26 }
 0xb6a   :  { %v3051_v32 = vld [vmem:[#allocation2 + $0x8] sm:$0xff] }
 0xb6b   :  { %3245 = vmatmul.msk.f32.gmra.mxu0 %vm180_vm2, %v3051_v32 }
 0xbe8   :  { %v3086_v33 = vpop.f32.mrf.mxu0 }
 0xbe9   :  { %v3087_v27 = vadd.f32 %v4427_v11, %v3086_v33 }
 0xbeb   :  { %3090 = vst [vmem:[#allocation21 + $0x8] sm:$0xff] %v3087_v27 }
 0xbec   :  { %3103 = dma.vmem_to_hbm [thread:$0]  %s3096_s29, 256, %s3098_s11, [#allocation11], %s3761_s17, %s3761_s17, %s3762_s18  }
 0xbed   :  { %3758 = dma.done.wait [#allocation11], 256  }
 0xbee   :  { %3759 = vsyncadd [#allocation11], 4294967040 }
 0xbef   :  { %3108 = vsyncpa [#allocation10], 1 }
 0xbf0   :  { %3109 = vsyncpa [#allocation13], 1 }
 0xbf1   :  { %3110 = vsyncpa [#allocation16], 1 }
 0xbf2   :  { %3111 = vsyncpa [#allocation19], 1 }
 0xbf3   :  { %3112 = vsyncpa [#allocation11], 1 }

</bundles_post_ra>
